<compile_context>
chip_gen: v6e
topology: v6e:2x2x1
jax: 0.10.0
libtpu: 0.0.40
codegen_flags: <defaults>
</compile_context>

<pallas_src>
import numpy as np
import jax
import jax.numpy as jnp
from jax import lax
from jax.experimental import pallas as pl
from jax.experimental.pallas import tpu as pltpu


# ----------------------------------------------------------------------------
# Fused Pallas kernel: 3x GlobalLocalFilter + quadratic fuse, one batch element
# per grid step, all filters/channels batched along the leading ("page") dim.
# ----------------------------------------------------------------------------
def quadra_glf_kernel(x_ref,
                      pw1_ref, pb1_ref, pw2_ref, pb2_ref,   # pre-norm affine  (NC,1,1)
                      dw_ref,                               # depthwise 3x3    (NC,3,3)
                      cwr_ref, cwi_ref,                     # complex weight   (NC,H,Wf)
                      pwe_ref, pbe_ref, pwo_ref, pbo_ref,   # post-norm affine (NC,1,1)
                      fw_ref, fhr_ref, fhi_ref, iw_ref,     # DFT matrices (replicated)
                      o_ref):
    f32 = jnp.float32
    eps = 1e-6
    C, H, W = x_ref.shape[1], x_ref.shape[2], x_ref.shape[3]
    C2 = C // 2
    NC = dw_ref.shape[0]          # NC = NF * C2, channels stacked filter-major
    NF = NC // C2                 # 3 filters: a, b, c of  a*b + c
    Wf = cwr_ref.shape[2]

    # ---- shared pre-LayerNorm statistics (channels_first, biased variance) --
    # (normalization stats do not depend on per-filter affine params, so they
    #  are computed once and shared by all three filters)
    xc = x_ref[0].astype(f32)                              # (C, H, W)
    u = xc[0]
    for c in range(1, C):                                  # tiny unrolled page reduce
        u = u + xc[c]
    u = u * (1.0 / C)                                      # (H, W)
    d = xc - u
    v = d[0] * d[0]
    for c in range(1, C):
        v = v + d[c] * d[c]
    xn = d * lax.rsqrt(v * (1.0 / C) + eps)                # (C, H, W)

    # per-filter pre-norm affine, channels stacked filter-major: n = f*C2 + c
    xh1 = xn[:C2]                                          # conv half
    xh2 = xn[C2:]                                          # spectral half
    x1 = jnp.concatenate([xh1] * NF, axis=0) * pw1_ref[...] + pb1_ref[...]   # (NC,H,W)
    x2 = jnp.concatenate([xh2] * NF, axis=0) * pw2_ref[...] + pb2_ref[...]   # (NC,H,W)

    # ---- local branch: depthwise 3x3 conv, padding=1, no bias (VPU only) ----
    zrow = jnp.zeros((NC, 1, W), f32)
    zcol = jnp.zeros((NC, H + 2, 1), f32)
    xp = jnp.concatenate([zrow, x1, zrow], axis=1)         # (NC, H+2, W)
    xp = jnp.concatenate([zcol, xp, zcol], axis=2)         # (NC, H+2, W+2)
    dw = dw_ref[...]                                       # (NC, 3, 3)
    y1 = None
    for kh in range(3):
        for kw in range(3):
            tap = xp[:, kh:kh + H, kw:kw + W]              # x[i+kh-1, j+kw-1], 0-padded
            term = dw[:, kh:kh + 1, kw:kw + 1] * tap       # per-channel scalar bcast
            y1 = term if y1 is None else y1 + term         # (NC, H, W)

    # ---- global branch: rfft2(ortho) * complex_weight -> irfft2(ortho) ------
    # real/imag packed along the lane dim; all matmuls batched over NC.
    zs = jnp.einsum('nhw,nwk->nhk', x2, fw_ref[...],
                    preferred_element_type=f32)            # (NC,H,2Wf) = [zr | zi]
    ya = jnp.einsum('nkm,nmw->nkw', fhr_ref[...], zs, preferred_element_type=f32)
    yb = jnp.einsum('nkm,nmw->nkw', fhi_ref[...], zs, preferred_element_type=f32)
    yr = ya[:, :, :Wf] - yb[:, :, Wf:]                     # Re(FH @ Z)
    yi = ya[:, :, Wf:] + yb[:, :, :Wf]                     # Im(FH @ Z)
    wr = cwr_ref[...]
    wi = cwi_ref[...]
    ur = yr * wr - yi * wi                                 # complex weight multiply
    ui = yr * wi + yi * wr
    us = jnp.concatenate([ur, ui], axis=2)                 # (NC,H,2Wf)
    va = jnp.einsum('nkm,nmw->nkw', fhr_ref[...], us, preferred_element_type=f32)
    vb = jnp.einsum('nkm,nmw->nkw', fhi_ref[...], us, preferred_element_type=f32)
    vr = va[:, :, :Wf] + vb[:, :, Wf:]                     # Re(conj(FH) @ U)
    vi = va[:, :, Wf:] - vb[:, :, :Wf]                     # Im(conj(FH) @ U)
    vc = jnp.concatenate([vr, vi], axis=2)                 # (NC,H,2Wf)
    y2 = jnp.einsum('nhk,nkw->nhw', vc, iw_ref[...],
                    preferred_element_type=f32)            # (NC,H,W) real

    # ---- per-filter post-LayerNorm (interleave handled via split weights) ---
    pwe = pwe_ref[...]; pbe = pbe_ref[...]
    pwo = pwo_ref[...]; pbo = pbo_ref[...]
    outs_e = []   # even output channels (conv half) per filter
    outs_o = []   # odd  output channels (fft  half) per filter
    for f in range(NF):
        a1 = y1[f * C2:(f + 1) * C2]                       # (C2,H,W)
        a2 = y2[f * C2:(f + 1) * C2]
        s = a1[0] + a2[0]
        for c in range(1, C2):
            s = s + a1[c] + a2[c]
        m = s * (1.0 / C)                                  # mean over all C channels
        d1 = a1 - m
        d2 = a2 - m
        vv = d1[0] * d1[0] + d2[0] * d2[0]
        for c in range(1, C2):
            vv = vv + d1[c] * d1[c] + d2[c] * d2[c]
        inv = lax.rsqrt(vv * (1.0 / C) + eps)
        sl = slice(f * C2, (f + 1) * C2)
        outs_e.append(d1 * inv * pwe[sl] + pbe[sl])
        outs_o.append(d2 * inv * pwo[sl] + pbo[sl])

    # ---- quadratic fuse: out = glf_a(x) * glf_b(x) + glf_c(x) ---------------
    fe = outs_e[0] * outs_e[1] + outs_e[2]                 # even channels (C2,H,W)
    fo = outs_o[0] * outs_o[1] + outs_o[2]                 # odd  channels (C2,H,W)

    # channel interleave: out[2c] = conv branch, out[2c+1] = fft branch
    parts = []
    for c in range(C2):
        parts.append(fe[c:c + 1])
        parts.append(fo[c:c + 1])
    res = jnp.concatenate(parts, axis=0)                   # (C,H,W)

    o_ref[0] = res.astype(o_ref.dtype)                     # single full-block store


# ----------------------------------------------------------------------------
# Host-side preparation: DFT matrices, stacked / kernel-ready parameters
# ----------------------------------------------------------------------------
def _dft_mats(H, W):
    Wf = W // 2 + 1
    n = np.arange(W)[:, None]; k = np.arange(Wf)[None, :]
    ang = 2.0 * np.pi * n * k / W
    fwr = np.cos(ang) / np.sqrt(W)                 # rfft along W, ortho
    fwi = -np.sin(ang) / np.sqrt(W)
    m = np.arange(H)[:, None]; h = np.arange(H)[None, :]
    angh = 2.0 * np.pi * m * h / H
    fhr = np.cos(angh) / np.sqrt(H)                # fft along H, ortho (symmetric)
    fhi = -np.sin(angh) / np.sqrt(H)
    wk = np.full((Wf,), 2.0)                       # Hermitian weights for irfft
    wk[0] = 1.0
    if W % 2 == 0:
        wk[-1] = 1.0
    kk = np.arange(Wf)[:, None]; nn = np.arange(W)[None, :]
    angi = 2.0 * np.pi * kk * nn / W
    iwr = wk[:, None] * np.cos(angi) / np.sqrt(W)  # irfft along W, ortho
    iwi = -wk[:, None] * np.sin(angi) / np.sqrt(W)
    return fwr, fwi, fhr, fhi, iwr, iwi


def init_glf_params(key, dim, h=14, w=8):
    """Parameter shapes follow GlobalLocalFilter.__init__ (deterministic, synthetic)."""
    c2 = dim // 2
    k1, k2 = jax.random.split(key)
    dw_w = jax.random.normal(k1, (c2, 3, 3), jnp.float32) * (1.0 / 3.0)
    cw = jax.random.normal(k2, (c2, h, w, 2), jnp.float32) * 0.02
    return dict(
        pre_w=jnp.ones((dim,), jnp.float32), pre_b=jnp.zeros((dim,), jnp.float32),
        dw_w=dw_w, cw_r=cw[..., 0], cw_i=cw[..., 1],
        post_w=jnp.ones((dim,), jnp.float32), post_b=jnp.zeros((dim,), jnp.float32),
    )


def prepare_quadra_params(filter_params, dim, H, W):
    """Stack the three filters' params filter-major (n = f*C2 + c) and build the
    DFT constants, all done once outside the jitted forward."""
    C2 = dim // 2
    NC = len(filter_params) * C2

    def stack(fn):
        return jnp.concatenate([jnp.asarray(fn(p), jnp.float32) for p in filter_params], axis=0)

    prep = dict(
        pw1=stack(lambda p: p["pre_w"][:C2]).reshape(NC, 1, 1),
        pb1=stack(lambda p: p["pre_b"][:C2]).reshape(NC, 1, 1),
        pw2=stack(lambda p: p["pre_w"][C2:]).reshape(NC, 1, 1),
        pb2=stack(lambda p: p["pre_b"][C2:]).reshape(NC, 1, 1),
        dw=stack(lambda p: p["dw_w"]),                       # (NC,3,3)
        cwr=stack(lambda p: p["cw_r"]),                      # (NC,H,Wf)
        cwi=stack(lambda p: p["cw_i"]),
        pwe=stack(lambda p: p["post_w"][0::2]).reshape(NC, 1, 1),
        pbe=stack(lambda p: p["post_b"][0::2]).reshape(NC, 1, 1),
        pwo=stack(lambda p: p["post_w"][1::2]).reshape(NC, 1, 1),
        pbo=stack(lambda p: p["post_b"][1::2]).reshape(NC, 1, 1),
    )

    fwr, fwi, fhr, fhi, iwr, iwi = _dft_mats(H, W)
    fw = np.concatenate([fwr, fwi], axis=1)                  # (W, 2Wf)  [re | im]
    iw = np.concatenate([iwr, iwi], axis=0)                  # (2Wf, W)  [re ; im]

    def rep(a):  # replicate for the batched einsums
        return jnp.asarray(np.broadcast_to(a, (NC,) + a.shape).copy(), jnp.float32)

    prep.update(fw=rep(fw), fhr=rep(fhr), fhi=rep(fhi), iw=rep(iw))
    return prep


# ----------------------------------------------------------------------------
# Forward: single fused pallas_call
# ----------------------------------------------------------------------------
@jax.jit
def quadra_conv_gf(x, prep):
    B, C, H, W = x.shape
    NC = prep["dw"].shape[0]
    Wf = W // 2 + 1

    def cspec(shape):
        n = len(shape)
        return pl.BlockSpec(shape, lambda b: (0,) * n)       # resident constants

    return pl.pallas_call(
        quadra_glf_kernel,
        out_shape=jax.ShapeDtypeStruct((B, C, H, W), jnp.float32),
        grid=(B,),
        in_specs=[
            pl.BlockSpec((1, C, H, W), lambda b: (b, 0, 0, 0)),   # x
            cspec((NC, 1, 1)), cspec((NC, 1, 1)),                 # pre_w/b (conv half)
            cspec((NC, 1, 1)), cspec((NC, 1, 1)),                 # pre_w/b (fft half)
            cspec((NC, 3, 3)),                                    # depthwise weights
            cspec((NC, H, Wf)), cspec((NC, H, Wf)),               # complex weight re/im
            cspec((NC, 1, 1)), cspec((NC, 1, 1)),                 # post_w/b (even chans)
            cspec((NC, 1, 1)), cspec((NC, 1, 1)),                 # post_w/b (odd chans)
            cspec((NC, W, 2 * Wf)),                               # [fwr | fwi]
            cspec((NC, H, H)), cspec((NC, H, H)),                 # fhr, fhi
            cspec((NC, 2 * Wf, W)),                               # [iwr ; iwi]
        ],
        out_specs=pl.BlockSpec((1, C, H, W), lambda b: (b, 0, 0, 0)),
        compiler_params=pltpu.CompilerParams(dimension_semantics=("parallel",)),
    )(x, prep["pw1"], prep["pb1"], prep["pw2"], prep["pb2"], prep["dw"],
      prep["cwr"], prep["cwi"], prep["pwe"], prep["pbe"], prep["pwo"], prep["pbo"],
      prep["fw"], prep["fhr"], prep["fhi"], prep["iw"])


# ----------------------------------------------------------------------------
if __name__ == "__main__":
    # H=W=14 => rfft2 output (14, 8) matches default complex_weight (h=14, w=8).
    B, C, H, W = 2, 4, 14, 14
    key = jax.random.PRNGKey(0)
    kx, k1, k2, k3 = jax.random.split(key, 4)

    x = jax.random.normal(kx, (B, C, H, W), jnp.float32)
    fps = [init_glf_params(k1, C), init_glf_params(k2, C), init_glf_params(k3, C)]
    prep = prepare_quadra_params(fps, C, H, W)

    out = quadra_conv_gf(x, prep)
    out = jax.block_until_ready(out)
    assert out.shape == (B, C, H, W) and out.dtype == jnp.float32
    assert bool(jnp.isfinite(out).all())
    print("KERNEL_OK")
</pallas_src>

<mosaic_0001>
module attributes {stable_mosaic.version = 11 : i64} {
  func.func @quadra_glf_kernel(%arg0: i32, %arg1: memref<1x4x14x14xf32, #tpu.memory_space<vmem>>, %arg2: memref<6x1x1xf32, #tpu.memory_space<vmem>>, %arg3: memref<6x1x1xf32, #tpu.memory_space<vmem>>, %arg4: memref<6x1x1xf32, #tpu.memory_space<vmem>>, %arg5: memref<6x1x1xf32, #tpu.memory_space<vmem>>, %arg6: memref<6x3x3xf32, #tpu.memory_space<vmem>>, %arg7: memref<6x14x8xf32, #tpu.memory_space<vmem>>, %arg8: memref<6x14x8xf32, #tpu.memory_space<vmem>>, %arg9: memref<6x1x1xf32, #tpu.memory_space<vmem>>, %arg10: memref<6x1x1xf32, #tpu.memory_space<vmem>>, %arg11: memref<6x1x1xf32, #tpu.memory_space<vmem>>, %arg12: memref<6x1x1xf32, #tpu.memory_space<vmem>>, %arg13: memref<6x14x16xf32, #tpu.memory_space<vmem>>, %arg14: memref<6x14x14xf32, #tpu.memory_space<vmem>>, %arg15: memref<6x14x14xf32, #tpu.memory_space<vmem>>, %arg16: memref<6x16x14xf32, #tpu.memory_space<vmem>>, %arg17: memref<1x4x14x14xf32, #tpu.memory_space<vmem>>) attributes {dimension_semantics = [#tpu.dimension_semantics<parallel>], iteration_bounds = array<i64: 2>, scalar_prefetch = 0 : i64, scratch_operands = 0 : i64, tpu.core_type = #tpu.core_type<tc>, window_params = [{transform_indices = @transform_0, window_bounds = array<i64: 1, 4, 14, 14>}, {pipeline_mode = #tpu.pipeline_mode<synchronous>, transform_indices = @transform_1, window_bounds = array<i64: 6, 1, 1>}, {pipeline_mode = #tpu.pipeline_mode<synchronous>, transform_indices = @transform_2, window_bounds = array<i64: 6, 1, 1>}, {pipeline_mode = #tpu.pipeline_mode<synchronous>, transform_indices = @transform_3, window_bounds = array<i64: 6, 1, 1>}, {pipeline_mode = #tpu.pipeline_mode<synchronous>, transform_indices = @transform_4, window_bounds = array<i64: 6, 1, 1>}, {pipeline_mode = #tpu.pipeline_mode<synchronous>, transform_indices = @transform_5, window_bounds = array<i64: 6, 3, 3>}, {pipeline_mode = #tpu.pipeline_mode<synchronous>, transform_indices = @transform_6, window_bounds = array<i64: 6, 14, 8>}, {pipeline_mode = #tpu.pipeline_mode<synchronous>, transform_indices = @transform_7, window_bounds = array<i64: 6, 14, 8>}, {pipeline_mode = #tpu.pipeline_mode<synchronous>, transform_indices = @transform_8, window_bounds = array<i64: 6, 1, 1>}, {pipeline_mode = #tpu.pipeline_mode<synchronous>, transform_indices = @transform_9, window_bounds = array<i64: 6, 1, 1>}, {pipeline_mode = #tpu.pipeline_mode<synchronous>, transform_indices = @transform_10, window_bounds = array<i64: 6, 1, 1>}, {pipeline_mode = #tpu.pipeline_mode<synchronous>, transform_indices = @transform_11, window_bounds = array<i64: 6, 1, 1>}, {pipeline_mode = #tpu.pipeline_mode<synchronous>, transform_indices = @transform_12, window_bounds = array<i64: 6, 14, 16>}, {pipeline_mode = #tpu.pipeline_mode<synchronous>, transform_indices = @transform_13, window_bounds = array<i64: 6, 14, 14>}, {pipeline_mode = #tpu.pipeline_mode<synchronous>, transform_indices = @transform_14, window_bounds = array<i64: 6, 14, 14>}, {pipeline_mode = #tpu.pipeline_mode<synchronous>, transform_indices = @transform_15, window_bounds = array<i64: 6, 16, 14>}, {transform_indices = @transform_16, window_bounds = array<i64: 1, 4, 14, 14>}]} {
    %c0 = arith.constant 0 : index
    %c0_0 = arith.constant 0 : index
    %c0_1 = arith.constant 0 : index
    %c0_2 = arith.constant 0 : index
    %0 = vector.load %arg1[%c0, %c0_0, %c0_1, %c0_2] : memref<1x4x14x14xf32, #tpu.memory_space<vmem>>, vector<1x4x14x14xf32>
    %1 = vector.shape_cast %0 : vector<1x4x14x14xf32> to vector<4x14x14xf32>
    %2 = vector.extract_strided_slice %1 {offsets = [0, 0, 0], sizes = [1, 14, 14], strides = [1, 1, 1]} : vector<4x14x14xf32> to vector<1x14x14xf32>
    %3 = vector.shape_cast %2 : vector<1x14x14xf32> to vector<14x14xf32>
    %4 = vector.extract_strided_slice %1 {offsets = [1, 0, 0], sizes = [1, 14, 14], strides = [1, 1, 1]} : vector<4x14x14xf32> to vector<1x14x14xf32>
    %5 = vector.shape_cast %4 : vector<1x14x14xf32> to vector<14x14xf32>
    %6 = arith.addf %3, %5 : vector<14x14xf32>
    %7 = vector.extract_strided_slice %1 {offsets = [2, 0, 0], sizes = [1, 14, 14], strides = [1, 1, 1]} : vector<4x14x14xf32> to vector<1x14x14xf32>
    %8 = vector.shape_cast %7 : vector<1x14x14xf32> to vector<14x14xf32>
    %9 = arith.addf %6, %8 : vector<14x14xf32>
    %10 = vector.extract_strided_slice %1 {offsets = [3, 0, 0], sizes = [1, 14, 14], strides = [1, 1, 1]} : vector<4x14x14xf32> to vector<1x14x14xf32>
    %11 = vector.shape_cast %10 : vector<1x14x14xf32> to vector<14x14xf32>
    %12 = arith.addf %9, %11 : vector<14x14xf32>
    %cst = arith.constant 2.500000e-01 : f32
    %13 = vector.broadcast %cst : f32 to vector<14x14xf32>
    %14 = arith.mulf %12, %13 : vector<14x14xf32>
    %15 = vector.shape_cast %14 : vector<14x14xf32> to vector<1x14x14xf32>
    %16 = vector.broadcast %15 : vector<1x14x14xf32> to vector<4x14x14xf32>
    %17 = arith.subf %1, %16 : vector<4x14x14xf32>
    %18 = vector.extract_strided_slice %17 {offsets = [0, 0, 0], sizes = [1, 14, 14], strides = [1, 1, 1]} : vector<4x14x14xf32> to vector<1x14x14xf32>
    %19 = vector.shape_cast %18 : vector<1x14x14xf32> to vector<14x14xf32>
    %20 = vector.extract_strided_slice %17 {offsets = [0, 0, 0], sizes = [1, 14, 14], strides = [1, 1, 1]} : vector<4x14x14xf32> to vector<1x14x14xf32>
    %21 = vector.shape_cast %20 : vector<1x14x14xf32> to vector<14x14xf32>
    %22 = arith.mulf %19, %21 : vector<14x14xf32>
    %23 = vector.extract_strided_slice %17 {offsets = [1, 0, 0], sizes = [1, 14, 14], strides = [1, 1, 1]} : vector<4x14x14xf32> to vector<1x14x14xf32>
    %24 = vector.shape_cast %23 : vector<1x14x14xf32> to vector<14x14xf32>
    %25 = vector.extract_strided_slice %17 {offsets = [1, 0, 0], sizes = [1, 14, 14], strides = [1, 1, 1]} : vector<4x14x14xf32> to vector<1x14x14xf32>
    %26 = vector.shape_cast %25 : vector<1x14x14xf32> to vector<14x14xf32>
    %27 = arith.mulf %24, %26 : vector<14x14xf32>
    %28 = arith.addf %22, %27 : vector<14x14xf32>
    %29 = vector.extract_strided_slice %17 {offsets = [2, 0, 0], sizes = [1, 14, 14], strides = [1, 1, 1]} : vector<4x14x14xf32> to vector<1x14x14xf32>
    %30 = vector.shape_cast %29 : vector<1x14x14xf32> to vector<14x14xf32>
    %31 = vector.extract_strided_slice %17 {offsets = [2, 0, 0], sizes = [1, 14, 14], strides = [1, 1, 1]} : vector<4x14x14xf32> to vector<1x14x14xf32>
    %32 = vector.shape_cast %31 : vector<1x14x14xf32> to vector<14x14xf32>
    %33 = arith.mulf %30, %32 : vector<14x14xf32>
    %34 = arith.addf %28, %33 : vector<14x14xf32>
    %35 = vector.extract_strided_slice %17 {offsets = [3, 0, 0], sizes = [1, 14, 14], strides = [1, 1, 1]} : vector<4x14x14xf32> to vector<1x14x14xf32>
    %36 = vector.shape_cast %35 : vector<1x14x14xf32> to vector<14x14xf32>
    %37 = vector.extract_strided_slice %17 {offsets = [3, 0, 0], sizes = [1, 14, 14], strides = [1, 1, 1]} : vector<4x14x14xf32> to vector<1x14x14xf32>
    %38 = vector.shape_cast %37 : vector<1x14x14xf32> to vector<14x14xf32>
    %39 = arith.mulf %36, %38 : vector<14x14xf32>
    %40 = arith.addf %34, %39 : vector<14x14xf32>
    %cst_3 = arith.constant 2.500000e-01 : f32
    %41 = vector.broadcast %cst_3 : f32 to vector<14x14xf32>
    %42 = arith.mulf %40, %41 : vector<14x14xf32>
    %cst_4 = arith.constant 9.99999997E-7 : f32
    %43 = vector.broadcast %cst_4 : f32 to vector<14x14xf32>
    %44 = arith.addf %42, %43 : vector<14x14xf32>
    %45 = math.rsqrt %44 : vector<14x14xf32>
    %46 = vector.shape_cast %45 : vector<14x14xf32> to vector<1x14x14xf32>
    %47 = vector.broadcast %46 : vector<1x14x14xf32> to vector<4x14x14xf32>
    %48 = arith.mulf %17, %47 : vector<4x14x14xf32>
    %49 = vector.extract_strided_slice %48 {offsets = [0, 0, 0], sizes = [2, 14, 14], strides = [1, 1, 1]} : vector<4x14x14xf32> to vector<2x14x14xf32>
    %50 = vector.extract_strided_slice %48 {offsets = [2, 0, 0], sizes = [2, 14, 14], strides = [1, 1, 1]} : vector<4x14x14xf32> to vector<2x14x14xf32>
    %51 = tpu.concatenate %49, %49, %49 in 0 : vector<2x14x14xf32>, vector<2x14x14xf32>, vector<2x14x14xf32> -> vector<6x14x14xf32>
    %c0_5 = arith.constant 0 : index
    %c0_6 = arith.constant 0 : index
    %c0_7 = arith.constant 0 : index
    %52 = vector.load %arg2[%c0_5, %c0_6, %c0_7] : memref<6x1x1xf32, #tpu.memory_space<vmem>>, vector<6x1x1xf32>
    %53 = vector.broadcast %52 : vector<6x1x1xf32> to vector<6x14x14xf32>
    %54 = arith.mulf %51, %53 : vector<6x14x14xf32>
    %c0_8 = arith.constant 0 : index
    %c0_9 = arith.constant 0 : index
    %c0_10 = arith.constant 0 : index
    %55 = vector.load %arg3[%c0_8, %c0_9, %c0_10] : memref<6x1x1xf32, #tpu.memory_space<vmem>>, vector<6x1x1xf32>
    %56 = vector.broadcast %55 : vector<6x1x1xf32> to vector<6x14x14xf32>
    %57 = arith.addf %54, %56 : vector<6x14x14xf32>
    %58 = tpu.concatenate %50, %50, %50 in 0 : vector<2x14x14xf32>, vector<2x14x14xf32>, vector<2x14x14xf32> -> vector<6x14x14xf32>
    %c0_11 = arith.constant 0 : index
    %c0_12 = arith.constant 0 : index
    %c0_13 = arith.constant 0 : index
    %59 = vector.load %arg4[%c0_11, %c0_12, %c0_13] : memref<6x1x1xf32, #tpu.memory_space<vmem>>, vector<6x1x1xf32>
    %60 = vector.broadcast %59 : vector<6x1x1xf32> to vector<6x14x14xf32>
    %61 = arith.mulf %58, %60 : vector<6x14x14xf32>
    %c0_14 = arith.constant 0 : index
    %c0_15 = arith.constant 0 : index
    %c0_16 = arith.constant 0 : index
    %62 = vector.load %arg5[%c0_14, %c0_15, %c0_16] : memref<6x1x1xf32, #tpu.memory_space<vmem>>, vector<6x1x1xf32>
    %63 = vector.broadcast %62 : vector<6x1x1xf32> to vector<6x14x14xf32>
    %64 = arith.addf %61, %63 : vector<6x14x14xf32>
    %cst_17 = arith.constant 0.000000e+00 : f32
    %65 = vector.broadcast %cst_17 : f32 to vector<6x1x14xf32>
    %cst_18 = arith.constant 0.000000e+00 : f32
    %66 = vector.broadcast %cst_18 : f32 to vector<6x16x1xf32>
    %67 = tpu.concatenate %65, %57, %65 in 1 : vector<6x1x14xf32>, vector<6x14x14xf32>, vector<6x1x14xf32> -> vector<6x16x14xf32>
    %68 = tpu.concatenate %66, %67, %66 in 2 : vector<6x16x1xf32>, vector<6x16x14xf32>, vector<6x16x1xf32> -> vector<6x16x16xf32>
    %c0_19 = arith.constant 0 : index
    %c0_20 = arith.constant 0 : index
    %c0_21 = arith.constant 0 : index
    %69 = vector.load %arg6[%c0_19, %c0_20, %c0_21] : memref<6x3x3xf32, #tpu.memory_space<vmem>>, vector<6x3x3xf32>
    %70 = vector.extract_strided_slice %68 {offsets = [0, 0, 0], sizes = [6, 14, 14], strides = [1, 1, 1]} : vector<6x16x16xf32> to vector<6x14x14xf32>
    %71 = vector.extract_strided_slice %69 {offsets = [0, 0, 0], sizes = [6, 1, 1], strides = [1, 1, 1]} : vector<6x3x3xf32> to vector<6x1x1xf32>
    %72 = vector.broadcast %71 : vector<6x1x1xf32> to vector<6x14x14xf32>
    %73 = arith.mulf %72, %70 : vector<6x14x14xf32>
    %74 = vector.extract_strided_slice %68 {offsets = [0, 0, 1], sizes = [6, 14, 14], strides = [1, 1, 1]} : vector<6x16x16xf32> to vector<6x14x14xf32>
    %75 = vector.extract_strided_slice %69 {offsets = [0, 0, 1], sizes = [6, 1, 1], strides = [1, 1, 1]} : vector<6x3x3xf32> to vector<6x1x1xf32>
    %76 = vector.broadcast %75 : vector<6x1x1xf32> to vector<6x14x14xf32>
    %77 = arith.mulf %76, %74 : vector<6x14x14xf32>
    %78 = arith.addf %73, %77 : vector<6x14x14xf32>
    %79 = vector.extract_strided_slice %68 {offsets = [0, 0, 2], sizes = [6, 14, 14], strides = [1, 1, 1]} : vector<6x16x16xf32> to vector<6x14x14xf32>
    %80 = vector.extract_strided_slice %69 {offsets = [0, 0, 2], sizes = [6, 1, 1], strides = [1, 1, 1]} : vector<6x3x3xf32> to vector<6x1x1xf32>
    %81 = vector.broadcast %80 : vector<6x1x1xf32> to vector<6x14x14xf32>
    %82 = arith.mulf %81, %79 : vector<6x14x14xf32>
    %83 = arith.addf %78, %82 : vector<6x14x14xf32>
    %84 = vector.extract_strided_slice %68 {offsets = [0, 1, 0], sizes = [6, 14, 14], strides = [1, 1, 1]} : vector<6x16x16xf32> to vector<6x14x14xf32>
    %85 = vector.extract_strided_slice %69 {offsets = [0, 1, 0], sizes = [6, 1, 1], strides = [1, 1, 1]} : vector<6x3x3xf32> to vector<6x1x1xf32>
    %86 = vector.broadcast %85 : vector<6x1x1xf32> to vector<6x14x14xf32>
    %87 = arith.mulf %86, %84 : vector<6x14x14xf32>
    %88 = arith.addf %83, %87 : vector<6x14x14xf32>
    %89 = vector.extract_strided_slice %68 {offsets = [0, 1, 1], sizes = [6, 14, 14], strides = [1, 1, 1]} : vector<6x16x16xf32> to vector<6x14x14xf32>
    %90 = vector.extract_strided_slice %69 {offsets = [0, 1, 1], sizes = [6, 1, 1], strides = [1, 1, 1]} : vector<6x3x3xf32> to vector<6x1x1xf32>
    %91 = vector.broadcast %90 : vector<6x1x1xf32> to vector<6x14x14xf32>
    %92 = arith.mulf %91, %89 : vector<6x14x14xf32>
    %93 = arith.addf %88, %92 : vector<6x14x14xf32>
    %94 = vector.extract_strided_slice %68 {offsets = [0, 1, 2], sizes = [6, 14, 14], strides = [1, 1, 1]} : vector<6x16x16xf32> to vector<6x14x14xf32>
    %95 = vector.extract_strided_slice %69 {offsets = [0, 1, 2], sizes = [6, 1, 1], strides = [1, 1, 1]} : vector<6x3x3xf32> to vector<6x1x1xf32>
    %96 = vector.broadcast %95 : vector<6x1x1xf32> to vector<6x14x14xf32>
    %97 = arith.mulf %96, %94 : vector<6x14x14xf32>
    %98 = arith.addf %93, %97 : vector<6x14x14xf32>
    %99 = vector.extract_strided_slice %68 {offsets = [0, 2, 0], sizes = [6, 14, 14], strides = [1, 1, 1]} : vector<6x16x16xf32> to vector<6x14x14xf32>
    %100 = vector.extract_strided_slice %69 {offsets = [0, 2, 0], sizes = [6, 1, 1], strides = [1, 1, 1]} : vector<6x3x3xf32> to vector<6x1x1xf32>
    %101 = vector.broadcast %100 : vector<6x1x1xf32> to vector<6x14x14xf32>
    %102 = arith.mulf %101, %99 : vector<6x14x14xf32>
    %103 = arith.addf %98, %102 : vector<6x14x14xf32>
    %104 = vector.extract_strided_slice %68 {offsets = [0, 2, 1], sizes = [6, 14, 14], strides = [1, 1, 1]} : vector<6x16x16xf32> to vector<6x14x14xf32>
    %105 = vector.extract_strided_slice %69 {offsets = [0, 2, 1], sizes = [6, 1, 1], strides = [1, 1, 1]} : vector<6x3x3xf32> to vector<6x1x1xf32>
    %106 = vector.broadcast %105 : vector<6x1x1xf32> to vector<6x14x14xf32>
    %107 = arith.mulf %106, %104 : vector<6x14x14xf32>
    %108 = arith.addf %103, %107 : vector<6x14x14xf32>
    %109 = vector.extract_strided_slice %68 {offsets = [0, 2, 2], sizes = [6, 14, 14], strides = [1, 1, 1]} : vector<6x16x16xf32> to vector<6x14x14xf32>
    %110 = vector.extract_strided_slice %69 {offsets = [0, 2, 2], sizes = [6, 1, 1], strides = [1, 1, 1]} : vector<6x3x3xf32> to vector<6x1x1xf32>
    %111 = vector.broadcast %110 : vector<6x1x1xf32> to vector<6x14x14xf32>
    %112 = arith.mulf %111, %109 : vector<6x14x14xf32>
    %113 = arith.addf %108, %112 : vector<6x14x14xf32>
    %c0_22 = arith.constant 0 : index
    %c0_23 = arith.constant 0 : index
    %c0_24 = arith.constant 0 : index
    %114 = vector.load %arg13[%c0_22, %c0_23, %c0_24] : memref<6x14x16xf32, #tpu.memory_space<vmem>>, vector<6x14x16xf32>
    "tpu.trace_start"() <{level = 10 : i32, message = "nhw,nwk->nhk"}> : () -> ()
    %cst_25 = arith.constant dense<0.000000e+00> : vector<6x14x16xf32>
    %115 = tpu.matmul %64, %114, %cst_25 {dimension_numbers = #tpu.dot_dimension_numbers<[2], [1], [1], [2], [0, 0, 0, 1, 1, 2], [0], [0]>} : vector<6x14x14xf32>, vector<6x14x16xf32>, vector<6x14x16xf32> -> vector<6x14x16xf32>
    "tpu.trace_stop"() : () -> ()
    %c0_26 = arith.constant 0 : index
    %c0_27 = arith.constant 0 : index
    %c0_28 = arith.constant 0 : index
    %116 = vector.load %arg14[%c0_26, %c0_27, %c0_28] : memref<6x14x14xf32, #tpu.memory_space<vmem>>, vector<6x14x14xf32>
    "tpu.trace_start"() <{level = 10 : i32, message = "nkm,nmw->nkw"}> : () -> ()
    %cst_29 = arith.constant dense<0.000000e+00> : vector<6x14x16xf32>
    %117 = tpu.matmul %116, %115, %cst_29 {dimension_numbers = #tpu.dot_dimension_numbers<[2], [1], [1], [2], [0, 0, 0, 1, 1, 2], [0], [0]>} : vector<6x14x14xf32>, vector<6x14x16xf32>, vector<6x14x16xf32> -> vector<6x14x16xf32>
    "tpu.trace_stop"() : () -> ()
    %c0_30 = arith.constant 0 : index
    %c0_31 = arith.constant 0 : index
    %c0_32 = arith.constant 0 : index
    %118 = vector.load %arg15[%c0_30, %c0_31, %c0_32] : memref<6x14x14xf32, #tpu.memory_space<vmem>>, vector<6x14x14xf32>
    "tpu.trace_start"() <{level = 10 : i32, message = "nkm,nmw->nkw"}> : () -> ()
    %cst_33 = arith.constant dense<0.000000e+00> : vector<6x14x16xf32>
    %119 = tpu.matmul %118, %115, %cst_33 {dimension_numbers = #tpu.dot_dimension_numbers<[2], [1], [1], [2], [0, 0, 0, 1, 1, 2], [0], [0]>} : vector<6x14x14xf32>, vector<6x14x16xf32>, vector<6x14x16xf32> -> vector<6x14x16xf32>
    "tpu.trace_stop"() : () -> ()
    %120 = vector.extract_strided_slice %117 {offsets = [0, 0, 0], sizes = [6, 14, 8], strides = [1, 1, 1]} : vector<6x14x16xf32> to vector<6x14x8xf32>
    %121 = vector.extract_strided_slice %119 {offsets = [0, 0, 8], sizes = [6, 14, 8], strides = [1, 1, 1]} : vector<6x14x16xf32> to vector<6x14x8xf32>
    %122 = arith.subf %120, %121 : vector<6x14x8xf32>
    %123 = vector.extract_strided_slice %117 {offsets = [0, 0, 8], sizes = [6, 14, 8], strides = [1, 1, 1]} : vector<6x14x16xf32> to vector<6x14x8xf32>
    %124 = vector.extract_strided_slice %119 {offsets = [0, 0, 0], sizes = [6, 14, 8], strides = [1, 1, 1]} : vector<6x14x16xf32> to vector<6x14x8xf32>
    %125 = arith.addf %123, %124 : vector<6x14x8xf32>
    %c0_34 = arith.constant 0 : index
    %c0_35 = arith.constant 0 : index
    %c0_36 = arith.constant 0 : index
    %126 = vector.load %arg7[%c0_34, %c0_35, %c0_36] : memref<6x14x8xf32, #tpu.memory_space<vmem>>, vector<6x14x8xf32>
    %c0_37 = arith.constant 0 : index
    %c0_38 = arith.constant 0 : index
    %c0_39 = arith.constant 0 : index
    %127 = vector.load %arg8[%c0_37, %c0_38, %c0_39] : memref<6x14x8xf32, #tpu.memory_space<vmem>>, vector<6x14x8xf32>
    %128 = arith.mulf %122, %126 : vector<6x14x8xf32>
    %129 = arith.mulf %125, %127 : vector<6x14x8xf32>
    %130 = arith.subf %128, %129 : vector<6x14x8xf32>
    %131 = arith.mulf %122, %127 : vector<6x14x8xf32>
    %132 = arith.mulf %125, %126 : vector<6x14x8xf32>
    %133 = arith.addf %131, %132 : vector<6x14x8xf32>
    %134 = tpu.concatenate %130, %133 in 2 : vector<6x14x8xf32>, vector<6x14x8xf32> -> vector<6x14x16xf32>
    %c0_40 = arith.constant 0 : index
    %c0_41 = arith.constant 0 : index
    %c0_42 = arith.constant 0 : index
    %135 = vector.load %arg14[%c0_40, %c0_41, %c0_42] : memref<6x14x14xf32, #tpu.memory_space<vmem>>, vector<6x14x14xf32>
    "tpu.trace_start"() <{level = 10 : i32, message = "nkm,nmw->nkw"}> : () -> ()
    %cst_43 = arith.constant dense<0.000000e+00> : vector<6x14x16xf32>
    %136 = tpu.matmul %135, %134, %cst_43 {dimension_numbers = #tpu.dot_dimension_numbers<[2], [1], [1], [2], [0, 0, 0, 1, 1, 2], [0], [0]>} : vector<6x14x14xf32>, vector<6x14x16xf32>, vector<6x14x16xf32> -> vector<6x14x16xf32>
    "tpu.trace_stop"() : () -> ()
    %c0_44 = arith.constant 0 : index
    %c0_45 = arith.constant 0 : index
    %c0_46 = arith.constant 0 : index
    %137 = vector.load %arg15[%c0_44, %c0_45, %c0_46] : memref<6x14x14xf32, #tpu.memory_space<vmem>>, vector<6x14x14xf32>
    "tpu.trace_start"() <{level = 10 : i32, message = "nkm,nmw->nkw"}> : () -> ()
    %cst_47 = arith.constant dense<0.000000e+00> : vector<6x14x16xf32>
    %138 = tpu.matmul %137, %134, %cst_47 {dimension_numbers = #tpu.dot_dimension_numbers<[2], [1], [1], [2], [0, 0, 0, 1, 1, 2], [0], [0]>} : vector<6x14x14xf32>, vector<6x14x16xf32>, vector<6x14x16xf32> -> vector<6x14x16xf32>
    "tpu.trace_stop"() : () -> ()
    %139 = vector.extract_strided_slice %136 {offsets = [0, 0, 0], sizes = [6, 14, 8], strides = [1, 1, 1]} : vector<6x14x16xf32> to vector<6x14x8xf32>
    %140 = vector.extract_strided_slice %138 {offsets = [0, 0, 8], sizes = [6, 14, 8], strides = [1, 1, 1]} : vector<6x14x16xf32> to vector<6x14x8xf32>
    %141 = arith.addf %139, %140 : vector<6x14x8xf32>
    %142 = vector.extract_strided_slice %136 {offsets = [0, 0, 8], sizes = [6, 14, 8], strides = [1, 1, 1]} : vector<6x14x16xf32> to vector<6x14x8xf32>
    %143 = vector.extract_strided_slice %138 {offsets = [0, 0, 0], sizes = [6, 14, 8], strides = [1, 1, 1]} : vector<6x14x16xf32> to vector<6x14x8xf32>
    %144 = arith.subf %142, %143 : vector<6x14x8xf32>
    %145 = tpu.concatenate %141, %144 in 2 : vector<6x14x8xf32>, vector<6x14x8xf32> -> vector<6x14x16xf32>
    %c0_48 = arith.constant 0 : index
    %c0_49 = arith.constant 0 : index
    %c0_50 = arith.constant 0 : index
    %146 = vector.load %arg16[%c0_48, %c0_49, %c0_50] : memref<6x16x14xf32, #tpu.memory_space<vmem>>, vector<6x16x14xf32>
    "tpu.trace_start"() <{level = 10 : i32, message = "nhk,nkw->nhw"}> : () -> ()
    %cst_51 = arith.constant dense<0.000000e+00> : vector<6x14x14xf32>
    %147 = tpu.matmul %145, %146, %cst_51 {dimension_numbers = #tpu.dot_dimension_numbers<[2], [1], [1], [2], [0, 0, 0, 1, 1, 2], [0], [0]>} : vector<6x14x16xf32>, vector<6x16x14xf32>, vector<6x14x14xf32> -> vector<6x14x14xf32>
    "tpu.trace_stop"() : () -> ()
    %c0_52 = arith.constant 0 : index
    %c0_53 = arith.constant 0 : index
    %c0_54 = arith.constant 0 : index
    %148 = vector.load %arg9[%c0_52, %c0_53, %c0_54] : memref<6x1x1xf32, #tpu.memory_space<vmem>>, vector<6x1x1xf32>
    %c0_55 = arith.constant 0 : index
    %c0_56 = arith.constant 0 : index
    %c0_57 = arith.constant 0 : index
    %149 = vector.load %arg10[%c0_55, %c0_56, %c0_57] : memref<6x1x1xf32, #tpu.memory_space<vmem>>, vector<6x1x1xf32>
    %c0_58 = arith.constant 0 : index
    %c0_59 = arith.constant 0 : index
    %c0_60 = arith.constant 0 : index
    %150 = vector.load %arg11[%c0_58, %c0_59, %c0_60] : memref<6x1x1xf32, #tpu.memory_space<vmem>>, vector<6x1x1xf32>
    %c0_61 = arith.constant 0 : index
    %c0_62 = arith.constant 0 : index
    %c0_63 = arith.constant 0 : index
    %151 = vector.load %arg12[%c0_61, %c0_62, %c0_63] : memref<6x1x1xf32, #tpu.memory_space<vmem>>, vector<6x1x1xf32>
    %152 = vector.extract_strided_slice %113 {offsets = [0, 0, 0], sizes = [2, 14, 14], strides = [1, 1, 1]} : vector<6x14x14xf32> to vector<2x14x14xf32>
    %153 = vector.extract_strided_slice %147 {offsets = [0, 0, 0], sizes = [2, 14, 14], strides = [1, 1, 1]} : vector<6x14x14xf32> to vector<2x14x14xf32>
    %154 = vector.extract_strided_slice %152 {offsets = [0, 0, 0], sizes = [1, 14, 14], strides = [1, 1, 1]} : vector<2x14x14xf32> to vector<1x14x14xf32>
    %155 = vector.shape_cast %154 : vector<1x14x14xf32> to vector<14x14xf32>
    %156 = vector.extract_strided_slice %153 {offsets = [0, 0, 0], sizes = [1, 14, 14], strides = [1, 1, 1]} : vector<2x14x14xf32> to vector<1x14x14xf32>
    %157 = vector.shape_cast %156 : vector<1x14x14xf32> to vector<14x14xf32>
    %158 = arith.addf %155, %157 : vector<14x14xf32>
    %159 = vector.extract_strided_slice %152 {offsets = [1, 0, 0], sizes = [1, 14, 14], strides = [1, 1, 1]} : vector<2x14x14xf32> to vector<1x14x14xf32>
    %160 = vector.shape_cast %159 : vector<1x14x14xf32> to vector<14x14xf32>
    %161 = arith.addf %158, %160 : vector<14x14xf32>
    %162 = vector.extract_strided_slice %153 {offsets = [1, 0, 0], sizes = [1, 14, 14], strides = [1, 1, 1]} : vector<2x14x14xf32> to vector<1x14x14xf32>
    %163 = vector.shape_cast %162 : vector<1x14x14xf32> to vector<14x14xf32>
    %164 = arith.addf %161, %163 : vector<14x14xf32>
    %cst_64 = arith.constant 2.500000e-01 : f32
    %165 = vector.broadcast %cst_64 : f32 to vector<14x14xf32>
    %166 = arith.mulf %164, %165 : vector<14x14xf32>
    %167 = vector.shape_cast %166 : vector<14x14xf32> to vector<1x14x14xf32>
    %168 = vector.broadcast %167 : vector<1x14x14xf32> to vector<2x14x14xf32>
    %169 = arith.subf %152, %168 : vector<2x14x14xf32>
    %170 = vector.shape_cast %166 : vector<14x14xf32> to vector<1x14x14xf32>
    %171 = vector.broadcast %170 : vector<1x14x14xf32> to vector<2x14x14xf32>
    %172 = arith.subf %153, %171 : vector<2x14x14xf32>
    %173 = vector.extract_strided_slice %169 {offsets = [0, 0, 0], sizes = [1, 14, 14], strides = [1, 1, 1]} : vector<2x14x14xf32> to vector<1x14x14xf32>
    %174 = vector.shape_cast %173 : vector<1x14x14xf32> to vector<14x14xf32>
    %175 = vector.extract_strided_slice %169 {offsets = [0, 0, 0], sizes = [1, 14, 14], strides = [1, 1, 1]} : vector<2x14x14xf32> to vector<1x14x14xf32>
    %176 = vector.shape_cast %175 : vector<1x14x14xf32> to vector<14x14xf32>
    %177 = arith.mulf %174, %176 : vector<14x14xf32>
    %178 = vector.extract_strided_slice %172 {offsets = [0, 0, 0], sizes = [1, 14, 14], strides = [1, 1, 1]} : vector<2x14x14xf32> to vector<1x14x14xf32>
    %179 = vector.shape_cast %178 : vector<1x14x14xf32> to vector<14x14xf32>
    %180 = vector.extract_strided_slice %172 {offsets = [0, 0, 0], sizes = [1, 14, 14], strides = [1, 1, 1]} : vector<2x14x14xf32> to vector<1x14x14xf32>
    %181 = vector.shape_cast %180 : vector<1x14x14xf32> to vector<14x14xf32>
    %182 = arith.mulf %179, %181 : vector<14x14xf32>
    %183 = arith.addf %177, %182 : vector<14x14xf32>
    %184 = vector.extract_strided_slice %169 {offsets = [1, 0, 0], sizes = [1, 14, 14], strides = [1, 1, 1]} : vector<2x14x14xf32> to vector<1x14x14xf32>
    %185 = vector.shape_cast %184 : vector<1x14x14xf32> to vector<14x14xf32>
    %186 = vector.extract_strided_slice %169 {offsets = [1, 0, 0], sizes = [1, 14, 14], strides = [1, 1, 1]} : vector<2x14x14xf32> to vector<1x14x14xf32>
    %187 = vector.shape_cast %186 : vector<1x14x14xf32> to vector<14x14xf32>
    %188 = arith.mulf %185, %187 : vector<14x14xf32>
    %189 = arith.addf %183, %188 : vector<14x14xf32>
    %190 = vector.extract_strided_slice %172 {offsets = [1, 0, 0], sizes = [1, 14, 14], strides = [1, 1, 1]} : vector<2x14x14xf32> to vector<1x14x14xf32>
    %191 = vector.shape_cast %190 : vector<1x14x14xf32> to vector<14x14xf32>
    %192 = vector.extract_strided_slice %172 {offsets = [1, 0, 0], sizes = [1, 14, 14], strides = [1, 1, 1]} : vector<2x14x14xf32> to vector<1x14x14xf32>
    %193 = vector.shape_cast %192 : vector<1x14x14xf32> to vector<14x14xf32>
    %194 = arith.mulf %191, %193 : vector<14x14xf32>
    %195 = arith.addf %189, %194 : vector<14x14xf32>
    %cst_65 = arith.constant 2.500000e-01 : f32
    %196 = vector.broadcast %cst_65 : f32 to vector<14x14xf32>
    %197 = arith.mulf %195, %196 : vector<14x14xf32>
    %cst_66 = arith.constant 9.99999997E-7 : f32
    %198 = vector.broadcast %cst_66 : f32 to vector<14x14xf32>
    %199 = arith.addf %197, %198 : vector<14x14xf32>
    %200 = math.rsqrt %199 : vector<14x14xf32>
    %201 = vector.shape_cast %200 : vector<14x14xf32> to vector<1x14x14xf32>
    %202 = vector.broadcast %201 : vector<1x14x14xf32> to vector<2x14x14xf32>
    %203 = arith.mulf %169, %202 : vector<2x14x14xf32>
    %204 = vector.extract_strided_slice %148 {offsets = [0, 0, 0], sizes = [2, 1, 1], strides = [1, 1, 1]} : vector<6x1x1xf32> to vector<2x1x1xf32>
    %205 = vector.broadcast %204 : vector<2x1x1xf32> to vector<2x14x14xf32>
    %206 = arith.mulf %203, %205 : vector<2x14x14xf32>
    %207 = vector.extract_strided_slice %149 {offsets = [0, 0, 0], sizes = [2, 1, 1], strides = [1, 1, 1]} : vector<6x1x1xf32> to vector<2x1x1xf32>
    %208 = vector.broadcast %207 : vector<2x1x1xf32> to vector<2x14x14xf32>
    %209 = arith.addf %206, %208 : vector<2x14x14xf32>
    %210 = vector.shape_cast %200 : vector<14x14xf32> to vector<1x14x14xf32>
    %211 = vector.broadcast %210 : vector<1x14x14xf32> to vector<2x14x14xf32>
    %212 = arith.mulf %172, %211 : vector<2x14x14xf32>
    %213 = vector.extract_strided_slice %150 {offsets = [0, 0, 0], sizes = [2, 1, 1], strides = [1, 1, 1]} : vector<6x1x1xf32> to vector<2x1x1xf32>
    %214 = vector.broadcast %213 : vector<2x1x1xf32> to vector<2x14x14xf32>
    %215 = arith.mulf %212, %214 : vector<2x14x14xf32>
    %216 = vector.extract_strided_slice %151 {offsets = [0, 0, 0], sizes = [2, 1, 1], strides = [1, 1, 1]} : vector<6x1x1xf32> to vector<2x1x1xf32>
    %217 = vector.broadcast %216 : vector<2x1x1xf32> to vector<2x14x14xf32>
    %218 = arith.addf %215, %217 : vector<2x14x14xf32>
    %219 = vector.extract_strided_slice %113 {offsets = [2, 0, 0], sizes = [2, 14, 14], strides = [1, 1, 1]} : vector<6x14x14xf32> to vector<2x14x14xf32>
    %220 = vector.extract_strided_slice %147 {offsets = [2, 0, 0], sizes = [2, 14, 14], strides = [1, 1, 1]} : vector<6x14x14xf32> to vector<2x14x14xf32>
    %221 = vector.extract_strided_slice %219 {offsets = [0, 0, 0], sizes = [1, 14, 14], strides = [1, 1, 1]} : vector<2x14x14xf32> to vector<1x14x14xf32>
    %222 = vector.shape_cast %221 : vector<1x14x14xf32> to vector<14x14xf32>
    %223 = vector.extract_strided_slice %220 {offsets = [0, 0, 0], sizes = [1, 14, 14], strides = [1, 1, 1]} : vector<2x14x14xf32> to vector<1x14x14xf32>
    %224 = vector.shape_cast %223 : vector<1x14x14xf32> to vector<14x14xf32>
    %225 = arith.addf %222, %224 : vector<14x14xf32>
    %226 = vector.extract_strided_slice %219 {offsets = [1, 0, 0], sizes = [1, 14, 14], strides = [1, 1, 1]} : vector<2x14x14xf32> to vector<1x14x14xf32>
    %227 = vector.shape_cast %226 : vector<1x14x14xf32> to vector<14x14xf32>
    %228 = arith.addf %225, %227 : vector<14x14xf32>
    %229 = vector.extract_strided_slice %220 {offsets = [1, 0, 0], sizes = [1, 14, 14], strides = [1, 1, 1]} : vector<2x14x14xf32> to vector<1x14x14xf32>
    %230 = vector.shape_cast %229 : vector<1x14x14xf32> to vector<14x14xf32>
    %231 = arith.addf %228, %230 : vector<14x14xf32>
    %cst_67 = arith.constant 2.500000e-01 : f32
    %232 = vector.broadcast %cst_67 : f32 to vector<14x14xf32>
    %233 = arith.mulf %231, %232 : vector<14x14xf32>
    %234 = vector.shape_cast %233 : vector<14x14xf32> to vector<1x14x14xf32>
    %235 = vector.broadcast %234 : vector<1x14x14xf32> to vector<2x14x14xf32>
    %236 = arith.subf %219, %235 : vector<2x14x14xf32>
    %237 = vector.shape_cast %233 : vector<14x14xf32> to vector<1x14x14xf32>
    %238 = vector.broadcast %237 : vector<1x14x14xf32> to vector<2x14x14xf32>
    %239 = arith.subf %220, %238 : vector<2x14x14xf32>
    %240 = vector.extract_strided_slice %236 {offsets = [0, 0, 0], sizes = [1, 14, 14], strides = [1, 1, 1]} : vector<2x14x14xf32> to vector<1x14x14xf32>
    %241 = vector.shape_cast %240 : vector<1x14x14xf32> to vector<14x14xf32>
    %242 = vector.extract_strided_slice %236 {offsets = [0, 0, 0], sizes = [1, 14, 14], strides = [1, 1, 1]} : vector<2x14x14xf32> to vector<1x14x14xf32>
    %243 = vector.shape_cast %242 : vector<1x14x14xf32> to vector<14x14xf32>
    %244 = arith.mulf %241, %243 : vector<14x14xf32>
    %245 = vector.extract_strided_slice %239 {offsets = [0, 0, 0], sizes = [1, 14, 14], strides = [1, 1, 1]} : vector<2x14x14xf32> to vector<1x14x14xf32>
    %246 = vector.shape_cast %245 : vector<1x14x14xf32> to vector<14x14xf32>
    %247 = vector.extract_strided_slice %239 {offsets = [0, 0, 0], sizes = [1, 14, 14], strides = [1, 1, 1]} : vector<2x14x14xf32> to vector<1x14x14xf32>
    %248 = vector.shape_cast %247 : vector<1x14x14xf32> to vector<14x14xf32>
    %249 = arith.mulf %246, %248 : vector<14x14xf32>
    %250 = arith.addf %244, %249 : vector<14x14xf32>
    %251 = vector.extract_strided_slice %236 {offsets = [1, 0, 0], sizes = [1, 14, 14], strides = [1, 1, 1]} : vector<2x14x14xf32> to vector<1x14x14xf32>
    %252 = vector.shape_cast %251 : vector<1x14x14xf32> to vector<14x14xf32>
    %253 = vector.extract_strided_slice %236 {offsets = [1, 0, 0], sizes = [1, 14, 14], strides = [1, 1, 1]} : vector<2x14x14xf32> to vector<1x14x14xf32>
    %254 = vector.shape_cast %253 : vector<1x14x14xf32> to vector<14x14xf32>
    %255 = arith.mulf %252, %254 : vector<14x14xf32>
    %256 = arith.addf %250, %255 : vector<14x14xf32>
    %257 = vector.extract_strided_slice %239 {offsets = [1, 0, 0], sizes = [1, 14, 14], strides = [1, 1, 1]} : vector<2x14x14xf32> to vector<1x14x14xf32>
    %258 = vector.shape_cast %257 : vector<1x14x14xf32> to vector<14x14xf32>
    %259 = vector.extract_strided_slice %239 {offsets = [1, 0, 0], sizes = [1, 14, 14], strides = [1, 1, 1]} : vector<2x14x14xf32> to vector<1x14x14xf32>
    %260 = vector.shape_cast %259 : vector<1x14x14xf32> to vector<14x14xf32>
    %261 = arith.mulf %258, %260 : vector<14x14xf32>
    %262 = arith.addf %256, %261 : vector<14x14xf32>
    %cst_68 = arith.constant 2.500000e-01 : f32
    %263 = vector.broadcast %cst_68 : f32 to vector<14x14xf32>
    %264 = arith.mulf %262, %263 : vector<14x14xf32>
    %cst_69 = arith.constant 9.99999997E-7 : f32
    %265 = vector.broadcast %cst_69 : f32 to vector<14x14xf32>
    %266 = arith.addf %264, %265 : vector<14x14xf32>
    %267 = math.rsqrt %266 : vector<14x14xf32>
    %268 = vector.shape_cast %267 : vector<14x14xf32> to vector<1x14x14xf32>
    %269 = vector.broadcast %268 : vector<1x14x14xf32> to vector<2x14x14xf32>
    %270 = arith.mulf %236, %269 : vector<2x14x14xf32>
    %271 = vector.extract_strided_slice %148 {offsets = [2, 0, 0], sizes = [2, 1, 1], strides = [1, 1, 1]} : vector<6x1x1xf32> to vector<2x1x1xf32>
    %272 = vector.broadcast %271 : vector<2x1x1xf32> to vector<2x14x14xf32>
    %273 = arith.mulf %270, %272 : vector<2x14x14xf32>
    %274 = vector.extract_strided_slice %149 {offsets = [2, 0, 0], sizes = [2, 1, 1], strides = [1, 1, 1]} : vector<6x1x1xf32> to vector<2x1x1xf32>
    %275 = vector.broadcast %274 : vector<2x1x1xf32> to vector<2x14x14xf32>
    %276 = arith.addf %273, %275 : vector<2x14x14xf32>
    %277 = vector.shape_cast %267 : vector<14x14xf32> to vector<1x14x14xf32>
    %278 = vector.broadcast %277 : vector<1x14x14xf32> to vector<2x14x14xf32>
    %279 = arith.mulf %239, %278 : vector<2x14x14xf32>
    %280 = vector.extract_strided_slice %150 {offsets = [2, 0, 0], sizes = [2, 1, 1], strides = [1, 1, 1]} : vector<6x1x1xf32> to vector<2x1x1xf32>
    %281 = vector.broadcast %280 : vector<2x1x1xf32> to vector<2x14x14xf32>
    %282 = arith.mulf %279, %281 : vector<2x14x14xf32>
    %283 = vector.extract_strided_slice %151 {offsets = [2, 0, 0], sizes = [2, 1, 1], strides = [1, 1, 1]} : vector<6x1x1xf32> to vector<2x1x1xf32>
    %284 = vector.broadcast %283 : vector<2x1x1xf32> to vector<2x14x14xf32>
    %285 = arith.addf %282, %284 : vector<2x14x14xf32>
    %286 = vector.extract_strided_slice %113 {offsets = [4, 0, 0], sizes = [2, 14, 14], strides = [1, 1, 1]} : vector<6x14x14xf32> to vector<2x14x14xf32>
    %287 = vector.extract_strided_slice %147 {offsets = [4, 0, 0], sizes = [2, 14, 14], strides = [1, 1, 1]} : vector<6x14x14xf32> to vector<2x14x14xf32>
    %288 = vector.extract_strided_slice %286 {offsets = [0, 0, 0], sizes = [1, 14, 14], strides = [1, 1, 1]} : vector<2x14x14xf32> to vector<1x14x14xf32>
    %289 = vector.shape_cast %288 : vector<1x14x14xf32> to vector<14x14xf32>
    %290 = vector.extract_strided_slice %287 {offsets = [0, 0, 0], sizes = [1, 14, 14], strides = [1, 1, 1]} : vector<2x14x14xf32> to vector<1x14x14xf32>
    %291 = vector.shape_cast %290 : vector<1x14x14xf32> to vector<14x14xf32>
    %292 = arith.addf %289, %291 : vector<14x14xf32>
    %293 = vector.extract_strided_slice %286 {offsets = [1, 0, 0], sizes = [1, 14, 14], strides = [1, 1, 1]} : vector<2x14x14xf32> to vector<1x14x14xf32>
    %294 = vector.shape_cast %293 : vector<1x14x14xf32> to vector<14x14xf32>
    %295 = arith.addf %292, %294 : vector<14x14xf32>
    %296 = vector.extract_strided_slice %287 {offsets = [1, 0, 0], sizes = [1, 14, 14], strides = [1, 1, 1]} : vector<2x14x14xf32> to vector<1x14x14xf32>
    %297 = vector.shape_cast %296 : vector<1x14x14xf32> to vector<14x14xf32>
    %298 = arith.addf %295, %297 : vector<14x14xf32>
    %cst_70 = arith.constant 2.500000e-01 : f32
    %299 = vector.broadcast %cst_70 : f32 to vector<14x14xf32>
    %300 = arith.mulf %298, %299 : vector<14x14xf32>
    %301 = vector.shape_cast %300 : vector<14x14xf32> to vector<1x14x14xf32>
    %302 = vector.broadcast %301 : vector<1x14x14xf32> to vector<2x14x14xf32>
    %303 = arith.subf %286, %302 : vector<2x14x14xf32>
    %304 = vector.shape_cast %300 : vector<14x14xf32> to vector<1x14x14xf32>
    %305 = vector.broadcast %304 : vector<1x14x14xf32> to vector<2x14x14xf32>
    %306 = arith.subf %287, %305 : vector<2x14x14xf32>
    %307 = vector.extract_strided_slice %303 {offsets = [0, 0, 0], sizes = [1, 14, 14], strides = [1, 1, 1]} : vector<2x14x14xf32> to vector<1x14x14xf32>
    %308 = vector.shape_cast %307 : vector<1x14x14xf32> to vector<14x14xf32>
    %309 = vector.extract_strided_slice %303 {offsets = [0, 0, 0], sizes = [1, 14, 14], strides = [1, 1, 1]} : vector<2x14x14xf32> to vector<1x14x14xf32>
    %310 = vector.shape_cast %309 : vector<1x14x14xf32> to vector<14x14xf32>
    %311 = arith.mulf %308, %310 : vector<14x14xf32>
    %312 = vector.extract_strided_slice %306 {offsets = [0, 0, 0], sizes = [1, 14, 14], strides = [1, 1, 1]} : vector<2x14x14xf32> to vector<1x14x14xf32>
    %313 = vector.shape_cast %312 : vector<1x14x14xf32> to vector<14x14xf32>
    %314 = vector.extract_strided_slice %306 {offsets = [0, 0, 0], sizes = [1, 14, 14], strides = [1, 1, 1]} : vector<2x14x14xf32> to vector<1x14x14xf32>
    %315 = vector.shape_cast %314 : vector<1x14x14xf32> to vector<14x14xf32>
    %316 = arith.mulf %313, %315 : vector<14x14xf32>
    %317 = arith.addf %311, %316 : vector<14x14xf32>
    %318 = vector.extract_strided_slice %303 {offsets = [1, 0, 0], sizes = [1, 14, 14], strides = [1, 1, 1]} : vector<2x14x14xf32> to vector<1x14x14xf32>
    %319 = vector.shape_cast %318 : vector<1x14x14xf32> to vector<14x14xf32>
    %320 = vector.extract_strided_slice %303 {offsets = [1, 0, 0], sizes = [1, 14, 14], strides = [1, 1, 1]} : vector<2x14x14xf32> to vector<1x14x14xf32>
    %321 = vector.shape_cast %320 : vector<1x14x14xf32> to vector<14x14xf32>
    %322 = arith.mulf %319, %321 : vector<14x14xf32>
    %323 = arith.addf %317, %322 : vector<14x14xf32>
    %324 = vector.extract_strided_slice %306 {offsets = [1, 0, 0], sizes = [1, 14, 14], strides = [1, 1, 1]} : vector<2x14x14xf32> to vector<1x14x14xf32>
    %325 = vector.shape_cast %324 : vector<1x14x14xf32> to vector<14x14xf32>
    %326 = vector.extract_strided_slice %306 {offsets = [1, 0, 0], sizes = [1, 14, 14], strides = [1, 1, 1]} : vector<2x14x14xf32> to vector<1x14x14xf32>
    %327 = vector.shape_cast %326 : vector<1x14x14xf32> to vector<14x14xf32>
    %328 = arith.mulf %325, %327 : vector<14x14xf32>
    %329 = arith.addf %323, %328 : vector<14x14xf32>
    %cst_71 = arith.constant 2.500000e-01 : f32
    %330 = vector.broadcast %cst_71 : f32 to vector<14x14xf32>
    %331 = arith.mulf %329, %330 : vector<14x14xf32>
    %cst_72 = arith.constant 9.99999997E-7 : f32
    %332 = vector.broadcast %cst_72 : f32 to vector<14x14xf32>
    %333 = arith.addf %331, %332 : vector<14x14xf32>
    %334 = math.rsqrt %333 : vector<14x14xf32>
    %335 = vector.shape_cast %334 : vector<14x14xf32> to vector<1x14x14xf32>
    %336 = vector.broadcast %335 : vector<1x14x14xf32> to vector<2x14x14xf32>
    %337 = arith.mulf %303, %336 : vector<2x14x14xf32>
    %338 = vector.extract_strided_slice %148 {offsets = [4, 0, 0], sizes = [2, 1, 1], strides = [1, 1, 1]} : vector<6x1x1xf32> to vector<2x1x1xf32>
    %339 = vector.broadcast %338 : vector<2x1x1xf32> to vector<2x14x14xf32>
    %340 = arith.mulf %337, %339 : vector<2x14x14xf32>
    %341 = vector.extract_strided_slice %149 {offsets = [4, 0, 0], sizes = [2, 1, 1], strides = [1, 1, 1]} : vector<6x1x1xf32> to vector<2x1x1xf32>
    %342 = vector.broadcast %341 : vector<2x1x1xf32> to vector<2x14x14xf32>
    %343 = arith.addf %340, %342 : vector<2x14x14xf32>
    %344 = vector.shape_cast %334 : vector<14x14xf32> to vector<1x14x14xf32>
    %345 = vector.broadcast %344 : vector<1x14x14xf32> to vector<2x14x14xf32>
    %346 = arith.mulf %306, %345 : vector<2x14x14xf32>
    %347 = vector.extract_strided_slice %150 {offsets = [4, 0, 0], sizes = [2, 1, 1], strides = [1, 1, 1]} : vector<6x1x1xf32> to vector<2x1x1xf32>
    %348 = vector.broadcast %347 : vector<2x1x1xf32> to vector<2x14x14xf32>
    %349 = arith.mulf %346, %348 : vector<2x14x14xf32>
    %350 = vector.extract_strided_slice %151 {offsets = [4, 0, 0], sizes = [2, 1, 1], strides = [1, 1, 1]} : vector<6x1x1xf32> to vector<2x1x1xf32>
    %351 = vector.broadcast %350 : vector<2x1x1xf32> to vector<2x14x14xf32>
    %352 = arith.addf %349, %351 : vector<2x14x14xf32>
    %353 = arith.mulf %209, %276 : vector<2x14x14xf32>
    %354 = arith.addf %353, %343 : vector<2x14x14xf32>
    %355 = arith.mulf %218, %285 : vector<2x14x14xf32>
    %356 = arith.addf %355, %352 : vector<2x14x14xf32>
    %357 = vector.extract_strided_slice %354 {offsets = [0, 0, 0], sizes = [1, 14, 14], strides = [1, 1, 1]} : vector<2x14x14xf32> to vector<1x14x14xf32>
    %358 = vector.extract_strided_slice %356 {offsets = [0, 0, 0], sizes = [1, 14, 14], strides = [1, 1, 1]} : vector<2x14x14xf32> to vector<1x14x14xf32>
    %359 = vector.extract_strided_slice %354 {offsets = [1, 0, 0], sizes = [1, 14, 14], strides = [1, 1, 1]} : vector<2x14x14xf32> to vector<1x14x14xf32>
    %360 = vector.extract_strided_slice %356 {offsets = [1, 0, 0], sizes = [1, 14, 14], strides = [1, 1, 1]} : vector<2x14x14xf32> to vector<1x14x14xf32>
    %361 = tpu.concatenate %357, %358, %359, %360 in 0 : vector<1x14x14xf32>, vector<1x14x14xf32>, vector<1x14x14xf32>, vector<1x14x14xf32> -> vector<4x14x14xf32>
    %c0_73 = arith.constant 0 : index
    %c0_74 = arith.constant 0 : index
    %c0_75 = arith.constant 0 : index
    %c0_76 = arith.constant 0 : index
    %362 = vector.load %arg17[%c0_73, %c0_74, %c0_75, %c0_76] : memref<1x4x14x14xf32, #tpu.memory_space<vmem>>, vector<1x4x14x14xf32>
    %363 = vector.shape_cast %362 : vector<1x4x14x14xf32> to vector<4x14x14xf32>
    %364 = vector.shape_cast %361 : vector<4x14x14xf32> to vector<1x4x14x14xf32>
    tpu.vector_store %arg17[%c0_73, %c0_74, %c0_75, %c0_76], %364 {strides = array<i32>} : memref<1x4x14x14xf32, #tpu.memory_space<vmem>>, vector<1x4x14x14xf32>,
    return
  }
  func.func @transform_0(%arg0: i32) -> (i32, i32, i32, i32) {
    %c0_i32 = arith.constant 0 : i32
    %c0_i32_0 = arith.constant 0 : i32
    %c0_i32_1 = arith.constant 0 : i32
    %c0_i32_2 = arith.constant 0 : i32
    return %arg0, %c0_i32, %c0_i32_0, %c0_i32_1 : i32, i32, i32, i32
  }
  func.func @transform_1(%arg0: i32) -> (i32, i32, i32) {
    %c0_i32 = arith.constant 0 : i32
    %c0_i32_0 = arith.constant 0 : i32
    %c0_i32_1 = arith.constant 0 : i32
    %c0_i32_2 = arith.constant 0 : i32
    return %c0_i32, %c0_i32_0, %c0_i32_1 : i32, i32, i32
  }
  func.func @transform_2(%arg0: i32) -> (i32, i32, i32) {
    %c0_i32 = arith.constant 0 : i32
    %c0_i32_0 = arith.constant 0 : i32
    %c0_i32_1 = arith.constant 0 : i32
    %c0_i32_2 = arith.constant 0 : i32
    return %c0_i32, %c0_i32_0, %c0_i32_1 : i32, i32, i32
  }
  func.func @transform_3(%arg0: i32) -> (i32, i32, i32) {
    %c0_i32 = arith.constant 0 : i32
    %c0_i32_0 = arith.constant 0 : i32
    %c0_i32_1 = arith.constant 0 : i32
    %c0_i32_2 = arith.constant 0 : i32
    return %c0_i32, %c0_i32_0, %c0_i32_1 : i32, i32, i32
  }
  func.func @transform_4(%arg0: i32) -> (i32, i32, i32) {
    %c0_i32 = arith.constant 0 : i32
    %c0_i32_0 = arith.constant 0 : i32
    %c0_i32_1 = arith.constant 0 : i32
    %c0_i32_2 = arith.constant 0 : i32
    return %c0_i32, %c0_i32_0, %c0_i32_1 : i32, i32, i32
  }
  func.func @transform_5(%arg0: i32) -> (i32, i32, i32) {
    %c0_i32 = arith.constant 0 : i32
    %c0_i32_0 = arith.constant 0 : i32
    %c0_i32_1 = arith.constant 0 : i32
    %c0_i32_2 = arith.constant 0 : i32
    return %c0_i32, %c0_i32_0, %c0_i32_1 : i32, i32, i32
  }
  func.func @transform_6(%arg0: i32) -> (i32, i32, i32) {
    %c0_i32 = arith.constant 0 : i32
    %c0_i32_0 = arith.constant 0 : i32
    %c0_i32_1 = arith.constant 0 : i32
    %c0_i32_2 = arith.constant 0 : i32
    return %c0_i32, %c0_i32_0, %c0_i32_1 : i32, i32, i32
  }
  func.func @transform_7(%arg0: i32) -> (i32, i32, i32) {
    %c0_i32 = arith.constant 0 : i32
    %c0_i32_0 = arith.constant 0 : i32
    %c0_i32_1 = arith.constant 0 : i32
    %c0_i32_2 = arith.constant 0 : i32
    return %c0_i32, %c0_i32_0, %c0_i32_1 : i32, i32, i32
  }
  func.func @transform_8(%arg0: i32) -> (i32, i32, i32) {
    %c0_i32 = arith.constant 0 : i32
    %c0_i32_0 = arith.constant 0 : i32
    %c0_i32_1 = arith.constant 0 : i32
    %c0_i32_2 = arith.constant 0 : i32
    return %c0_i32, %c0_i32_0, %c0_i32_1 : i32, i32, i32
  }
  func.func @transform_9(%arg0: i32) -> (i32, i32, i32) {
    %c0_i32 = arith.constant 0 : i32
    %c0_i32_0 = arith.constant 0 : i32
    %c0_i32_1 = arith.constant 0 : i32
    %c0_i32_2 = arith.constant 0 : i32
    return %c0_i32, %c0_i32_0, %c0_i32_1 : i32, i32, i32
  }
  func.func @transform_10(%arg0: i32) -> (i32, i32, i32) {
    %c0_i32 = arith.constant 0 : i32
    %c0_i32_0 = arith.constant 0 : i32
    %c0_i32_1 = arith.constant 0 : i32
    %c0_i32_2 = arith.constant 0 : i32
    return %c0_i32, %c0_i32_0, %c0_i32_1 : i32, i32, i32
  }
  func.func @transform_11(%arg0: i32) -> (i32, i32, i32) {
    %c0_i32 = arith.constant 0 : i32
    %c0_i32_0 = arith.constant 0 : i32
    %c0_i32_1 = arith.constant 0 : i32
    %c0_i32_2 = arith.constant 0 : i32
    return %c0_i32, %c0_i32_0, %c0_i32_1 : i32, i32, i32
  }
  func.func @transform_12(%arg0: i32) -> (i32, i32, i32) {
    %c0_i32 = arith.constant 0 : i32
    %c0_i32_0 = arith.constant 0 : i32
    %c0_i32_1 = arith.constant 0 : i32
    %c0_i32_2 = arith.constant 0 : i32
    return %c0_i32, %c0_i32_0, %c0_i32_1 : i32, i32, i32
  }
  func.func @transform_13(%arg0: i32) -> (i32, i32, i32) {
    %c0_i32 = arith.constant 0 : i32
    %c0_i32_0 = arith.constant 0 : i32
    %c0_i32_1 = arith.constant 0 : i32
    %c0_i32_2 = arith.constant 0 : i32
    return %c0_i32, %c0_i32_0, %c0_i32_1 : i32, i32, i32
  }
  func.func @transform_14(%arg0: i32) -> (i32, i32, i32) {
    %c0_i32 = arith.constant 0 : i32
    %c0_i32_0 = arith.constant 0 : i32
    %c0_i32_1 = arith.constant 0 : i32
    %c0_i32_2 = arith.constant 0 : i32
    return %c0_i32, %c0_i32_0, %c0_i32_1 : i32, i32, i32
  }
  func.func @transform_15(%arg0: i32) -> (i32, i32, i32) {
    %c0_i32 = arith.constant 0 : i32
    %c0_i32_0 = arith.constant 0 : i32
    %c0_i32_1 = arith.constant 0 : i32
    %c0_i32_2 = arith.constant 0 : i32
    return %c0_i32, %c0_i32_0, %c0_i32_1 : i32, i32, i32
  }
  func.func @transform_16(%arg0: i32) -> (i32, i32, i32, i32) {
    %c0_i32 = arith.constant 0 : i32
    %c0_i32_0 = arith.constant 0 : i32
    %c0_i32_1 = arith.constant 0 : i32
    %c0_i32_2 = arith.constant 0 : i32
    return %arg0, %c0_i32, %c0_i32_0, %c0_i32_1 : i32, i32, i32, i32
  }
}

</mosaic_0001>

<bundles_post_ra>
// kernel: quadra_conv_gf.1
= control target key start
LH: loop header
LB: loop body
LE: loop exit
PB: predicated region body
PF: predicated region fallthrough
CT: control target
= control target key end

     0   :  { %s6821_s21 = smov 0   ;;  %s8734_s0 = inlined_call_operand.vmem [shape: f32[2,4,14,14], index: 0, kind: input, shape index: {}]   ;;  %s8735_s1 = inlined_call_operand.vmem [shape: f32[6,1,1], index: 1, kind: input, shape index: {}]   ;;  %s8736_s2 = inlined_call_operand.vmem [shape: f32[6,1,1], index: 2, kind: input, shape index: {}]   ;;  %s8737_s3 = inlined_call_operand.vmem [shape: f32[6,1,1], index: 3, kind: input, shape index: {}]   ;;  %s8738_s4 = inlined_call_operand.vmem [shape: f32[6,1,1], index: 4, kind: input, shape index: {}]   ;;  %s8739_s5 = inlined_call_operand.vmem [shape: f32[6,3,3], index: 5, kind: input, shape index: {}]   ;;  %s8740_s6 = inlined_call_operand.vmem [shape: f32[6,14,8], index: 6, kind: input, shape index: {}]   ;;  %s8741_s7 = inlined_call_operand.vmem [shape: f32[6,14,8], index: 7, kind: input, shape index: {}]   ;;  %s8742_s8 = inlined_call_operand.vmem [shape: f32[6,1,1], index: 8, kind: input, shape index: {}]   ;;  %s8743_s9 = inlined_call_operand.vmem [shape: f32[6,1,1], index: 9, kind: input, shape index: {}]   ;;  %s8744_s10 = inlined_call_operand.vmem [shape: f32[6,1,1], index: 10, kind: input, shape index: {}]   ;;  %s8745_s11 = inlined_call_operand.vmem [shape: f32[6,1,1], index: 11, kind: input, shape index: {}]   ;;  %s8746_s12 = inlined_call_operand.vmem [shape: f32[6,14,16], index: 12, kind: input, shape index: {}]   ;;  %s8747_s13 = inlined_call_operand.vmem [shape: f32[6,14,14], index: 13, kind: input, shape index: {}]   ;;  %s8748_s14 = inlined_call_operand.vmem [shape: f32[6,14,14], index: 14, kind: input, shape index: {}]   ;;  %s8749_s15 = inlined_call_operand.vmem [shape: f32[6,16,14], index: 15, kind: input, shape index: {}]   ;;  %s8750_s16 = inlined_call_operand.vmem [shape: f32[2,4,14,14], index: 16, kind: output, shape index: {}]  }
   0x1   :  { %8776 = sst [smem:[#allocation20_spill]] %s8734_s0 }
   0x2   :  { %8777 = sst [smem:[#allocation21_spill]] %s8735_s1 }
   0x3   :  { %8778 = sst [smem:[#allocation22_spill]] %s8736_s2 }
   0x4 LB: > { %s6020_s22 = sadd.s32 4294967295, %s6728_s21   ;;  %p6024_p0 = scmp.ge.s32.totalorder %s6728_s21, 1  ;;  %s6728_s21 = sphi %s6821_s21, %s26_s21  }
   0x5   : > { %p462_p1 = scmp.lt.s32.totalorder %s6728_s21, 3 }
   0x7   : > { %p463_p2 = pnand %p6024_p0, %p462_p1 }
   0x9   : > { %466 = sbr.rel (%p463_p2) target bundleno = 2019 (0x7e3), region = 84 }
   0xe   : > { %v6042_v0 = vld [vmem:[%s8737_s3 + $0x1] ss:$0 sm:$0xff]  ;;  %v6041_v1 = vld [vmem:[%s8737_s3] ss:$0 sm:$0xff]  ;;  %v6730_v2 = vmov 0   ;;  %vm1616_vm0 = vcmask 1045504  }
   0xf   : > { %6702 = vset.pattern.permute.xlu1 %v6730_v2  ;;  %6701 = vset.pattern.permute.xlu0 %v6730_v2  ;;  %v6043_v3 = vld [vmem:[%s8737_s3 + $0x2] ss:$0 sm:$0xff]  ;;  %v6047_v4 = vld [vmem:[%s8738_s4] ss:$0 sm:$0xff]  ;;  %v1900_v5 = vld [vmem:[%s8746_s12 + $0x8] sm:$0x3f] }
  0x10   : > { %759 = vperm.xlu1 %6702, %v6042_v0   ;;  %755 = vperm.xlu0 %6701, %v6041_v1   ;;  %v1899_v6 = vld [vmem:[%s8746_s12] sm:$0xff]  ;;  %v1902_v7 = vld [vmem:[%s8746_s12 + $0x18] sm:$0x3f]  ;;  %v1901_v8 = vld [vmem:[%s8746_s12 + $0x10] sm:$0xff]  ;;  %p512_p3 = scmp.lt.s32.totalorder %s6020_s22, 1  ;;  %s8779_s23 = sld [smem:[#allocation20_spill]] }
  0x11   : > { %6327 = vmatprep.subr.msk.mxu0 %vm1616_vm0, %v1900_v5  ;;  %v6049_v9 = vld [vmem:[%s8738_s4 + $0x2] ss:$0 sm:$0xff]  ;;  %v6048_v10 = vld [vmem:[%s8738_s4 + $0x1] ss:$0 sm:$0xff]  ;;  %6334 = vmatprep.subr.msk.mxu1 %vm1616_vm0, %v1902_v7  ;;  %v6865_v11 = vld [vmem:[%s8746_s12 + $0x28] sm:$0x3f] }
  0x12   : > { %6328 = vmatpush3.msk.msra.mxu0 %vm1616_vm0, %v1900_v5  ;;  %6335 = vmatpush3.msk.msra.mxu1 %vm1616_vm0, %v1902_v7  ;;  %v6871_v12 = vld [vmem:[%s8746_s12 + $0x38] sm:$0x3f]  ;;  %v6045_v13 = vld [vmem:[%s8737_s3 + $0x4] ss:$0 sm:$0xff]  ;;  %v6044_v14 = vld [vmem:[%s8737_s3 + $0x3] ss:$0 sm:$0xff] }
  0x13   : > { %6329 = vmatprep.subr.mxu0 %v1899_v6  ;;  %6336 = vmatprep.subr.mxu1 %v1901_v8  ;;  %v6051_v15 = vld [vmem:[%s8738_s4 + $0x4] ss:$0 sm:$0xff]  ;;  %v6050_v16 = vld [vmem:[%s8738_s4 + $0x3] ss:$0 sm:$0xff]  ;;  %v6052_v17 = vld [vmem:[%s8738_s4 + $0x5] ss:$0 sm:$0xff] }
  0x14   : > { %763 = vperm.xlu1 %6702, %v6043_v3   ;;  %827 = vperm.xlu0 %6701, %v6047_v4   ;;  %v6046_v18 = vld [vmem:[%s8737_s3 + $0x5] ss:$0 sm:$0xff]  ;;  %s8822_s22 = smov (!%p512_p3, %s6020_s22), 1  ;;  %vm1911_vm1 = vcmask 113664   ;;  %s6731_s0 = smov 8   ;;  %vm3874_vm2 = vcmask 64512  }
  0x15   : > { %6330 = vmatpush3.msra.mxu0 %v1899_v6  ;;  %6337 = vmatpush3.msra.mxu1 %v1901_v8  ;;  %s8771_s18 = sshll.u32 %s8822_s22, 6  ;;  %s6732_s20 = smov 120   ;;  %vm874_vm3 = vcmask 1040384   ;;  %vm911_vm4 = vcmask 1046528   ;;  %vm966_vm5 = vcmask 7168   ;;  %vm979_vm6 = vcmask 121856  }
  0x16   : > { %6341 = vmatprep.subr.msk.mxu0 %vm1616_vm0, %v6865_v11  ;;  %6348 = vmatprep.subr.msk.mxu1 %vm1616_vm0, %v6871_v12  ;;  %s516_s24 = scalar_lea.vmem %s8779_s23, %s8771_s18  ;;  %s8798_s1 = sld [smem:[#allocation21_spill]]  ;;  %vm5033_vm7 = vcmask 130048   ;;  %vm5957_vm8 = vcmask 111616  }
  0x17   : > { %v523_v19 = vld [vmem:[%s516_s24 + $0x8] sm:$0x3f]  ;;  %v525_v20 = vld [vmem:[%s516_s24 + $0x18] sm:$0x3f]  ;;  %v522_v21 = vld [vmem:[%s516_s24] sm:$0xff]  ;;  %s8799_s2 = sld [smem:[#allocation22_spill]] }
  0x18   : > { %835 = vperm.xlu1 %6702, %v6049_v9   ;;  %831 = vperm.xlu0 %6701, %v6048_v10   ;;  %v524_v22 = vld [vmem:[%s516_s24 + $0x10] sm:$0xff]  ;;  %v531_v23 = vadd.f32 %v525_v20, %v523_v19  ;;  %v527_v24 = vld [vmem:[%s516_s24 + $0x28] sm:$0x3f]  ;;  %v526_v26 = vld [vmem:[%s516_s24 + $0x20] sm:$0xff]  ;;  %s6733_s17 = smov 1   ;;  %s8772_s19 = smov 127  }
  0x19   : > { %v530_v25 = vadd.f32 %v524_v22, %v522_v21  ;;  %v529_v28 = vld [vmem:[%s516_s24 + $0x38] sm:$0x3f]  ;;  %v528_v30 = vld [vmem:[%s516_s24 + $0x30] sm:$0xff] }
  0x1a   : > { %v533_v27 = vadd.f32 %v531_v23, %v527_v24 }
  0x1b   : > { %v532_v29 = vadd.f32 %v530_v25, %v526_v26 }
  0x1c   : > { %771 = vperm.xlu1 %6702, %v6045_v13   ;;  %767 = vperm.xlu0 %6701, %v6044_v14   ;;  %v535_v31 = vadd.f32 %v533_v27, %v529_v28  ;;  %v1905_v27 = vld [vmem:[%s8746_s12 + $0x30] sm:$0xff] }
  0x1d   : > { %v534_v32 = vadd.f32 %v532_v29, %v528_v30 }
  0x1e   : > { %v537_v33 = vmul.f32 0.25, %v535_v31 }
  0x1f   : > { %v536_v34 = vmul.f32 0.25, %v534_v32  ;;  %v1910_v32 = vld [vmem:[%s8746_s12 + $0x58] sm:$0x3f] }
  0x20   : > { %843 = vperm.xlu1 %6702, %v6051_v15   ;;  %839 = vperm.xlu0 %6701, %v6050_v16   ;;  %v6907_v35 = vsub.f32 %v523_v19, %v537_v33  ;;  %v6909_v36 = vsub.f32 %v525_v20, %v537_v33  ;;  %v543_v39 = vsub.f32 %v527_v24, %v537_v33  ;;  %v1903_v16 = vld [vmem:[%s8746_s12 + $0x20] sm:$0xff]  ;;  %v1908_v24 = vld [vmem:[%s8746_s12 + $0x48] sm:$0x3f] }
  0x21   : > { %v6911_v37 = vsub.f32 %v522_v21, %v536_v34  ;;  %v6913_v38 = vsub.f32 %v524_v22, %v536_v34  ;;  %v542_v42 = vsub.f32 %v526_v26, %v536_v34  ;;  %v545_v45 = vsub.f32 %v529_v28, %v537_v33 }
  0x22   : > { %8780 = vst [vmem:[#allocation2_spill] sm:$0xff] %v6907_v35  ;;  %8781 = vst [vmem:[#allocation3_spill] sm:$0xff] %v6909_v36  ;;  %v547_v40 = vmul.f32 %v6907_v35, %v6907_v35  ;;  %v549_v41 = vmul.f32 %v6909_v36, %v6909_v36  ;;  %v553_v47 = vmul.f32 %v543_v39, %v543_v39 }
  0x23   : > { %8782 = vst [vmem:[#allocation4_spill] sm:$0xff] %v6911_v37  ;;  %8783 = vst [vmem:[#allocation5_spill] sm:$0xff] %v6913_v38  ;;  %v546_v43 = vmul.f32 %v6911_v37, %v6911_v37  ;;  %v548_v44 = vmul.f32 %v6913_v38, %v6913_v38  ;;  %v544_v48 = vsub.f32 %v528_v30, %v536_v34 }
  0x24   : > { %847 = vperm.xlu1 %6702, %v6052_v17   ;;  %775 = vperm.xlu0 %6701, %v6046_v18   ;;  %v551_v46 = vadd.f32 %v549_v41, %v547_v40  ;;  %v552_v50 = vmul.f32 %v542_v42, %v542_v42  ;;  %v557_v52 = vmul.f32 %v545_v45, %v545_v45 }
  0x25   : > { %v550_v49 = vadd.f32 %v548_v44, %v546_v43  ;;  %v556_v54 = vmul.f32 %v544_v48, %v544_v48 }
  0x26   : > { %v555_v51 = vadd.f32 %v553_v47, %v551_v46 }
  0x27   : > { %v554_v53 = vadd.f32 %v552_v50, %v550_v49  ;;  %v6972_v49 = vld [vmem:[%s8747_s13] sm:$0xff]  ;;  %v6979_v50 = vld [vmem:[%s8747_s13 + $0x10] sm:$0xff] }
  0x28   : > { %v559_v55 = vadd.f32 %v557_v52, %v555_v51  ;;  %v6986_v51 = vld [vmem:[%s8740_s6 + $0x8] sm:$0x3f]  ;;  %v6993_v52 = vld [vmem:[%s8740_s6] sm:$0xff] }
  0x29   : > { %v558_v56 = vadd.f32 %v556_v54, %v554_v53  ;;  %3720 = vrot.lane.b32.xlu0 %v6986_v51, %s6731_s0  ;;  %v6998_v53 = vld [vmem:[%s8740_s6 + $0x18] sm:$0x3f]  ;;  %3718 = vrot.lane.b32.xlu1 %v6993_v52, %s6731_s0  ;;  %v7005_v54 = vld [vmem:[%s8740_s6 + $0x28] sm:$0x3f] }
  0x2a   : > { %v561_v57 = vmul.f32 0.25, %v559_v55  ;;  %v7012_v55 = vld [vmem:[%s8740_s6 + $0x10] sm:$0xff] }
  0x2b   : > { %v560_v58 = vmul.f32 0.25, %v558_v56  ;;  %v7021_v56 = vld [vmem:[%s8740_s6 + $0x38] sm:$0x3f] }
  0x2c   : > { %v563_v59 = vadd.f32 1e-06, %v561_v57 }
  0x2d   : > { %v562_v60 = vadd.f32 1e-06, %v560_v58  ;;  %3724 = vrot.lane.b32.xlu0 %v6998_v53, %s6731_s0  ;;  %3728 = vrot.lane.b32.xlu1 %v7005_v54, %s6731_s0 }
  0x2e   : > { %6703 = vrsqrt.f32 %v563_v59  ;;  %v2417_v59 = vld [vmem:[%s8747_s13 + $0x8] sm:$0x3f] }
  0x2f   : > { %6705 = vrsqrt.f32 %v562_v60 }
  0x31   : > { %3722 = vrot.lane.b32.xlu0 %v7012_v55, %s6731_s0 }
  0x35   : > { %3732 = vrot.lane.b32.xlu0 %v7021_v56, %s6731_s0 }
  0x3b   : > { %v6923_v61 = vpop.eup %6703 }
  0x3c   : > { %8784 = vst [vmem:[#allocation6_spill] sm:$0xff] %v6923_v61  ;;  %v6925_v62 = vpop.eup %6705  ;;  %v571_v63 = vmul.f32 %v6923_v61, %v543_v39  ;;  %v573_v3 = vmul.f32 %v6923_v61, %v545_v45 }
  0x3d   : > { %8785 = vst [vmem:[#allocation7_spill] sm:$0xff] %v6925_v62  ;;  %v570_v0 = vmul.f32 %v6925_v62, %v542_v42  ;;  %v572_v6 = vmul.f32 %v6925_v62, %v544_v48 }
  0x8b   : > { %v760_v1 = vpop.permute.xlu1 %759  ;;  %v756_v2 = vpop.permute.xlu0 %755 }
  0x8c   : > { %v779_v4 = vmul.f32 %v756_v2, %v571_v63  ;;  %v778_v5 = vmul.f32 %v756_v2, %v570_v0  ;;  %v781_v13 = vmul.f32 %v760_v1, %v573_v3  ;;  %v780_v17 = vmul.f32 %v760_v1, %v572_v6  ;;  %v7043_v1 = vld [vmem:[%s8747_s13 + $0x20] sm:$0xff] }
  0x8f   : > { %v764_v7 = vpop.permute.xlu1 %763  ;;  %v828_v8 = vpop.permute.xlu0 %827 }
  0x90   : > { %v851_v9 = vadd.f32 %v828_v8, %v779_v4  ;;  %v850_v10 = vadd.f32 %v828_v8, %v778_v5  ;;  %v782_v14 = vmul.f32 %v764_v7, %v570_v0  ;;  %v783_v15 = vmul.f32 %v764_v7, %v571_v63  ;;  %v2419_v4 = vld [vmem:[%s8747_s13 + $0x18] sm:$0x3f]  ;;  %v7057_v5 = vld [vmem:[%s8747_s13 + $0x40] sm:$0xff] }
  0x91   : > { %8786 = vst [vmem:[#allocation8_spill] sm:$0xff] %v7057_v5 }
  0x92   : > { %6331 = vmatprep.mubr.msk.f32.mxu0 %vm1911_vm1, %v850_v10 }
  0x93   : > { %v836_v18 = vpop.permute.xlu1 %835  ;;  %v832_v19 = vpop.permute.xlu0 %831  ;;  %6332 = vmatmul.mubr.msk.f32.vlgmr.msra.gmra.mxu0 %vm1911_vm1, %v851_v9 }
  0x94   : > { %v854_v20 = vadd.f32 %v836_v18, %v782_v14  ;;  %v855_v21 = vadd.f32 %v836_v18, %v783_v15  ;;  %v853_v22 = vadd.f32 %v832_v19, %v781_v13  ;;  %6342 = vmatpush3.msk.msra.mxu0 %vm1616_vm0, %v6865_v11  ;;  %v852_v23 = vadd.f32 %v832_v19, %v780_v17  ;;  %v1907_v11 = vld [vmem:[%s8746_s12 + $0x40] sm:$0xff]  ;;  %v2425_v13 = vld [vmem:[%s8747_s13 + $0x48] sm:$0x3f]  ;;  %v2423_v14 = vld [vmem:[%s8747_s13 + $0x38] sm:$0x3f] }
  0x95   : > { %6343 = vmatprep.subr.mxu0 %v1903_v16  ;;  %v2933_v17 = vld [vmem:[%s8748_s14 + $0x8] sm:$0x3f]  ;;  %v7099_v19 = vld [vmem:[%s8747_s13 + $0x50] sm:$0xff] }
  0x96   : > { %6338 = vmatprep.mubr.msk.f32.mxu1 %vm1911_vm1, %v852_v23  ;;  %6344 = vmatpush3.msra.mxu0 %v1903_v16  ;;  %v7089_v16 = vld [vmem:[%s8748_s14] sm:$0xff]  ;;  %8788 = vst [vmem:[#allocation10_spill] sm:$0xff] %v7099_v19  ;;  %v2937_v23 = vld [vmem:[%s8748_s14 + $0x28] sm:$0x3f] }
  0x97   : > { %6345 = vmatprep.mubr.msk.f32.mxu0 %vm1911_vm1, %v854_v20  ;;  %v772_v25 = vpop.permute.xlu1 %771  ;;  %v768_v26 = vpop.permute.xlu0 %767  ;;  %6339 = vmatmul.mubr.msk.f32.vlgmr.msra.gmra.mxu1 %vm1911_vm1, %v853_v22  ;;  %8787 = vst [vmem:[#allocation9_spill] sm:$0xff] %v7089_v16  ;;  %v2427_v20 = vld [vmem:[%s8747_s13 + $0x58] sm:$0x3f]  ;;  %v7124_v22 = vld [vmem:[%s8748_s14 + $0x10] sm:$0xff] }
  0x98   : > { %6346 = vmatmul.mubr.msk.f32.vlgmr.msra.gmra.mxu0 %vm1911_vm1, %v855_v21  ;;  %v786_v28 = vmul.f32 %v772_v25, %v570_v0  ;;  %6355 = vmatprep.subr.msk.mxu0 %vm1616_vm0, %v1908_v24  ;;  %v787_v29 = vmul.f32 %v772_v25, %v571_v63  ;;  %v784_v30 = vmul.f32 %v768_v26, %v572_v6  ;;  %v7115_v21 = vld [vmem:[%s8748_s14 + $0x20] sm:$0xff]  ;;  %v7145_v25 = vld [vmem:[%s8748_s14 + $0x30] sm:$0xff] }
  0x99   : > { %6349 = vmatpush3.msk.msra.mxu1 %vm1616_vm0, %v6871_v12  ;;  %v785_v31 = vmul.f32 %v768_v26, %v573_v3  ;;  %6356 = vmatpush3.msk.msra.mxu0 %vm1616_vm0, %v1908_v24  ;;  %v1909_v12 = vld [vmem:[%s8746_s12 + $0x50] sm:$0xff]  ;;  %8789 = vst [vmem:[#allocation11_spill] sm:$0xff] %v7115_v21  ;;  %8790 = vst [vmem:[#allocation12_spill] sm:$0xff] %v7124_v22  ;;  %v2935_v24 = vld [vmem:[%s8748_s14 + $0x18] sm:$0x3f] }
  0x9a   : > { %6350 = vmatprep.subr.mxu1 %v1905_v27  ;;  %6357 = vmatprep.subr.mxu0 %v1907_v11  ;;  %8791 = vst [vmem:[#allocation13_spill] sm:$0xff] %v7145_v25  ;;  %v2940_v26 = vld [vmem:[%s8748_s14 + $0x40] sm:$0xff] }
  0x9b   : > { %v844_v33 = vpop.permute.xlu1 %843  ;;  %v840_v34 = vpop.permute.xlu0 %839  ;;  %6351 = vmatpush3.msra.mxu1 %v1905_v27  ;;  %6358 = vmatpush3.msra.mxu0 %v1907_v11  ;;  %v2939_v27 = vld [vmem:[%s8748_s14 + $0x38] sm:$0x3f]  ;;  %v2942_v11 = vld [vmem:[%s8748_s14 + $0x50] sm:$0xff] }
  0x9c   : > { %v858_v39 = vadd.f32 %v844_v33, %v786_v28  ;;  %v859_v40 = vadd.f32 %v844_v33, %v787_v29  ;;  %v856_v41 = vadd.f32 %v840_v34, %v784_v30  ;;  %v857_v42 = vadd.f32 %v840_v34, %v785_v31  ;;  %6362 = vmatprep.subr.msk.mxu1 %vm1616_vm0, %v1910_v32  ;;  %v2941_v28 = vld [vmem:[%s8748_s14 + $0x48] sm:$0x3f]  ;;  %v2943_v29 = vld [vmem:[%s8748_s14 + $0x58] sm:$0x3f]  ;;  %v7180_v30 = vld [vmem:[%s8740_s6 + $0x40] sm:$0xff] }
  0x9d   : > { %8792 = vst [vmem:[#allocation14_spill] sm:$0xff] %v7180_v30  ;;  %3734 = vrot.lane.b32.xlu0 %v7180_v30, %s6731_s0  ;;  %v7187_v31 = vld [vmem:[%s8740_s6 + $0x20] sm:$0xff]  ;;  %v7201_v33 = vld [vmem:[%s8740_s6 + $0x48] sm:$0x3f] }
  0x9e   : > { %6352 = vmatprep.mubr.msk.f32.mxu1 %vm1911_vm1, %v856_v41  ;;  %6359 = vmatprep.mubr.msk.f32.mxu0 %vm1911_vm1, %v858_v39  ;;  %8793 = vst [vmem:[#allocation15_spill] sm:$0xff] %v7187_v31  ;;  %8795 = vst [vmem:[#allocation17_spill] sm:$0xff] %v7201_v33  ;;  %v7208_v34 = vld [vmem:[%s8741_s7 + $0x8] sm:$0x3f]  ;;  %v7215_v39 = vld [vmem:[%s8740_s6 + $0x30] sm:$0xff] }
  0x9f   : > { %v776_v43 = vpop.permute.xlu0 %775  ;;  %6353 = vmatmul.mubr.msk.f32.vlgmr.msra.gmra.mxu1 %vm1911_vm1, %v857_v42  ;;  %6360 = vmatmul.mubr.msk.f32.vlgmr.msra.gmra.mxu0 %vm1911_vm1, %v859_v40  ;;  %v848_v46 = vpop.permute.xlu1 %847  ;;  %8796 = vst [vmem:[#allocation18_spill] sm:$0xff] %v7215_v39  ;;  %v7222_v40 = vld [vmem:[%s8740_s6 + $0x50] sm:$0xff] }
  0xa0   : > { %v788_v44 = vmul.f32 %v776_v43, %v572_v6  ;;  %v789_v45 = vmul.f32 %v776_v43, %v573_v3  ;;  %6363 = vmatpush3.msk.msra.mxu1 %vm1616_vm0, %v1910_v32  ;;  %6373 = vmatprep.mubr.msk.f32.mxu0 %vm1911_vm1, %v6972_v49  ;;  %v2421_v3 = vld [vmem:[%s8747_s13 + $0x28] sm:$0x3f]  ;;  %v7062_v6 = vld [vmem:[%s8747_s13 + $0x30] sm:$0xff]  ;;  %v7194_v32 = vld [vmem:[%s8740_s6 + $0x58] sm:$0x3f]  ;;  %8797 = vst [vmem:[#allocation19_spill] sm:$0xff] %v7222_v40 }
  0xa1   : > { %6364 = vmatprep.subr.mxu1 %v1909_v12  ;;  %3726 = vrot.lane.b32.xlu1 %v7187_v31, %s6731_s0  ;;  %8794 = vst [vmem:[#allocation16_spill] sm:$0xff] %v7194_v32 }
  0xa2   : > { %v860_v47 = vadd.f32 %v848_v46, %v788_v44  ;;  %v861_v48 = vadd.f32 %v848_v46, %v789_v45  ;;  %6365 = vmatpush3.msra.mxu1 %v1909_v12  ;;  %3740 = vrot.lane.b32.xlu0 %v7194_v32, %s6731_s0 }
  0xa4   : > { %6366 = vmatprep.mubr.msk.f32.mxu1 %vm1911_vm1, %v860_v47 }
  0xa5   : > { %6367 = vmatmul.mubr.msk.f32.vlgmr.msra.gmra.mxu1 %vm1911_vm1, %v861_v48  ;;  %3736 = vrot.lane.b32.xlu1 %v7201_v33, %s6731_s0 }
  0xa6   : > { %6380 = vmatprep.mubr.msk.f32.mxu1 %vm1911_vm1, %v6979_v50  ;;  %3588 = vrot.lane.b32.xlu0 %v7208_v34, %s6731_s0 }
  0xa9   : > { %3730 = vrot.lane.b32.xlu1 %v7215_v39, %s6731_s0 }
  0xad   : > { %3738 = vrot.lane.b32.xlu1 %v7222_v40, %s6731_s0 }
 0x153   : > { %v6333_v57 = vpop.f32.mrf.mxu0 }
 0x154   : > { %6369 = vmatprep.subr.msk.mxu0 %vm1616_vm0, %v6333_v57 }
 0x155   : > { %v1987_v58 = vpop.f32.mrf.mxu0  ;;  %6370 = vmatpush3.msk.msra.mxu0 %vm1616_vm0, %v6333_v57 }
 0x156   : > { %6371 = vmatprep.subr.mxu0 %v1987_v58 }
 0x157   : > { %v7030_v60 = vpop.f32.mrf.mxu1  ;;  %6372 = vmatpush3.msra.mxu0 %v1987_v58 }
 0x158   : > { %v6347_v63 = vpop.f32.mrf.mxu0  ;;  %6376 = vmatprep.subr.msk.mxu1 %vm1616_vm0, %v7030_v60  ;;  %6374 = vmatmul.mubr.msk.f32.vlgmr.msra.gmra.mxu0 %vm1911_vm1, %v2417_v59 }
 0x159   : > { %6383 = vmatprep.subr.msk.mxu0 %vm1616_vm0, %v6347_v63  ;;  %v7036_v0 = vpop.f32.mrf.mxu1  ;;  %6377 = vmatpush3.msk.msra.mxu1 %vm1616_vm0, %v7030_v60 }
 0x15a   : > { %v2155_v2 = vpop.f32.mrf.mxu0  ;;  %6384 = vmatpush3.msk.msra.mxu0 %vm1616_vm0, %v6347_v63  ;;  %6378 = vmatprep.subr.mxu1 %v7036_v0 }
 0x15b   : > { %6385 = vmatprep.subr.mxu0 %v2155_v2  ;;  %6379 = vmatpush3.msra.mxu1 %v7036_v0 }
 0x15c   : > { %6386 = vmatpush3.msra.mxu0 %v2155_v2  ;;  %6387 = vmatprep.mubr.msk.f32.mxu0 %vm1911_vm1, %v7043_v1 }
 0x15d   : > { %6388 = vmatmul.mubr.msk.f32.vlgmr.msra.gmra.mxu0 %vm1911_vm1, %v2421_v3  ;;  %6381 = vmatmul.mubr.msk.f32.vlgmr.msra.gmra.mxu1 %vm1911_vm1, %v2419_v4 }
 0x15e   : > { %6401 = vmatprep.mubr.msk.f32.mxu0 %vm1911_vm1, %v7057_v5  ;;  %6394 = vmatprep.mubr.msk.f32.mxu1 %vm1911_vm1, %v7062_v6 }
 0x15f   : > { %v6354_v7 = vpop.f32.mrf.mxu1  ;;  %v6361_v8 = vpop.f32.mrf.mxu0 }
 0x160   : > { %6390 = vmatprep.subr.msk.mxu1 %vm1616_vm0, %v6354_v7  ;;  %6397 = vmatprep.subr.msk.mxu0 %vm1616_vm0, %v6361_v8 }
 0x161   : > { %v2239_v9 = vpop.f32.mrf.mxu1  ;;  %v2323_v10 = vpop.f32.mrf.mxu0  ;;  %6391 = vmatpush3.msk.msra.mxu1 %vm1616_vm0, %v6354_v7  ;;  %6398 = vmatpush3.msk.msra.mxu0 %vm1616_vm0, %v6361_v8 }
 0x162   : > { %6392 = vmatprep.subr.mxu1 %v2239_v9  ;;  %6399 = vmatprep.subr.mxu0 %v2323_v10 }
 0x163   : > { %6393 = vmatpush3.msra.mxu1 %v2239_v9  ;;  %6400 = vmatpush3.msra.mxu0 %v2323_v10 }
 0x164   : > { %6402 = vmatmul.mubr.msk.f32.vlgmr.msra.gmra.mxu0 %vm1911_vm1, %v2425_v13  ;;  %6411 = vmatprep.subr.msk.mxu0 %vm1616_vm0, %v6333_v57  ;;  %v7269_v13 = vld [vmem:[%s8741_s7 + $0x28] sm:$0x3f] }
 0x165   : > { %v6368_v15 = vpop.f32.mrf.mxu1  ;;  %6395 = vmatmul.mubr.msk.f32.vlgmr.msra.gmra.mxu1 %vm1911_vm1, %v2423_v14  ;;  %6412 = vmatpush3.msk.msra.mxu0 %vm1616_vm0, %v6333_v57  ;;  %v7275_v14 = vld [vmem:[%s8741_s7] sm:$0xff] }
 0x166   : > { %6404 = vmatprep.subr.msk.mxu1 %vm1616_vm0, %v6368_v15  ;;  %6413 = vmatprep.subr.mxu0 %v1987_v58 }
 0x167   : > { %v2407_v18 = vpop.f32.mrf.mxu1  ;;  %6405 = vmatpush3.msk.msra.mxu1 %vm1616_vm0, %v6368_v15  ;;  %6414 = vmatpush3.msra.mxu0 %v1987_v58 }
 0x168   : > { %6415 = vmatprep.mubr.msk.f32.mxu0 %vm1911_vm1, %v7089_v16  ;;  %6406 = vmatprep.subr.mxu1 %v2407_v18 }
 0x169   : > { %6416 = vmatmul.mubr.msk.f32.vlgmr.msra.gmra.mxu0 %vm1911_vm1, %v2933_v17  ;;  %6425 = vmatprep.subr.msk.mxu0 %vm1616_vm0, %v6347_v63  ;;  %v7291_v17 = vld [vmem:[%s8741_s7 + $0x18] sm:$0x3f] }
 0x16a   : > { %6407 = vmatpush3.msra.mxu1 %v2407_v18  ;;  %6408 = vmatprep.mubr.msk.f32.mxu1 %vm1911_vm1, %v7099_v19 }
 0x16b   : > { %6426 = vmatpush3.msk.msra.mxu0 %vm1616_vm0, %v6347_v63  ;;  %6409 = vmatmul.mubr.msk.f32.vlgmr.msra.gmra.mxu1 %vm1911_vm1, %v2427_v20  ;;  %v7307_v20 = vld [vmem:[%s8741_s7 + $0x20] sm:$0xff] }
 0x16c   : > { %6418 = vmatprep.subr.msk.mxu1 %vm1616_vm0, %v7030_v60  ;;  %6427 = vmatprep.subr.mxu0 %v2155_v2 }
 0x16d   : > { %6419 = vmatpush3.msk.msra.mxu1 %vm1616_vm0, %v7030_v60  ;;  %6428 = vmatpush3.msra.mxu0 %v2155_v2 }
 0x16e   : > { %6420 = vmatprep.subr.mxu1 %v7036_v0  ;;  %6429 = vmatprep.mubr.msk.f32.mxu0 %vm1911_vm1, %v7115_v21 }
 0x16f   : > { %6439 = vmatprep.subr.msk.mxu0 %vm1616_vm0, %v6361_v8  ;;  %6421 = vmatpush3.msra.mxu1 %v7036_v0 }
 0x170   : > { %6422 = vmatprep.mubr.msk.f32.mxu1 %vm1911_vm1, %v7124_v22  ;;  %6430 = vmatmul.mubr.msk.f32.vlgmr.msra.gmra.mxu0 %vm1911_vm1, %v2937_v23  ;;  %v7316_v23 = vld [vmem:[%s8741_s7 + $0x48] sm:$0x3f] }
 0x171   : > { %6440 = vmatpush3.msk.msra.mxu0 %vm1616_vm0, %v6361_v8  ;;  %6423 = vmatmul.mubr.msk.f32.vlgmr.msra.gmra.mxu1 %vm1911_vm1, %v2935_v24  ;;  %v7322_v24 = vld [vmem:[%s8741_s7 + $0x40] sm:$0xff] }
 0x172   : > { %6432 = vmatprep.subr.msk.mxu1 %vm1616_vm0, %v6354_v7  ;;  %6441 = vmatprep.subr.mxu0 %v2323_v10 }
 0x173   : > { %6433 = vmatpush3.msk.msra.mxu1 %vm1616_vm0, %v6354_v7  ;;  %6442 = vmatpush3.msra.mxu0 %v2323_v10 }
 0x174   : > { %6434 = vmatprep.subr.mxu1 %v2239_v9  ;;  %6436 = vmatprep.mubr.msk.f32.mxu1 %vm1911_vm1, %v7145_v25 }
 0x175   : > { %6435 = vmatpush3.msra.mxu1 %v2239_v9  ;;  %6443 = vmatprep.mubr.msk.f32.mxu0 %vm1911_vm1, %v2940_v26  ;;  %v7329_v26 = vld [vmem:[%s8741_s7 + $0x30] sm:$0xff] }
 0x176   : > { %6446 = vmatprep.subr.msk.mxu1 %vm1616_vm0, %v6368_v15  ;;  %6437 = vmatmul.mubr.msk.f32.vlgmr.msra.gmra.mxu1 %vm1911_vm1, %v2939_v27  ;;  %v7336_v27 = vld [vmem:[%s8741_s7 + $0x58] sm:$0x3f] }
 0x177   : > { %6447 = vmatpush3.msk.msra.mxu1 %vm1616_vm0, %v6368_v15  ;;  %6450 = vmatprep.mubr.msk.f32.mxu1 %vm1911_vm1, %v2942_v11  ;;  %v7285_v15 = vld [vmem:[%s8741_s7 + $0x10] sm:$0xff] }
 0x178   : > { %6448 = vmatprep.subr.mxu1 %v2407_v18  ;;  %6444 = vmatmul.mubr.msk.f32.vlgmr.msra.gmra.mxu0 %vm1911_vm1, %v2941_v28  ;;  %v7343_v11 = vld [vmem:[%s8741_s7 + $0x50] sm:$0xff]  ;;  %v3721_v28 = vpop.permute.xlu0 %3720 }
 0x179   : > { %6449 = vmatpush3.msra.mxu1 %v2407_v18  ;;  %6457 = vmatprep.mubr.msk.f32.mxu0 %vm1911_vm1, %v6972_v49  ;;  %v7301_v18 = vld [vmem:[%s8741_s7 + $0x38] sm:$0x3f] }
 0x17a   : > { %6451 = vmatmul.mubr.msk.f32.vlgmr.msra.gmra.mxu1 %vm1911_vm1, %v2943_v29 }
 0x17b   : > { %6464 = vmatprep.mubr.msk.f32.mxu1 %vm1911_vm1, %v6979_v50 }
 0x17c   : > { %v3725_v29 = vpop.permute.xlu0 %3724 }
 0x218   : > { %v7226_v41 = vpop.f32.mrf.mxu0 }
 0x21a   : > { %v7228_v42 = vpop.f32.mrf.mxu0 }
 0x21d   : > { %v7230_v12 = vpop.f32.mrf.mxu0  ;;  %v7232_v43 = vpop.f32.mrf.mxu1 }
 0x21f   : > { %v7234_v44 = vpop.f32.mrf.mxu0  ;;  %v7236_v45 = vpop.f32.mrf.mxu1 }
 0x224   : > { %v7238_v46 = vpop.f32.mrf.mxu0 }
 0x225   : > { %v7240_v47 = vpop.f32.mrf.mxu1 }
 0x226   : > { %v7242_v48 = vpop.f32.mrf.mxu0 }
 0x227   : > { %v7244_v49 = vpop.f32.mrf.mxu1 }
 0x229   : > { %v6417_v50 = vpop.f32.mrf.mxu0 }
 0x22a   : > { %3492 = vrot.lane.b32.xlu0 %v6417_v50, %s6731_s0 }
 0x22b   : > { %v7247_v57 = vpop.f32.mrf.mxu1  ;;  %v3016_v60 = vpop.f32.mrf.mxu0 }
 0x22d   : > { %v7249_v58 = vpop.f32.mrf.mxu1 }
 0x22e   : > { %3444 = vrot.lane.b32.xlu0 %v6417_v50, %s6732_s20  ;;  %v3723_v50 = vpop.permute.xlu0 %3722 }
 0x230   : > { %v6431_v0 = vpop.f32.mrf.mxu0 }
 0x231   : > { %v6424_v59 = vpop.f32.mrf.mxu1 }
 0x232   : > { %3496 = vrot.lane.b32.xlu1 %v6424_v59, %s6731_s0  ;;  %v3178_v4 = vpop.f32.mrf.mxu0 }
 0x233   : > { %v3097_v63 = vpop.f32.mrf.mxu1 }
 0x234   : > { %3494 = vrot.lane.b32.xlu0 %v3097_v63, %s6731_s0 }
 0x236   : > { %3448 = vrot.lane.b32.xlu1 %v6424_v59, %s6732_s20  ;;  %v6438_v2 = vpop.f32.mrf.mxu1  ;;  %v3719_v59 = vpop.permute.xlu1 %3718 }
 0x238   : > { %3500 = vrot.lane.b32.xlu0 %v6431_v0, %s6731_s0  ;;  %v3259_v3 = vpop.f32.mrf.mxu1  ;;  %v6445_v8 = vpop.f32.mrf.mxu0 }
 0x23a   : > { %3490 = vrot.lane.b32.xlu1 %v3016_v60, %s6731_s0  ;;  %v6452_v7 = vpop.f32.mrf.mxu1  ;;  %v3340_v9 = vpop.f32.mrf.mxu0 }
 0x23c   : > { %3504 = vrot.lane.b32.xlu0 %v6438_v2, %s6731_s0  ;;  %v3421_v10 = vpop.f32.mrf.mxu1 }
 0x23e   : > { %3442 = vrot.lane.b32.xlu1 %v3016_v60, %s6732_s20  ;;  %v3733_v60 = vpop.permute.xlu0 %3732 }
 0x240   : > { %3502 = vrot.lane.b32.xlu0 %v3259_v3, %s6731_s0 }
 0x242   : > { %3498 = vrot.lane.b32.xlu1 %v3178_v4, %s6731_s0 }
 0x244   : > { %3512 = vrot.lane.b32.xlu0 %v6452_v7, %s6731_s0 }
 0x246   : > { %3508 = vrot.lane.b32.xlu1 %v6445_v8, %s6731_s0 }
 0x248   : > { %3452 = vrot.lane.b32.xlu0 %v6431_v0, %s6732_s20  ;;  %v3735_v0 = vpop.permute.xlu0 %3734 }
 0x24a   : > { %3506 = vrot.lane.b32.xlu1 %v3340_v9, %s6731_s0 }
 0x24c   : > { %3450 = vrot.lane.b32.xlu0 %v3178_v4, %s6732_s20 }
 0x24e   : > { %3510 = vrot.lane.b32.xlu1 %v3421_v10, %s6731_s0 }
 0x250   : > { %3596 = vrot.lane.b32.xlu0 %v7269_v13, %s6731_s0 }
 0x252   : > { %3586 = vrot.lane.b32.xlu1 %v7275_v14, %s6731_s0 }
 0x254   : > { %3456 = vrot.lane.b32.xlu0 %v6438_v2, %s6732_s20 }
 0x256   : > { %3446 = vrot.lane.b32.xlu1 %v3097_v63, %s6732_s20  ;;  %v3729_v63 = vpop.permute.xlu1 %3728 }
 0x258   : > { %3590 = vrot.lane.b32.xlu0 %v7285_v15, %s6731_s0 }
 0x25a   : > { %3592 = vrot.lane.b32.xlu1 %v7291_v17, %s6731_s0  ;;  %v3727_v2 = vpop.permute.xlu1 %3726 }
 0x25c   : > { %3454 = vrot.lane.b32.xlu0 %v3259_v3, %s6732_s20  ;;  %v3741_v3 = vpop.permute.xlu0 %3740 }
 0x25e   : > { %3460 = vrot.lane.b32.xlu1 %v6445_v8, %s6732_s20  ;;  %v3737_v4 = vpop.permute.xlu1 %3736 }
 0x260   : > { %3600 = vrot.lane.b32.xlu0 %v7301_v18, %s6731_s0 }
 0x262   : > { %3594 = vrot.lane.b32.xlu1 %v7307_v20, %s6731_s0  ;;  %v3731_v8 = vpop.permute.xlu1 %3730 }
 0x264   : > { %3464 = vrot.lane.b32.xlu0 %v6452_v7, %s6732_s20  ;;  %v3589_v7 = vpop.permute.xlu0 %3588 }
 0x266   : > { %3604 = vrot.lane.b32.xlu1 %v7316_v23, %s6731_s0  ;;  %v3739_v25 = vpop.permute.xlu1 %3738 }
 0x268   : > { %3602 = vrot.lane.b32.xlu0 %v7322_v24, %s6731_s0 }
 0x26a   : > { %3598 = vrot.lane.b32.xlu1 %v7329_v26, %s6731_s0 }
 0x26c   : > { %3608 = vrot.lane.b32.xlu0 %v7336_v27, %s6731_s0 }
 0x26e   : > { %3606 = vrot.lane.b32.xlu1 %v7343_v11, %s6731_s0 }
 0x272   : > { %3458 = vrot.lane.b32.xlu1 %v3340_v9, %s6732_s20 }
 0x276   : > { %3462 = vrot.lane.b32.xlu1 %v3421_v10, %s6732_s20 }
 0x29c   : > { %v3493_v36 = vpop.permute.xlu0 %3492 }
 0x29d   : > { %v3527_v38 = vadd.f32 %v7226_v41, %v3493_v36 }
 0x29f   : > { %v3755_v62 = vmul.f32 %v3721_v28, %v3527_v38 }
 0x2a0   : > { %v7352_v9 = vpop.permute.xlu0 %3444 }
 0x2a1   : > { %3780 = vrot.lane.b32.xlu0 %v3755_v62, %s6732_s20 }
 0x2a4   : > { %v3497_v10 = vpop.permute.xlu1 %3496 }
 0x2a5   : > { %v3529_v37 = vadd.f32 %v7232_v43, %v3497_v10 }
 0x2a6   : > { %v3495_v61 = vpop.permute.xlu0 %3494 }
 0x2a7   : > { %v3757_v35 = vmul.f32 %v3725_v29, %v3529_v37  ;;  %v3528_v22 = vadd.f32 %v3495_v61, %v7236_v45 }
 0x2a8   : > { %v7357_v21 = vpop.permute.xlu1 %3448 }
 0x2a9   : > { %3784 = vrot.lane.b32.xlu0 %v3757_v35, %s6732_s20  ;;  %v3756_v40 = vmul.f32 %v3723_v50, %v3528_v22 }
 0x2aa   : > { %v3501_v16 = vpop.permute.xlu0 %3500 }
 0x2ab   : > { %v3531_v62 = vadd.f32 %v7230_v12, %v3501_v16 }
 0x2ac   : > { %v3491_v36 = vpop.permute.xlu1 %3490 }
 0x2ad   : > { %v3526_v28 = vadd.f32 %v3491_v36, %v7228_v42  ;;  %3782 = vrot.lane.b32.xlu0 %v3756_v40, %s6732_s20  ;;  %v3759_v29 = vmul.f32 %v3729_v63, %v3531_v62 }
 0x2ae   : > { %v3505_v19 = vpop.permute.xlu0 %3504 }
 0x2af   : > { %v3754_v30 = vmul.f32 %v3719_v59, %v3526_v28  ;;  %v3533_v5 = vadd.f32 %v7240_v47, %v3505_v19 }
 0x2b0   : > { %v7363_v10 = vpop.permute.xlu1 %3442 }
 0x2b1   : > { %3778 = vrot.lane.b32.xlu1 %v3754_v30, %s6732_s20  ;;  %v3761_v32 = vmul.f32 %v3733_v60, %v3533_v5 }
 0x2b2   : > { %v3503_v61 = vpop.permute.xlu0 %3502 }
 0x2b3   : > { %v3532_v30 = vadd.f32 %v3503_v61, %v7244_v49 }
 0x2b4   : > { %v3499_v35 = vpop.permute.xlu1 %3498 }
 0x2b5   : > { %3788 = vrot.lane.b32.xlu1 %v3759_v29, %s6732_s20  ;;  %v3530_v36 = vadd.f32 %v3499_v35, %v7234_v44  ;;  %v3760_v29 = vmul.f32 %v3731_v8, %v3532_v30 }
 0x2b6   : > { %v3513_v50 = vpop.permute.xlu0 %3512 }
 0x2b7   : > { %v3758_v59 = vmul.f32 %v3727_v2, %v3530_v36  ;;  %v3537_v35 = vadd.f32 %v7247_v57, %v3513_v50  ;;  %v3623_v50 = vmul.f32 %v3589_v7, %v3527_v38 }
 0x2b8   : > { %v3509_v40 = vpop.permute.xlu1 %3508 }
 0x2b9   : > { %v3535_v33 = vadd.f32 %v7238_v46, %v3509_v40  ;;  %3792 = vrot.lane.b32.xlu1 %v3761_v32, %s6732_s20 }
 0x2ba   : > { %v7371_v16 = vpop.permute.xlu0 %3452 }
 0x2bb   : > { %v3763_v63 = vmul.f32 %v3737_v4, %v3535_v33 }
 0x2bc   : > { %v3507_v39 = vpop.permute.xlu1 %3506 }
 0x2bd   : > { %v3534_v19 = vadd.f32 %v3507_v39, %v7242_v48  ;;  %3796 = vrot.lane.b32.xlu0 %v3763_v63, %s6732_s20  ;;  %3786 = vrot.lane.b32.xlu1 %v3758_v59, %s6732_s20  ;;  %v3765_v39 = vmul.f32 %v3741_v3, %v3537_v35 }
 0x2be   : > { %v7377_v60 = vpop.permute.xlu0 %3450 }
 0x2bf   : > { %v3762_v40 = vmul.f32 %v3735_v0, %v3534_v19 }
 0x2c0   : > { %v3511_v32 = vpop.permute.xlu1 %3510 }
 0x2c1   : > { %v7381_v31 = vadd.f32 %v3511_v32, %v7249_v58  ;;  %3790 = vrot.lane.b32.xlu1 %v3760_v29, %s6732_s20  ;;  %3794 = vrot.lane.b32.xlu0 %v3762_v40, %s6732_s20 }
 0x2c2   : > { %v3597_v2 = vpop.permute.xlu0 %3596 }
 0x2c3   : > { %v3764_v4 = vmul.f32 %v3739_v25, %v7381_v31  ;;  %v3627_v29 = vmul.f32 %v3597_v2, %v3531_v62 }
 0x2c4   : > { %v3587_v61 = vpop.permute.xlu1 %3586 }
 0x2c5   : > { %3800 = vrot.lane.b32.xlu0 %v3765_v39, %s6732_s20  ;;  %3798 = vrot.lane.b32.xlu1 %v3764_v4, %s6732_s20  ;;  %v3622_v0 = vmul.f32 %v3587_v61, %v3526_v28 }
 0x2c6   : > { %v3457_v8 = vpop.permute.xlu0 %3456 }
 0x2c8   : > { %v3447_v59 = vpop.permute.xlu1 %3446 }
 0x2c9   : > { %3648 = vrot.lane.b32.xlu0 %v3623_v50, %s6732_s20  ;;  %3646 = vrot.lane.b32.xlu1 %v3622_v0, %s6732_s20 }
 0x2ca   : > { %v3591_v63 = vpop.permute.xlu0 %3590 }
 0x2cb   : > { %v3624_v3 = vmul.f32 %v3591_v63, %v3528_v22 }
 0x2cc   : > { %v3593_v40 = vpop.permute.xlu1 %3592 }
 0x2cd   : > { %v3625_v32 = vmul.f32 %v3593_v40, %v3529_v37  ;;  %3656 = vrot.lane.b32.xlu0 %v3627_v29, %s6732_s20 }
 0x2ce   : > { %v3455_v25 = vpop.permute.xlu0 %3454 }
 0x2cf   : > { %3652 = vrot.lane.b32.xlu1 %v3625_v32, %s6732_s20 }
 0x2d0   : > { %v3461_v39 = vpop.permute.xlu1 %3460 }
 0x2d1   : > { %3650 = vrot.lane.b32.xlu0 %v3624_v3, %s6732_s20 }
 0x2d2   : > { %v3601_v38 = vpop.permute.xlu0 %3600 }
 0x2d3   : > { %v3629_v7 = vmul.f32 %v3601_v38, %v3533_v5 }
 0x2d4   : > { %v3595_v28 = vpop.permute.xlu1 %3594 }
 0x2d5   : > { %v3626_v4 = vmul.f32 %v3595_v28, %v3530_v36  ;;  %3660 = vrot.lane.b32.xlu0 %v3629_v7, %s6732_s20  ;;  %v7401_v36 = vsub.f32 %v7226_v41, %v7352_v9 }
 0x2d6   : > { %v3465_v61 = vpop.permute.xlu0 %3464 }
 0x2d7   : > { %3654 = vrot.lane.b32.xlu1 %v3626_v4, %s6732_s20 }
 0x2d8   : > { %v3605_v62 = vpop.permute.xlu1 %3604 }
 0x2d9   : > { %v3631_v37 = vmul.f32 %v3605_v62, %v3535_v33  ;;  %v3695_v33 = vmul.f32 %v7208_v34, %v7401_v36  ;;  %v7417_v34 = vsub.f32 %v7228_v42, %v7363_v10  ;;  %v7430_v10 = vsub.f32 %v7240_v47, %v3457_v8 }
 0x2da   : > { %v3603_v2 = vpop.permute.xlu0 %3602  ;;  %v7443_v47 = vsub.f32 %v7244_v49, %v3455_v25 }
 0x2db   : > { %3664 = vrot.lane.b32.xlu1 %v3631_v37, %s6732_s20  ;;  %v3630_v50 = vmul.f32 %v3603_v2, %v3534_v19  ;;  %v7452_v2 = vsub.f32 %v7238_v46, %v3461_v39 }
 0x2dc   : > { %v3599_v22 = vpop.permute.xlu1 %3598  ;;  %v3700_v49 = vmul.f32 %v7329_v26, %v7443_v47 }
 0x2dd   : > { %v3628_v0 = vmul.f32 %v3599_v22, %v3532_v30  ;;  %v7407_v30 = vsub.f32 %v7232_v43, %v7357_v21 }
 0x2de   : > { %v3609_v63 = vpop.permute.xlu0 %3608 }
 0x2df   : > { %3662 = vrot.lane.b32.xlu1 %v3630_v50, %s6732_s20  ;;  %3658 = vrot.lane.b32.xlu0 %v3628_v0, %s6732_s20  ;;  %v3633_v5 = vmul.f32 %v3609_v63, %v3537_v35  ;;  %v7411_v35 = vsub.f32 %v7236_v45, %v3447_v59  ;;  %v3697_v41 = vmul.f32 %v7291_v17, %v7407_v30 }
 0x2e0   : > { %v3607_v29 = vpop.permute.xlu1 %3606  ;;  %v7424_v45 = vsub.f32 %v7230_v12, %v7371_v16  ;;  %v3694_v17 = vmul.f32 %v7275_v14, %v7417_v34  ;;  %v7437_v12 = vsub.f32 %v7234_v44, %v7377_v60  ;;  %v3701_v14 = vmul.f32 %v7301_v18, %v7430_v10 }
 0x2e1   : > { %v3696_v21 = vmul.f32 %v7285_v15, %v7411_v35  ;;  %v7455_v18 = vsub.f32 %v7247_v57, %v3465_v61  ;;  %v3703_v0 = vmul.f32 %v7316_v23, %v7452_v2  ;;  %v6029_v23 = vld [vmem:[%s8798_s1] ss:$0 sm:$0xff]  ;;  %v3632_v26 = vmul.f32 %v3607_v29, %v7381_v31  ;;  %v6030_v31 = vld [vmem:[%s8798_s1 + $0x1] ss:$0 sm:$0xff]  ;;  %v6032_v29 = vld [vmem:[%s8798_s1 + $0x3] ss:$0 sm:$0xff] }
 0x2e2   : > { %v3699_v15 = vmul.f32 %v7269_v13, %v7424_v45  ;;  %v3698_v13 = vmul.f32 %v7307_v20, %v7437_v12 }
 0x2e3   : > { %3668 = vrot.lane.b32.xlu0 %v3633_v5, %s6732_s20  ;;  %v3705_v46 = vmul.f32 %v7336_v27, %v7455_v18 }
 0x2e4   : > { %v3459_v19 = vpop.permute.xlu1 %3458 }
 0x2e5   : > { %v7446_v8 = vsub.f32 %v7242_v48, %v3459_v19  ;;  %v6039_v19 = vld [vmem:[%s8799_s2 + $0x4] ss:$0 sm:$0xff] }
 0x2e7   : > { %v3702_v48 = vmul.f32 %v7322_v24, %v7446_v8 }
 0x2e8   : > { %v3463_v43 = vpop.permute.xlu1 %3462 }
 0x2e9   : > { %v7469_v61 = vsub.f32 %v7249_v58, %v3463_v43  ;;  %v6031_v58 = vld [vmem:[%s8798_s1 + $0x2] ss:$0 sm:$0xff]  ;;  %v7523_v43 = vld [vmem:[%s8739_s5 + $0x4] sm:$0x7] }
 0x2eb   : > { %v3704_v27 = vmul.f32 %v7343_v11, %v7469_v61  ;;  %v6035_v11 = vld [vmem:[%s8799_s2] ss:$0 sm:$0xff] }
 0x313   : > { %v3781_v40 = vpop.permute.xlu0 %3780 }
 0x314   : > { %v3815_v32 = vadd.f32 %v3781_v40, %v3695_v33  ;;  %v6033_v33 = vld [vmem:[%s8798_s1 + $0x4] ss:$0 sm:$0xff]  ;;  %v6037_v40 = vld [vmem:[%s8799_s2 + $0x2] ss:$0 sm:$0xff] }
 0x316   : > { %3840 = vrot.lane.b32.xlu0 %v3815_v32, %s6731_s0  ;;  %v6034_v32 = vld [vmem:[%s8798_s1 + $0x5] ss:$0 sm:$0xff] }
 0x31b   : > { %v3785_v9 = vpop.permute.xlu0 %3784 }
 0x31c   : > { %v3817_v3 = vadd.f32 %v3785_v9, %v3697_v41  ;;  %v6036_v41 = vld [vmem:[%s8799_s2 + $0x1] ss:$0 sm:$0xff]  ;;  %v6038_v9 = vld [vmem:[%s8799_s2 + $0x3] ss:$0 sm:$0xff] }
 0x31e   : > { %3844 = vrot.lane.b32.xlu0 %v3817_v3, %s6731_s0  ;;  %v6040_v3 = vld [vmem:[%s8799_s2 + $0x5] ss:$0 sm:$0xff] }
 0x31f   : > { %v3783_v38 = vpop.permute.xlu0 %3782 }
 0x320   : > { %v3816_v7 = vadd.f32 %v3783_v38, %v3696_v21  ;;  %v7517_v21 = vld [vmem:[%s8739_s5] sm:$0x7] }
 0x321   : > { %6579 = vpush %v7517_v21 }
 0x322   : > { %3842 = vrot.lane.b32.xlu0 %v3816_v7, %s6731_s0  ;;  %v7528_v7 = vld [vmem:[%s8739_s5 + $0x8] sm:$0x7]  ;;  %6581 = vpush %v7523_v43 }
 0x323   : > { %v3779_v59 = vpop.permute.xlu1 %3778  ;;  %6583 = vpush %v7528_v7 }
 0x324   : > { %v3814_v42 = vadd.f32 %v3779_v59, %v3694_v17  ;;  %v7535_v17 = vld [vmem:[%s8739_s5 + $0xc] sm:$0x7]  ;;  %v7540_v59 = vld [vmem:[%s8739_s5 + $0x10] sm:$0x7] }
 0x325   : > { %6585 = vpush %v7535_v17 }
 0x326   : > { %3838 = vrot.lane.b32.xlu1 %v3814_v42, %s6731_s0  ;;  %6587 = vpush %v7540_v59 }
 0x327   : > { %v3789_v28 = vpop.permute.xlu1 %3788 }
 0x328   : > { %v3819_v4 = vadd.f32 %v3789_v28, %v3699_v15  ;;  %v7547_v15 = vld [vmem:[%s8739_s5 + $0x14] sm:$0x7] }
 0x329   : > { %6589 = vpush %v7547_v15 }
 0x32a   : > { %3848 = vrot.lane.b32.xlu1 %v3819_v4, %s6731_s0 }
 0x32b   : > { %v3793_v16 = vpop.permute.xlu1 %3792 }
 0x32c   : > { %v3821_v62 = vadd.f32 %v3793_v16, %v3701_v14 }
 0x32e   : > { %3852 = vrot.lane.b32.xlu0 %v3821_v62, %s6731_s0 }
 0x32f   : > { %v3797_v44 = vpop.permute.xlu0 %3796  ;;  %v3787_v60 = vpop.permute.xlu1 %3786 }
 0x330   : > { %v3818_v37 = vadd.f32 %v3787_v60, %v3698_v13  ;;  %v3823_v39 = vadd.f32 %v3797_v44, %v3703_v0  ;;  %v3563_v44 = vmul.f32 %v6986_v51, %v7401_v36  ;;  %v3564_v36 = vmul.f32 %v7012_v55, %v7411_v35  ;;  %v3890_v55 = vld [vmem:[%s8747_s13 + $0x18] sm:$0x3f] }
 0x332   : > { %3846 = vrot.lane.b32.xlu1 %v3818_v37, %s6731_s0 }
 0x333   : > { %v3795_v25 = vpop.permute.xlu0 %3794  ;;  %v3791_v22 = vpop.permute.xlu1 %3790 }
 0x334   : > { %v3822_v20 = vadd.f32 %v3795_v25, %v3702_v48  ;;  %v3820_v50 = vadd.f32 %v3791_v22, %v3700_v49  ;;  %v3565_v25 = vmul.f32 %v6998_v53, %v7407_v30  ;;  %v3562_v53 = vmul.f32 %v6993_v52, %v7417_v34  ;;  %v3888_v34 = vld [vmem:[%s8747_s13 + $0x8] sm:$0x3f] }
 0x336   : > { %3854 = vrot.lane.b32.xlu0 %v3822_v20, %s6731_s0  ;;  %3850 = vrot.lane.b32.xlu1 %v3820_v50, %s6731_s0 }
 0x337   : > { %v3801_v57 = vpop.permute.xlu0 %3800  ;;  %v3799_v63 = vpop.permute.xlu1 %3798 }
 0x338   : > { %v3825_v24 = vadd.f32 %v3801_v57, %v3705_v46  ;;  %v3824_v5 = vadd.f32 %v3799_v63, %v3704_v27  ;;  %v8800_v27 = vld [vmem:[#allocation15_spill] sm:$0xff] }
 0x33a   : > { %3860 = vrot.lane.b32.xlu0 %v3825_v24, %s6731_s0  ;;  %3856 = vrot.lane.b32.xlu1 %v3823_v39, %s6731_s0  ;;  %v3567_v24 = vmul.f32 %v7005_v54, %v7424_v45  ;;  %v3569_v54 = vmul.f32 %v7021_v56, %v7430_v10  ;;  %v8801_v10 = vld [vmem:[#allocation18_spill] sm:$0xff] }
 0x33b   : > { %v3649_v38 = vpop.permute.xlu0 %3648  ;;  %v3647_v16 = vpop.permute.xlu1 %3646 }
 0x33c   : > { %v3683_v60 = vsub.f32 %v3563_v44, %v3649_v38  ;;  %v3682_v35 = vsub.f32 %v3562_v53, %v3647_v16  ;;  %v8804_v38 = vld [vmem:[#allocation8_spill] sm:$0xff]  ;;  %v4406_v53 = vld [vmem:[%s8748_s14 + $0x18] sm:$0x3f] }
 0x33e   : > { %611 = vperm.xlu0 %6701, %v6029_v23   ;;  %3666 = vrot.lane.b32.xlu1 %v3632_v26, %s6732_s20 }
 0x33f   : > { %v3657_v42 = vpop.permute.xlu0 %3656 }
 0x340   : > { %v3687_v23 = vsub.f32 %v3567_v24, %v3657_v42  ;;  %v8813_v24 = vld [vmem:[#allocation4_spill] sm:$0xff] }
 0x341   : > { %v3653_v62 = vpop.permute.xlu1 %3652 }
 0x342   : > { %619 = vperm.xlu0 %6701, %v6031_v58   ;;  %3858 = vrot.lane.b32.xlu1 %v3824_v5, %s6731_s0  ;;  %v3685_v20 = vsub.f32 %v3565_v25, %v3653_v62  ;;  %v3566_v58 = vmul.f32 %v8800_v27, %v7437_v12  ;;  %v3892_v12 = vld [vmem:[%s8747_s13 + $0x28] sm:$0x3f] }
 0x343   : > { %v3651_v28 = vpop.permute.xlu0 %3650 }
 0x344   : > { %v3684_v0 = vsub.f32 %v3564_v36, %v3651_v28  ;;  %v8805_v28 = vld [vmem:[#allocation14_spill] sm:$0xff] }
 0x346   : > { %627 = vperm.xlu0 %6701, %v6033_v33   ;;  %615 = vperm.xlu1 %6702, %v6030_v31   ;;  %v3568_v33 = vmul.f32 %v8801_v10, %v7443_v47 }
 0x347   : > { %v3661_v4 = vpop.permute.xlu0 %3660 }
 0x349   : > { %v3655_v37 = vpop.permute.xlu1 %3654 }
 0x34a   : > { %683 = vperm.xlu0 %6701, %v6035_v11   ;;  %623 = vperm.xlu1 %6702, %v6032_v29   ;;  %v3686_v56 = vsub.f32 %v3566_v58, %v3655_v37 }
 0x34d   : > { %v7565_v22 = vpop.permute.xlu1 %3664 }
 0x34e   : > { %691 = vperm.xlu0 %6701, %v6037_v40   ;;  %631 = vperm.xlu1 %6702, %v6034_v32   ;;  %v8802_v32 = vld [vmem:[#allocation17_spill] sm:$0xff] }
 0x351   : > { %v7550_v14 = vpop.permute.xlu0 %3658  ;;  %v3663_v46 = vpop.permute.xlu1 %3662 }
 0x352   : > { %699 = vperm.xlu0 %6701, %v6039_v19   ;;  %687 = vperm.xlu1 %6702, %v6036_v41   ;;  %v3688_v11 = vsub.f32 %v3568_v33, %v7550_v14  ;;  %v3571_v19 = vmul.f32 %v8802_v32, %v7452_v2  ;;  %v8803_v41 = vld [vmem:[#allocation16_spill] sm:$0xff]  ;;  %v3570_v2 = vmul.f32 %v8805_v28, %v7446_v8  ;;  %v8817_v33 = vld [vmem:[#allocation3_spill] sm:$0xff] }
 0x353   : > { %v3573_v47 = vmul.f32 %v8803_v41, %v7455_v18 }
 0x354   : > { %v3691_v42 = vsub.f32 %v3571_v19, %v7565_v22  ;;  %v3690_v16 = vsub.f32 %v3570_v2, %v3663_v46  ;;  %v4408_v46 = vld [vmem:[%s8748_s14 + $0x28] sm:$0x3f] }
 0x355   : > { %v7552_v13 = vpop.permute.xlu0 %3668 }
 0x356   : > { %695 = vperm.xlu1 %6702, %v6038_v9  }
 0x35a   : > { %703 = vperm.xlu1 %6702, %v6040_v3   ;;  %v3894_v3 = vld [vmem:[%s8747_s13 + $0x38] sm:$0x3f] }
 0x388   : > { %v3841_v48 = vpop.permute.xlu0 %3840 }
 0x389   : > { %v7557_v49 = vsel %vm3874_vm2, %v3683_v60, %v3841_v48  ;;  %v8806_v60 = vld [vmem:[#allocation10_spill] sm:$0xff]  ;;  %v8807_v48 = vld [vmem:[#allocation19_spill] sm:$0xff] }
 0x38a   : > { %6453 = vmatprep.subr.msk.mxu0 %vm1616_vm0, %v7557_v49  ;;  %v3572_v25 = vmul.f32 %v8807_v48, %v7469_v61  ;;  %v4404_v61 = vld [vmem:[%s8748_s14 + $0x8] sm:$0x3f] }
 0x38b   : > { %6454 = vmatpush3.msk.msra.mxu0 %vm1616_vm0, %v7557_v49 }
 0x390   : > { %v3845_v51 = vpop.permute.xlu0 %3844 }
 0x391   : > { %v7570_v50 = vsel %vm3874_vm2, %v3685_v20, %v3845_v51  ;;  %v8808_v20 = vld [vmem:[#allocation9_spill] sm:$0xff] }
 0x392   : > { %6460 = vmatprep.subr.msk.mxu1 %vm1616_vm0, %v7570_v50 }
 0x393   : > { %6461 = vmatpush3.msk.msra.mxu1 %vm1616_vm0, %v7570_v50 }
 0x394   : > { %v3843_v57 = vpop.permute.xlu0 %3842 }
 0x395   : > { %v7579_v30 = vsel %vm3874_vm2, %v3684_v0, %v3843_v57  ;;  %v8809_v57 = vld [vmem:[#allocation11_spill] sm:$0xff] }
 0x396   : > { %6462 = vmatprep.subr.mxu1 %v7579_v30 }
 0x397   : > { %6463 = vmatpush3.msra.mxu1 %v7579_v30 }
 0x398   : > { %v3839_v39 = vpop.permute.xlu1 %3838  ;;  %6465 = vmatmul.mubr.msk.f32.vlgmr.msra.gmra.mxu1 %vm1911_vm1, %v3890_v55 }
 0x399   : > { %v7590_v52 = vsel %vm3874_vm2, %v3682_v35, %v3839_v39  ;;  %6478 = vmatprep.mubr.msk.f32.mxu1 %vm1911_vm1, %v7062_v6  ;;  %v3689_v6 = vsub.f32 %v3569_v54, %v3661_v4  ;;  %v3693_v4 = vsub.f32 %v3573_v47, %v7552_v13  ;;  %v3896_v13 = vld [vmem:[%s8747_s13 + $0x48] sm:$0x3f]  ;;  %v8811_v35 = vld [vmem:[#allocation2_spill] sm:$0xff] }
 0x39a   : > { %6455 = vmatprep.subr.mxu0 %v7590_v52 }
 0x39b   : > { %6456 = vmatpush3.msra.mxu0 %v7590_v52 }
 0x39c   : > { %v3849_v26 = vpop.permute.xlu1 %3848  ;;  %6458 = vmatmul.mubr.msk.f32.vlgmr.msra.gmra.mxu0 %vm1911_vm1, %v3888_v34 }
 0x39d   : > { %v7603_v45 = vsel %vm3874_vm2, %v3687_v23, %v3849_v26  ;;  %6471 = vmatprep.mubr.msk.f32.mxu0 %vm1911_vm1, %v7043_v1  ;;  %v4410_v23 = vld [vmem:[%s8748_s14 + $0x38] sm:$0x3f] }
 0x39e   : > { %6467 = vmatprep.subr.msk.mxu0 %vm1616_vm0, %v7603_v45  ;;  %v8815_v26 = vld [vmem:[#allocation13_spill] sm:$0xff] }
 0x39f   : > { %6468 = vmatpush3.msk.msra.mxu0 %vm1616_vm0, %v7603_v45 }
 0x3a0   : > { %v3853_v63 = vpop.permute.xlu0 %3852 }
 0x3a1   : > { %v7614_v5 = vsel %vm3874_vm2, %v3689_v6, %v3853_v63 }
 0x3a2   : > { %6474 = vmatprep.subr.msk.mxu1 %vm1616_vm0, %v7614_v5 }
 0x3a3   : > { %6475 = vmatpush3.msk.msra.mxu1 %vm1616_vm0, %v7614_v5 }
 0x3a4   : > { %v3847_v1 = vpop.permute.xlu1 %3846 }
 0x3a5   : > { %v3879_v31 = vsel %vm3874_vm2, %v3686_v56, %v3847_v1  ;;  %v8816_v1 = vld [vmem:[#allocation5_spill] sm:$0xff] }
 0x3a6   : > { %6469 = vmatprep.subr.mxu0 %v3879_v31 }
 0x3a7   : > { %6470 = vmatpush3.msra.mxu0 %v3879_v31 }
 0x3a8   : > { %v3855_v29 = vpop.permute.xlu0 %3854  ;;  %v3851_v40 = vpop.permute.xlu1 %3850  ;;  %6472 = vmatmul.mubr.msk.f32.vlgmr.msra.gmra.mxu0 %vm1911_vm1, %v3892_v12 }
 0x3a9   : > { %v7633_v9 = vsel %vm3874_vm2, %v3688_v11, %v3851_v40  ;;  %6485 = vmatprep.mubr.msk.f32.mxu0 %vm1911_vm1, %v8804_v38  ;;  %v3883_v8 = vsel %vm3874_vm2, %v3690_v16, %v3855_v29 }
 0x3aa   : > { %6476 = vmatprep.subr.mxu1 %v7633_v9 }
 0x3ab   : > { %6477 = vmatpush3.msra.mxu1 %v7633_v9 }
 0x3ac   : > { %v3861_v18 = vpop.permute.xlu0 %3860  ;;  %v3857_v14 = vpop.permute.xlu1 %3856  ;;  %6479 = vmatmul.mubr.msk.f32.vlgmr.msra.gmra.mxu1 %vm1911_vm1, %v3894_v3 }
 0x3ad   : > { %v3886_v62 = vsel %vm3874_vm2, %v3693_v4, %v3861_v18  ;;  %v3884_v44 = vsel %vm3874_vm2, %v3691_v42, %v3857_v14  ;;  %6492 = vmatprep.mubr.msk.f32.mxu1 %vm1911_vm1, %v8806_v60 }
 0x3ae   : > { %6481 = vmatprep.subr.msk.mxu0 %vm1616_vm0, %v3884_v44  ;;  %6488 = vmatprep.subr.msk.mxu1 %vm1616_vm0, %v3886_v62 }
 0x3af   : > { %6482 = vmatpush3.msk.msra.mxu0 %vm1616_vm0, %v3884_v44  ;;  %6489 = vmatpush3.msk.msra.mxu1 %vm1616_vm0, %v3886_v62 }
 0x3b0   : > { %6483 = vmatprep.subr.mxu0 %v3883_v8  ;;  %v3667_v37 = vpop.permute.xlu1 %3666 }
 0x3b1   : > { %6484 = vmatpush3.msra.mxu0 %v3883_v8  ;;  %v3692_v22 = vsub.f32 %v3572_v25, %v3667_v37 }
 0x3b2   : > { %6495 = vmatprep.subr.msk.mxu0 %vm1616_vm0, %v7557_v49  ;;  %6486 = vmatmul.mubr.msk.f32.vlgmr.msra.gmra.mxu0 %vm1911_vm1, %v3896_v13 }
 0x3b3   : > { %6496 = vmatpush3.msk.msra.mxu0 %vm1616_vm0, %v7557_v49  ;;  %6499 = vmatprep.mubr.msk.f32.mxu0 %vm1911_vm1, %v8808_v20  ;;  %v3898_v49 = vld [vmem:[%s8747_s13 + $0x58] sm:$0x3f] }
 0x3b4   : > { %6497 = vmatprep.subr.mxu0 %v7590_v52  ;;  %v3859_v51 = vpop.permute.xlu1 %3858 }
 0x3b5   : > { %v3885_v36 = vsel %vm3874_vm2, %v3692_v22, %v3859_v51  ;;  %6498 = vmatpush3.msra.mxu0 %v7590_v52  ;;  %v8814_v52 = vld [vmem:[#allocation7_spill] sm:$0xff] }
 0x3b6   : > { %6490 = vmatprep.subr.mxu1 %v3885_v36  ;;  %6509 = vmatprep.subr.msk.mxu0 %vm1616_vm0, %v7603_v45  ;;  %v566_v34 = vmul.f32 %v8814_v52, %v8813_v24  ;;  %v568_v10 = vmul.f32 %v8814_v52, %v8816_v1 }
 0x3b7   : > { %6491 = vmatpush3.msra.mxu1 %v3885_v36  ;;  %6500 = vmatmul.mubr.msk.f32.vlgmr.msra.gmra.mxu0 %vm1911_vm1, %v4404_v61 }
 0x3b8   : > { %6510 = vmatpush3.msk.msra.mxu0 %vm1616_vm0, %v7603_v45  ;;  %6502 = vmatprep.subr.msk.mxu1 %vm1616_vm0, %v7570_v50 }
 0x3b9   : > { %6511 = vmatprep.subr.mxu0 %v3879_v31  ;;  %v612_v0 = vpop.permute.xlu0 %611  ;;  %6493 = vmatmul.mubr.msk.f32.vlgmr.msra.gmra.mxu1 %vm1911_vm1, %v3898_v49 }
 0x3ba   : > { %6503 = vmatpush3.msk.msra.mxu1 %vm1616_vm0, %v7570_v50  ;;  %6512 = vmatpush3.msra.mxu0 %v3879_v31  ;;  %v8810_v50 = vld [vmem:[#allocation12_spill] sm:$0xff]  ;;  %v634_v6 = vmul.f32 %v612_v0, %v566_v34 }
 0x3bb   : > { %6504 = vmatprep.subr.mxu1 %v7579_v30  ;;  %6513 = vmatprep.mubr.msk.f32.mxu0 %vm1911_vm1, %v8809_v57 }
 0x3bc   : > { %6523 = vmatprep.subr.msk.mxu0 %vm1616_vm0, %v3884_v44  ;;  %6505 = vmatpush3.msra.mxu1 %v7579_v30  ;;  %v8812_v30 = vld [vmem:[#allocation6_spill] sm:$0xff] }
 0x3bd   : > { %6514 = vmatmul.mubr.msk.f32.vlgmr.msra.gmra.mxu0 %vm1911_vm1, %v4408_v46  ;;  %6506 = vmatprep.mubr.msk.f32.mxu1 %vm1911_vm1, %v8810_v50  ;;  %v620_v55 = vpop.permute.xlu0 %619  ;;  %v567_v39 = vmul.f32 %v8812_v30, %v8811_v35  ;;  %v569_v31 = vmul.f32 %v8812_v30, %v8817_v33  ;;  %v4411_v33 = vld [vmem:[%s8748_s14 + $0x40] sm:$0xff] }
 0x3be   : > { %6524 = vmatpush3.msk.msra.mxu0 %vm1616_vm0, %v3884_v44  ;;  %6516 = vmatprep.subr.msk.mxu1 %vm1616_vm0, %v7614_v5  ;;  %v638_v32 = vmul.f32 %v620_v55, %v566_v34 }
 0x3bf   : > { %6525 = vmatprep.subr.mxu0 %v3883_v8  ;;  %6507 = vmatmul.mubr.msk.f32.vlgmr.msra.gmra.mxu1 %vm1911_vm1, %v4406_v53  ;;  %v635_v63 = vmul.f32 %v612_v0, %v567_v39  ;;  %v639_v19 = vmul.f32 %v620_v55, %v567_v39 }
 0x3c0   : > { %6517 = vmatpush3.msk.msra.mxu1 %vm1616_vm0, %v7614_v5  ;;  %6526 = vmatpush3.msra.mxu0 %v3883_v8 }
 0x3c1   : > { %6518 = vmatprep.subr.mxu1 %v7633_v9  ;;  %6520 = vmatprep.mubr.msk.f32.mxu1 %vm1911_vm1, %v8815_v26  ;;  %v628_v54 = vpop.permute.xlu0 %627  ;;  %v616_v45 = vpop.permute.xlu1 %615 }
 0x3c2   : > { %6519 = vmatpush3.msra.mxu1 %v7633_v9  ;;  %v636_v41 = vmul.f32 %v616_v45, %v568_v10  ;;  %v637_v3 = vmul.f32 %v616_v45, %v569_v31  ;;  %v642_v37 = vmul.f32 %v628_v54, %v566_v34  ;;  %v643_v48 = vmul.f32 %v628_v54, %v567_v39 }
 0x3c3   : > { %6530 = vmatprep.subr.msk.mxu1 %vm1616_vm0, %v3886_v62  ;;  %6521 = vmatmul.mubr.msk.f32.vlgmr.msra.gmra.mxu1 %vm1911_vm1, %v4410_v23 }
 0x3c4   : > { %6531 = vmatpush3.msk.msra.mxu1 %vm1616_vm0, %v3886_v62  ;;  %6527 = vmatprep.mubr.msk.f32.mxu0 %vm1911_vm1, %v4411_v33 }
 0x3c5   : > { %6532 = vmatprep.subr.mxu1 %v3885_v36  ;;  %v684_v27 = vpop.permute.xlu0 %683  ;;  %v624_v58 = vpop.permute.xlu1 %623 }
 0x3c6   : > { %6533 = vmatpush3.msra.mxu1 %v3885_v36  ;;  %v706_v5 = vadd.f32 %v684_v27, %v634_v6  ;;  %v707_v56 = vadd.f32 %v684_v27, %v635_v63  ;;  %v640_v14 = vmul.f32 %v624_v58, %v568_v10  ;;  %v641_v16 = vmul.f32 %v624_v58, %v569_v31 }
 0x3c8   : > { %v875_v12 = vrot.slane %v706_v5, 7  ;;  %v876_v11 = vrot.slane %v707_v56, 7 }
 0x3c9   : > { %v692_v29 = vpop.permute.xlu0 %691  ;;  %v632_v40 = vpop.permute.xlu1 %631 }
 0x3ca   : > { %v905_v47 = vsel %vm874_vm3, 0.0, %v875_v12  ;;  %v877_v9 = vsel %vm874_vm3, %v875_v12, %v876_v11  ;;  %v710_v38 = vadd.f32 %v692_v29, %v638_v32  ;;  %v711_v42 = vadd.f32 %v692_v29, %v639_v19  ;;  %v4413_v12 = vld [vmem:[%s8748_s14 + $0x50] sm:$0xff]  ;;  %v4414_v11 = vld [vmem:[%s8748_s14 + $0x58] sm:$0x3f] }
 0x3cb   : > { %930 = vrot.lane.b32.xlu0 %v905_v47, %s6733_s17  ;;  %v912_v28 = vsel %vm911_vm4, %v877_v9, 0.0  ;;  %v644_v55 = vmul.f32 %v632_v40, %v568_v10  ;;  %v645_v35 = vmul.f32 %v632_v40, %v569_v31  ;;  %v4412_v31 = vld [vmem:[%s8748_s14 + $0x48] sm:$0x3f]  ;;  %6534 = vmatprep.mubr.msk.f32.mxu1 %vm1911_vm1, %v4413_v12 }
 0x3cc   : > { %932 = vrot.lane.b32.xlu1 %v912_v28, %s6733_s17  ;;  %v881_v62 = vrot.slane %v710_v38, 7  ;;  %v882_v44 = vrot.slane %v711_v42, 7  ;;  %6528 = vmatmul.mubr.msk.f32.vlgmr.msra.gmra.mxu0 %vm1911_vm1, %v4412_v31 }
 0x3cd   : > { %v688_v2 = vpop.permute.xlu1 %687  ;;  %v700_v60 = vpop.permute.xlu0 %699  ;;  %6535 = vmatmul.mubr.msk.f32.vlgmr.msra.gmra.mxu1 %vm1911_vm1, %v4414_v11 }
 0x3ce   : > { %v708_v4 = vadd.f32 %v688_v2, %v636_v41  ;;  %v709_v18 = vadd.f32 %v688_v2, %v637_v3  ;;  %v714_v36 = vadd.f32 %v700_v60, %v642_v37  ;;  %v715_v0 = vadd.f32 %v700_v60, %v643_v48 }
 0x3cf   : > { %v883_v53 = vsel %vm874_vm3, %v881_v62, %v882_v44  ;;  %v907_v30 = vsel %vm874_vm3, 0.0, %v881_v62 }
 0x3d0   : > { %v878_v8 = vrot.slane %v708_v4, 7  ;;  %v879_v13 = vrot.slane %v709_v18, 7  ;;  %v887_v39 = vrot.slane %v714_v36, 7  ;;  %v914_v24 = vsel %vm911_vm4, %v883_v53, 0.0 }
 0x3d1   : > { %v696_v25 = vpop.permute.xlu1 %695  ;;  %v888_v52 = vrot.slane %v715_v0, 7 }
 0x3d2   : > { %v712_v22 = vadd.f32 %v696_v25, %v640_v14  ;;  %v713_v20 = vadd.f32 %v696_v25, %v641_v16  ;;  %v906_v51 = vsel %vm874_vm3, 0.0, %v878_v8  ;;  %v880_v61 = vsel %vm874_vm3, %v878_v8, %v879_v13 }
 0x3d3   : > { %934 = vrot.lane.b32.xlu0 %v906_v51, %s6733_s17  ;;  %v913_v49 = vsel %vm911_vm4, %v880_v61, 0.0  ;;  %v889_v27 = vsel %vm874_vm3, %v887_v39, %v888_v52  ;;  %v909_v58 = vsel %vm874_vm3, 0.0, %v887_v39 }
 0x3d4   : > { %v884_v46 = vrot.slane %v712_v22, 7  ;;  %v885_v57 = vrot.slane %v713_v20, 7  ;;  %936 = vrot.lane.b32.xlu1 %v913_v49, %s6733_s17  ;;  %v916_v5 = vsel %vm911_vm4, %v889_v27, 0.0 }
 0x3d5   : > { %v704_v50 = vpop.permute.xlu1 %703 }
 0x3d6   : > { %v716_v34 = vadd.f32 %v704_v50, %v644_v55  ;;  %v717_v23 = vadd.f32 %v704_v50, %v645_v35  ;;  %v886_v26 = vsel %vm874_vm3, %v884_v46, %v885_v57  ;;  %v908_v54 = vsel %vm874_vm3, 0.0, %v884_v46 }
 0x3d7   : > { %938 = vrot.lane.b32.xlu0 %v907_v30, %s6733_s17  ;;  %v915_v45 = vsel %vm911_vm4, %v886_v26, 0.0 }
 0x3d8   : > { %940 = vrot.lane.b32.xlu1 %v914_v24, %s6733_s17  ;;  %v890_v6 = vrot.slane %v716_v34, 7  ;;  %v891_v63 = vrot.slane %v717_v23, 7 }
 0x3da   : > { %v892_v56 = vsel %vm874_vm3, %v890_v6, %v891_v63  ;;  %v910_v1 = vsel %vm874_vm3, 0.0, %v890_v6 }
 0x3db   : > { %942 = vrot.lane.b32.xlu0 %v908_v54, %s6733_s17  ;;  %v917_v10 = vsel %vm911_vm4, %v892_v56, 0.0 }
 0x3dc   : > { %944 = vrot.lane.b32.xlu1 %v915_v45, %s6733_s17 }
 0x3df   : > { %946 = vrot.lane.b32.xlu0 %v909_v58, %s6733_s17 }
 0x3e0   : > { %948 = vrot.lane.b32.xlu1 %v916_v5, %s6733_s17 }
 0x3e3   : > { %950 = vrot.lane.b32.xlu0 %v910_v1, %s6733_s17 }
 0x3e4   : > { %952 = vrot.lane.b32.xlu1 %v917_v10, %s6733_s17  ;;  %s7787_s17 = spop %6579 }
 0x3e5   : > { %s7789_s23 = spop %6581 }
 0x3e6   : > { %s7791_s24 = spop %6583 }
 0x3e7   : > { %1034 = vrot.lane.b32.xlu0 %v7517_v21, %s8772_s19  ;;  %s7793_s25 = spop %6585 }
 0x3e8   : > { %1036 = vrot.lane.b32.xlu1 %v7523_v43, %s8772_s19  ;;  %s7797_s26 = spop %6587 }
 0x3e9   : > { %s7799_s27 = spop %6589 }
 0x3eb   : > { %1038 = vrot.lane.b32.xlu0 %v7528_v7, %s8772_s19 }
 0x3ec   : > { %1040 = vrot.lane.b32.xlu1 %v7535_v17, %s8772_s19 }
 0x3ef   : > { %1042 = vrot.lane.b32.xlu0 %v7540_v59, %s8772_s19 }
 0x3f0   : > { %1044 = vrot.lane.b32.xlu1 %v7547_v15, %s8772_s19 }
 0x43d   : > { %v931_v29 = vpop.permute.xlu0 %930 }
 0x43e   : > { %v933_v40 = vpop.permute.xlu1 %932  ;;  %v967_v60 = vsel %vm966_vm5, 0.0, %v931_v29 }
 0x43f   : > { %v968_v8 = vsel %vm966_vm5, 0.0, %v933_v40  ;;  %v7802_v13 = vsel %vm979_vm6, %v967_v60, 0.0  ;;  %v7910_v60 = vrot.slane %v7517_v21, 1 }
 0x440   : > { %v7805_v37 = vsel %vm979_vm6, %v968_v8, 0.0 }
 0x445   : > { %v935_v32 = vpop.permute.xlu0 %934 }
 0x446   : > { %v937_v19 = vpop.permute.xlu1 %936  ;;  %v969_v25 = vsel %vm966_vm5, 0.0, %v935_v32 }
 0x447   : > { %v970_v22 = vsel %vm966_vm5, 0.0, %v937_v19  ;;  %v7814_v36 = vsel %vm979_vm6, %v969_v25, 0.0  ;;  %v7913_v25 = vrot.slane %v7523_v43, 1 }
 0x448   : > { %v7817_v49 = vsel %vm979_vm6, %v970_v22, 0.0  ;;  %v7916_v22 = vrot.slane %v7528_v7, 1 }
 0x449   : > { %v939_v41 = vpop.permute.xlu0 %938 }
 0x44a   : > { %v941_v47 = vpop.permute.xlu1 %940  ;;  %v971_v0 = vsel %vm966_vm5, 0.0, %v939_v41 }
 0x44b   : > { %v972_v46 = vsel %vm966_vm5, 0.0, %v941_v47  ;;  %v7826_v55 = vsel %vm979_vm6, %v971_v0, 0.0 }
 0x44c   : > { %v7829_v35 = vsel %vm979_vm6, %v972_v46, 0.0 }
 0x44d   : > { %v943_v9 = vpop.permute.xlu0 %942 }
 0x44e   : > { %v945_v3 = vpop.permute.xlu1 %944  ;;  %v973_v30 = vsel %vm966_vm5, 0.0, %v943_v9 }
 0x44f   : > { %v974_v39 = vsel %vm966_vm5, 0.0, %v945_v3  ;;  %v7838_v23 = vsel %vm979_vm6, %v973_v30, 0.0 }
 0x450   : > { %v7841_v26 = vsel %vm979_vm6, %v974_v39, 0.0 }
 0x451   : > { %v947_v38 = vpop.permute.xlu0 %946 }
 0x452   : > { %v949_v42 = vpop.permute.xlu1 %948  ;;  %v975_v54 = vsel %vm966_vm5, 0.0, %v947_v38 }
 0x453   : > { %v976_v45 = vsel %vm966_vm5, 0.0, %v949_v42  ;;  %v7850_v58 = vsel %vm979_vm6, %v975_v54, 0.0 }
 0x454   : > { %v7853_v5 = vsel %vm979_vm6, %v976_v45, 0.0 }
 0x455   : > { %v7783_v28 = vpop.permute.xlu0 %950 }
 0x456   : > { %v7785_v2 = vpop.permute.xlu1 %952  ;;  %v977_v56 = vsel %vm966_vm5, 0.0, %v7783_v28 }
 0x457   : > { %v978_v1 = vsel %vm966_vm5, 0.0, %v7785_v2  ;;  %v7864_v12 = vsel %vm979_vm6, %v977_v56, 0.0 }
 0x458   : > { %v7867_v11 = vsel %vm979_vm6, %v978_v1, 0.0  ;;  %v7937_v0 = vpop.f32.mrf.mxu1 }
 0x459   : > { %v1035_v4 = vpop.permute.xlu0 %1034 }
 0x45a   : > { %6591 = vpush %v1035_v4  ;;  %v1037_v18 = vpop.permute.xlu1 %1036 }
 0x45b   : > { %6593 = vpush %v1037_v18 }
 0x45d   : > { %v1039_v14 = vpop.permute.xlu0 %1038 }
 0x45e   : > { %6595 = vpush %v1039_v14  ;;  %v1041_v16 = vpop.permute.xlu1 %1040 }
 0x45f   : > { %6597 = vpush %v1041_v16 }
 0x461   : > { %v1043_v62 = vpop.permute.xlu0 %1042 }
 0x462   : > { %6599 = vpush %v1043_v62  ;;  %v1045_v44 = vpop.permute.xlu1 %1044 }
 0x463   : > { %6601 = vpush %v1045_v44 }
 0x48b   : > { %s6592_s28 = spop %6591 }
 0x48c   : > { %v1047_v48 = vstv %s6592_s28  ;;  %s6594_s29 = spop %6593 }
 0x48d   : > { %v1064_v20 = vmul.f32 %v1047_v48, %v7802_v13  ;;  %v1065_v51 = vmul.f32 %v1047_v48, %v7805_v37  ;;  %v1050_v61 = vstv %s6594_s29 }
 0x48e   : > { %v1066_v57 = vmul.f32 %v1050_v61, %v7814_v36  ;;  %v1067_v53 = vmul.f32 %v1050_v61, %v7817_v49  ;;  %v7927_v61 = vrot.slane %v7547_v15, 1 }
 0x48f   : > { %1088 = vrot.lane.b32.xlu0 %v1064_v20, %s8772_s19  ;;  %1090 = vrot.lane.b32.xlu1 %v1065_v51, %s8772_s19  ;;  %s6596_s30 = spop %6595  ;;  %v7919_v20 = vrot.slane %v7535_v17, 1  ;;  %v7923_v51 = vrot.slane %v7540_v59, 1 }
 0x490   : > { %v1053_v50 = vstv %s6596_s30  ;;  %s6598_s28 = spop %6597 }
 0x491   : > { %v1068_v24 = vmul.f32 %v1053_v50, %v7826_v55  ;;  %v1069_v52 = vmul.f32 %v1053_v50, %v7829_v35  ;;  %v1056_v34 = vstv %s6598_s28  ;;  %s8774_s28 = smov 126  }
 0x492   : > { %v1070_v6 = vmul.f32 %v1056_v34, %v7838_v23  ;;  %v1071_v63 = vmul.f32 %v1056_v34, %v7841_v26 }
 0x493   : > { %1094 = vrot.lane.b32.xlu1 %v1067_v53, %s8772_s19  ;;  %1092 = vrot.lane.b32.xlu0 %v1066_v57, %s8772_s19  ;;  %s6600_s29 = spop %6599  ;;  %v7941_v57 = vpop.f32.mrf.mxu1 }
 0x494   : > { %v1059_v27 = vstv %s6600_s29  ;;  %s6602_s30 = spop %6601 }
 0x495   : > { %v1072_v10 = vmul.f32 %v1059_v27, %v7850_v58  ;;  %v1073_v33 = vmul.f32 %v1059_v27, %v7853_v5  ;;  %v1062_v31 = vstv %s6602_s30  ;;  %v7945_v53 = vpop.f32.mrf.mxu1  ;;  %v5021_v27 = vld [vmem:[%s8749_s15] sm:$0xff] }
 0x496   : > { %v1074_v29 = vmul.f32 %v1062_v31, %v7864_v12  ;;  %v1075_v40 = vmul.f32 %v1062_v31, %v7867_v11  ;;  %v7977_v31 = vld [vmem:[%s8749_s15 + $0x28] sm:$0xff] }
 0x497   : > { %1098 = vrot.lane.b32.xlu1 %v1069_v52, %s8772_s19  ;;  %1096 = vrot.lane.b32.xlu0 %v1068_v24, %s8772_s19  ;;  %v7949_v30 = vpop.f32.mrf.mxu1 }
 0x499   : > { %v7955_v54 = vpop.f32.mrf.mxu1 }
 0x49b   : > { %1102 = vrot.lane.b32.xlu1 %v1071_v63, %s8772_s19  ;;  %1100 = vrot.lane.b32.xlu0 %v1070_v6, %s8772_s19  ;;  %v7959_v6 = vpop.f32.mrf.mxu1  ;;  %v5022_v63 = vld [vmem:[%s8749_s15 + $0x8] sm:$0xff] }
 0x49c   : > { %6537 = vmatprep.subr.mxu0 %v5022_v63 }
 0x49d   : > { %6538 = vmatpush3.msra.mxu0 %v5022_v63  ;;  %v6508_v1 = vpop.f32.mrf.mxu1 }
 0x49e   : > { %6539 = vmatprep.subr.mxu0 %v5021_v27 }
 0x49f   : > { %1106 = vrot.lane.b32.xlu1 %v1073_v33, %s8772_s19  ;;  %1104 = vrot.lane.b32.xlu0 %v1072_v10, %s8772_s19  ;;  %v5024_v33 = vld [vmem:[%s8749_s15 + $0x18] sm:$0xff] }
 0x4a0   : > { %6540 = vmatpush3.msra.mxu0 %v5021_v27  ;;  %6544 = vmatprep.subr.mxu1 %v5024_v33 }
 0x4a1   : > { %6551 = vmatprep.subr.mxu0 %v7977_v31  ;;  %6545 = vmatpush3.msra.mxu1 %v5024_v33 }
 0x4a3   : > { %1110 = vrot.lane.b32.xlu1 %v1075_v40, %s8772_s19  ;;  %1108 = vrot.lane.b32.xlu0 %v1074_v29, %s8772_s19  ;;  %v5023_v29 = vld [vmem:[%s8749_s15 + $0x10] sm:$0xff] }
 0x4a4   : > { %6546 = vmatprep.subr.mxu1 %v5023_v29 }
 0x4a5   : > { %6547 = vmatpush3.msra.mxu1 %v5023_v29 }
 0x4a7   : > { %1138 = vrot.lane.b32.xlu1 %v7523_v43, %s8774_s28  ;;  %1136 = vrot.lane.b32.xlu0 %v7517_v21, %s8774_s28  ;;  %v7933_v43 = vpop.f32.mrf.mxu0 }
 0x4ab   : > { %1142 = vrot.lane.b32.xlu1 %v7535_v17, %s8774_s28  ;;  %1140 = vrot.lane.b32.xlu0 %v7528_v7, %s8774_s28  ;;  %v7935_v17 = vpop.f32.mrf.mxu0 }
 0x4ad   : > { %v7939_v46 = vpop.f32.mrf.mxu0 }
 0x4af   : > { %1146 = vrot.lane.b32.xlu1 %v7547_v15, %s8774_s28  ;;  %1144 = vrot.lane.b32.xlu0 %v7540_v59, %s8774_s28  ;;  %v7943_v15 = vpop.f32.mrf.mxu0 }
 0x4b1   : > { %v7947_v50 = vpop.f32.mrf.mxu0 }
 0x4b3   : > { %v7953_v34 = vpop.f32.mrf.mxu0 }
 0x4b5   : > { %v6501_v45 = vpop.f32.mrf.mxu0 }
 0x4b7   : > { %v4487_v56 = vpop.f32.mrf.mxu0 }
 0x4b9   : > { %v6515_v10 = vpop.f32.mrf.mxu0 }
 0x4bb   : > { %v4649_v40 = vpop.f32.mrf.mxu0 }
 0x501   : > { %v7885_v32 = vpop.permute.xlu0 %1088  ;;  %v7887_v19 = vpop.permute.xlu1 %1090 }
 0x505   : > { %v7889_v41 = vpop.permute.xlu0 %1092  ;;  %v7891_v47 = vpop.permute.xlu1 %1094 }
 0x509   : > { %v7893_v9 = vpop.permute.xlu0 %1096  ;;  %v7895_v3 = vpop.permute.xlu1 %1098 }
 0x50d   : > { %v7897_v38 = vpop.permute.xlu0 %1100  ;;  %v7899_v42 = vpop.permute.xlu1 %1102 }
 0x511   : > { %v7901_v28 = vpop.permute.xlu0 %1104  ;;  %v7903_v2 = vpop.permute.xlu1 %1106 }
 0x515   : > { %v7905_v4 = vpop.permute.xlu0 %1108  ;;  %v7907_v18 = vpop.permute.xlu1 %1110 }
 0x519   : > { %v1137_v14 = vpop.permute.xlu0 %1136  ;;  %v1139_v16 = vpop.permute.xlu1 %1138 }
 0x51a   : > { %6603 = vpush %v1137_v14  ;;  %v4568_v14 = vpop.f32.mrf.mxu1 }
 0x51b   : > { %6605 = vpush %v1139_v16  ;;  %v6529_v16 = vpop.f32.mrf.mxu0 }
 0x51d   : > { %v1141_v62 = vpop.permute.xlu0 %1140  ;;  %v1143_v44 = vpop.permute.xlu1 %1142 }
 0x51e   : > { %6607 = vpush %v1141_v62  ;;  %v6522_v62 = vpop.f32.mrf.mxu1 }
 0x51f   : > { %6609 = vpush %v1143_v44  ;;  %v7994_v44 = vld [vmem:[%s8749_s15 + $0x38] sm:$0xff] }
 0x520   : > { %6558 = vmatprep.subr.mxu1 %v7994_v44 }
 0x521   : > { %v1145_v8 = vpop.permute.xlu0 %1144  ;;  %v1147_v48 = vpop.permute.xlu1 %1146 }
 0x522   : > { %6611 = vpush %v1145_v8  ;;  %v4811_v8 = vpop.f32.mrf.mxu0 }
 0x523   : > { %6613 = vpush %v1147_v48  ;;  %v4730_v48 = vpop.f32.mrf.mxu1 }
 0x524   : > { %6615 = vpush %v7910_v60 }
 0x525   : > { %6617 = vpush %v7913_v25 }
 0x526   : > { %6619 = vpush %v7916_v22 }
 0x527   : > { %6621 = vpush %v7919_v20 }
 0x528   : > { %6623 = vpush %v7923_v51 }
 0x529   : > { %6625 = vpush %v7927_v61 }
 0x54b   : > { %s6604_s29 = spop %6603 }
 0x54c   : > { %v1149_v39 = vstv %s6604_s29  ;;  %s6606_s18 = spop %6605  ;;  %s8818_s29 = smov 126  }
 0x54d   : > { %v1166_v24 = vmul.f32 %v1149_v39, %v7802_v13  ;;  %v1167_v52 = vmul.f32 %v1149_v39, %v7805_v37  ;;  %v6536_v39 = vpop.f32.mrf.mxu1 }
 0x54f   : > { %1192 = vrot.lane.b32.xlu1 %v1167_v52, %s8774_s28  ;;  %1190 = vrot.lane.b32.xlu0 %v1166_v24, %s8774_s28  ;;  %v4892_v24 = vpop.f32.mrf.mxu1  ;;  %v1152_v52 = vstv %s6606_s18  ;;  %s6608_s30 = spop %6607 }
 0x550   : > { %v1169_v63 = vmul.f32 %v1152_v52, %v7817_v49  ;;  %v1155_v27 = vstv %s6608_s30  ;;  %s6610_s19 = spop %6609 }
 0x553   : > { %4963 = vrot.lane.b32.xlu1 %v6501_v45, %s6731_s0  ;;  %4915 = vrot.lane.b32.xlu0 %v6501_v45, %s6732_s20  ;;  %v1168_v45 = vmul.f32 %v1152_v52, %v7814_v36  ;;  %s6612_s1 = spop %6611 }
 0x557   : > { %4961 = vrot.lane.b32.xlu1 %v4487_v56, %s6731_s0  ;;  %4919 = vrot.lane.b32.xlu0 %v6508_v1, %s6732_s20 }
 0x55b   : > { %4923 = vrot.lane.b32.xlu1 %v6515_v10, %s6732_s20  ;;  %4967 = vrot.lane.b32.xlu0 %v6508_v1, %s6731_s0  ;;  %v1171_v1 = vmul.f32 %v1155_v27, %v7829_v35 }
 0x55f   : > { %4971 = vrot.lane.b32.xlu1 %v6515_v10, %s6731_s0  ;;  %4913 = vrot.lane.b32.xlu0 %v4487_v56, %s6732_s20  ;;  %v1170_v56 = vmul.f32 %v1155_v27, %v7826_v55  ;;  %v1158_v10 = vstv %s6610_s19 }
 0x560   : > { %v1172_v33 = vmul.f32 %v1158_v10, %v7838_v23  ;;  %v1173_v29 = vmul.f32 %v1158_v10, %v7841_v26 }
 0x563   : > { %4921 = vrot.lane.b32.xlu1 %v4649_v40, %s6732_s20  ;;  %4917 = vrot.lane.b32.xlu0 %v4568_v14, %s6732_s20 }
 0x567   : > { %4969 = vrot.lane.b32.xlu1 %v4649_v40, %s6731_s0  ;;  %4965 = vrot.lane.b32.xlu0 %v4568_v14, %s6731_s0  ;;  %v1161_v40 = vstv %s6612_s1 }
 0x568   : > { %v1174_v14 = vmul.f32 %v1161_v40, %v7850_v58 }
 0x56b   : > { %4931 = vrot.lane.b32.xlu1 %v6529_v16, %s6732_s20  ;;  %4927 = vrot.lane.b32.xlu0 %v6522_v62, %s6732_s20 }
 0x56f   : > { %4979 = vrot.lane.b32.xlu1 %v6529_v16, %s6731_s0  ;;  %4975 = vrot.lane.b32.xlu0 %v6522_v62, %s6731_s0  ;;  %v1175_v16 = vmul.f32 %v1161_v40, %v7853_v5 }
 0x573   : > { %4929 = vrot.lane.b32.xlu1 %v4811_v8, %s6732_s20  ;;  %4925 = vrot.lane.b32.xlu0 %v4730_v48, %s6732_s20 }
 0x577   : > { %4977 = vrot.lane.b32.xlu1 %v4811_v8, %s6731_s0  ;;  %4973 = vrot.lane.b32.xlu0 %v4730_v48, %s6731_s0 }
 0x57b   : > { %4981 = vrot.lane.b32.xlu1 %v4892_v24, %s6731_s0  ;;  %4933 = vrot.lane.b32.xlu0 %v4892_v24, %s6732_s20  ;;  %v8053_v24 = vrot.slane %v7528_v7, 2 }
 0x57f   : > { %4983 = vrot.lane.b32.xlu1 %v6536_v39, %s6731_s0  ;;  %4935 = vrot.lane.b32.xlu0 %v6536_v39, %s6732_s20  ;;  %s6614_s0 = spop %6613  ;;  %s8819_s20 = smov 127   ;;  %v8048_v39 = vrot.slane %v7517_v21, 2 }
 0x580   : > { %v1164_v62 = vstv %s6614_s0  ;;  %s6616_s28 = spop %6615 }
 0x581   : > { %v1176_v8 = vmul.f32 %v1164_v62, %v7864_v12  ;;  %v1177_v48 = vmul.f32 %v1164_v62, %v7867_v11  ;;  %s6618_s19 = spop %6617 }
 0x582   : > { %s8129_s1 = spop %6619 }
 0x583   : > { %1196 = vrot.lane.b32.xlu1 %v1169_v63, %s8818_s29  ;;  %1194 = vrot.lane.b32.xlu0 %v1168_v45, %s8818_s29 }
 0x587   : > { %1200 = vrot.lane.b32.xlu1 %v1171_v1, %s8818_s29  ;;  %1198 = vrot.lane.b32.xlu0 %v1170_v56, %s8818_s29 }
 0x58b   : > { %1204 = vrot.lane.b32.xlu1 %v1173_v29, %s8818_s29  ;;  %1202 = vrot.lane.b32.xlu0 %v1172_v33, %s8818_s29 }
 0x58f   : > { %1208 = vrot.lane.b32.xlu1 %v1175_v16, %s8818_s29  ;;  %1206 = vrot.lane.b32.xlu0 %v1174_v14, %s8818_s29 }
 0x593   : > { %1212 = vrot.lane.b32.xlu1 %v1177_v48, %s8818_s29  ;;  %1210 = vrot.lane.b32.xlu0 %v1176_v8, %s8818_s29 }
 0x597   : > { %1330 = vrot.lane.b32.xlu1 %v7913_v25, %s8819_s20  ;;  %1328 = vrot.lane.b32.xlu0 %v7910_v60, %s8819_s20 }
 0x59b   : > { %1334 = vrot.lane.b32.xlu1 %v7919_v20, %s8819_s20  ;;  %1332 = vrot.lane.b32.xlu0 %v7916_v22, %s8819_s20 }
 0x59f   : > { %1338 = vrot.lane.b32.xlu1 %v7927_v61, %s8819_s20  ;;  %1336 = vrot.lane.b32.xlu0 %v7923_v51, %s8819_s20 }
 0x5a3   : > { %1448 = vrot.lane.b32.xlu1 %v7910_v60, %s8818_s29  ;;  %v8058_v60 = vrot.slane %v7540_v59, 2 }
 0x5a7   : > { %1452 = vrot.lane.b32.xlu1 %v7916_v22, %s8818_s29  ;;  %v1245_v22 = vstv %s6616_s28 }
 0x5a8   : > { %v1262_v21 = vmul.f32 %v1245_v22, %v7802_v13  ;;  %v1263_v52 = vmul.f32 %v1245_v22, %v7805_v37 }
 0x5aa   : > { %v1286_v63 = vrot.slane %v1262_v21, 1  ;;  %v1287_v59 = vrot.slane %v1263_v52, 1 }
 0x5ab   : > { %1456 = vrot.lane.b32.xlu1 %v7923_v51, %s8818_s29  ;;  %v1000_v51 = vstv %s7787_s17 }
 0x5ac   : > { %v1022_v7 = vmul.f32 %v1000_v51, %v7802_v13  ;;  %v1023_v45 = vmul.f32 %v1000_v51, %v7805_v37  ;;  %v1288_v40 = vsel %vm911_vm4, %v1286_v63, %v1287_v59 }
 0x5ae   : > { %v1124_v27 = vadd.f32 %v7885_v32, %v1022_v7  ;;  %v1125_v56 = vadd.f32 %v7887_v19, %v1023_v45 }
 0x5af   : > { %1659 = vrot.lane.b32.xlu1 %v8048_v39, %s8819_s20 }
 0x5b3   : > { %1663 = vrot.lane.b32.xlu1 %v8053_v24, %s8819_s20 }
 0x5b7   : > { %1667 = vrot.lane.b32.xlu1 %v8058_v60, %s8819_s20 }
 0x5bb   : > { %1779 = vrot.lane.b32.xlu1 %v8048_v39, %s8818_s29 }
 0x5bf   : > { %1783 = vrot.lane.b32.xlu1 %v8053_v24, %s8818_s29 }
 0x5c1   : > { %v1191_v1 = vpop.permute.xlu0 %1190  ;;  %v1193_v10 = vpop.permute.xlu1 %1192 }
 0x5c2   : > { %v1226_v33 = vadd.f32 %v1191_v1, %v1124_v27  ;;  %v1227_v29 = vadd.f32 %v1193_v10, %v1125_v56  ;;  %v5025_v10 = vld [vmem:[%s8749_s15 + $0x20] sm:$0xff] }
 0x5c3   : > { %1787 = vrot.lane.b32.xlu1 %v8058_v60, %s8818_s29 }
 0x5c4   : > { %v8076_v14 = vadd.f32 %v1287_v59, %v1227_v29  ;;  %v8078_v16 = vadd.f32 %v1288_v40, %v1226_v33 }
 0x5c5   : > { %v4916_v62 = vpop.permute.xlu0 %4915  ;;  %v4964_v8 = vpop.permute.xlu1 %4963 }
 0x5c6   : > { %v4950_v19 = vadd.f32 %v7933_v43, %v4916_v62  ;;  %v4998_v21 = vsub.f32 %v7933_v43, %v4964_v8  ;;  %v5030_v43 = vld [vmem:[%s8749_s15 + $0x48] sm:$0xff] }
 0x5c8   : > { %v5010_v1 = vsel %vm3874_vm2, %v4950_v19, %v4998_v21 }
 0x5c9   : > { %v4920_v48 = vpop.permute.xlu0 %4919  ;;  %v4962_v22 = vpop.permute.xlu1 %4961 }
 0x5ca   : > { %v4997_v45 = vsub.f32 %v7935_v17, %v4962_v22  ;;  %v4952_v19 = vadd.f32 %v7937_v0, %v4920_v48 }
 0x5cd   : > { %v4968_v32 = vpop.permute.xlu0 %4967  ;;  %v4924_v51 = vpop.permute.xlu1 %4923 }
 0x5ce   : > { %v4954_v21 = vadd.f32 %v7939_v46, %v4924_v51 }
 0x5d1   : > { %v4914_v52 = vpop.permute.xlu0 %4913  ;;  %v4972_v7 = vpop.permute.xlu1 %4971 }
 0x5d2   : > { %v4949_v63 = vadd.f32 %v4914_v52, %v7935_v17  ;;  %v5000_v17 = vsub.f32 %v7937_v0, %v4968_v32  ;;  %v5002_v33 = vsub.f32 %v7939_v46, %v4972_v7  ;;  %v5027_v0 = vld [vmem:[%s8749_s15 + $0x30] sm:$0xff]  ;;  %v5029_v46 = vld [vmem:[%s8749_s15 + $0x40] sm:$0xff] }
 0x5d4   : > { %v5009_v59 = vsel %vm3874_vm2, %v4949_v63, %v4997_v45  ;;  %v5012_v63 = vsel %vm3874_vm2, %v4952_v19, %v5000_v17 }
 0x5d5   : > { %v4918_v27 = vpop.permute.xlu0 %4917  ;;  %6541 = vmatprep.mubr.msk.f32.mxu0 %vm5033_vm7, %v5009_v59  ;;  %v4922_v56 = vpop.permute.xlu1 %4921 }
 0x5d6   : > { %6542 = vmatmul.mubr.msk.f32.vlgmr.msra.gmra.mxu0 %vm5033_vm7, %v5010_v1  ;;  %v4951_v62 = vadd.f32 %v4918_v27, %v7941_v57  ;;  %v4953_v8 = vadd.f32 %v4922_v56, %v7943_v15 }
 0x5d7   : > { %6552 = vmatpush3.msra.mxu0 %v7977_v31 }
 0x5d8   : > { %6553 = vmatprep.subr.mxu0 %v5025_v10 }
 0x5d9   : > { %v4966_v29 = vpop.permute.xlu0 %4965  ;;  %v4970_v40 = vpop.permute.xlu1 %4969  ;;  %6554 = vmatpush3.msra.mxu0 %v5025_v10 }
 0x5da   : > { %v4999_v22 = vsub.f32 %v7941_v57, %v4966_v29  ;;  %v5001_v31 = vsub.f32 %v7943_v15, %v4970_v40  ;;  %6565 = vmatprep.subr.mxu0 %v5030_v43  ;;  %v5014_v57 = vsel %vm3874_vm2, %v4954_v21, %v5002_v33  ;;  %v5032_v15 = vld [vmem:[%s8749_s15 + $0x58] sm:$0xff]  ;;  %v1004_v21 = vstv %s7789_s23  ;;  %s6622_s23 = spop %6621 }
 0x5dc   : > { %v5011_v32 = vsel %vm3874_vm2, %v4951_v62, %v4999_v22  ;;  %v5013_v52 = vsel %vm3874_vm2, %v4953_v8, %v5001_v31  ;;  %v1248_v8 = vstv %s6618_s19 }
 0x5dd   : > { %6548 = vmatprep.mubr.msk.f32.mxu1 %vm5033_vm7, %v5011_v32  ;;  %v4928_v7 = vpop.permute.xlu0 %4927  ;;  %6555 = vmatprep.mubr.msk.f32.mxu0 %vm5033_vm7, %v5013_v52  ;;  %v4932_v45 = vpop.permute.xlu1 %4931 }
 0x5de   : > { %6549 = vmatmul.mubr.msk.f32.vlgmr.msra.gmra.mxu1 %vm5033_vm7, %v5012_v63  ;;  %6556 = vmatmul.mubr.msk.f32.vlgmr.msra.gmra.mxu0 %vm5033_vm7, %v5014_v57  ;;  %v4956_v40 = vadd.f32 %v7945_v53, %v4928_v7  ;;  %v4958_v62 = vadd.f32 %v7947_v50, %v4932_v45  ;;  %v1264_v7 = vmul.f32 %v1248_v8, %v7814_v36  ;;  %v1251_v63 = vstv %s8129_s1 }
 0x5df   : > { %6559 = vmatpush3.msra.mxu1 %v7994_v44  ;;  %6566 = vmatpush3.msra.mxu0 %v5030_v43  ;;  %v1265_v45 = vmul.f32 %v1248_v8, %v7817_v49 }
 0x5e0   : > { %6560 = vmatprep.subr.mxu1 %v5027_v0  ;;  %6567 = vmatprep.subr.mxu0 %v5029_v46 }
 0x5e1   : > { %v4976_v48 = vpop.permute.xlu0 %4975  ;;  %v4980_v51 = vpop.permute.xlu1 %4979  ;;  %6561 = vmatpush3.msra.mxu1 %v5027_v0  ;;  %6568 = vmatpush3.msra.mxu0 %v5029_v46  ;;  %v1024_v0 = vmul.f32 %v1004_v21, %v7814_v36  ;;  %v1008_v46 = vstv %s7791_s24  ;;  %s8157_s24 = spop %6623 }
 0x5e2   : > { %6572 = vmatprep.subr.mxu1 %v5032_v15  ;;  %v5004_v56 = vsub.f32 %v7945_v53, %v4976_v48  ;;  %v5006_v1 = vsub.f32 %v7947_v50, %v4980_v51  ;;  %v5031_v50 = vld [vmem:[%s8749_s15 + $0x50] sm:$0xff]  ;;  %v1025_v51 = vmul.f32 %v1004_v21, %v7817_v49 }
 0x5e4   : > { %v5018_v53 = vsel %vm3874_vm2, %v4958_v62, %v5006_v1  ;;  %v1290_v1 = vrot.slane %v1265_v45, 1  ;;  %v1027_v62 = vmul.f32 %v1008_v46, %v7829_v35  ;;  %v1016_v45 = vstv %s7797_s26 }
 0x5e5   : > { %v4926_v59 = vpop.permute.xlu0 %4925  ;;  %v4930_v27 = vpop.permute.xlu1 %4929 }
 0x5e6   : > { %v4955_v43 = vadd.f32 %v4926_v59, %v7949_v30  ;;  %v4957_v17 = vadd.f32 %v4930_v27, %v7953_v34  ;;  %v1266_v59 = vmul.f32 %v1251_v63, %v7826_v55  ;;  %v1129_v21 = vadd.f32 %v7895_v3, %v1027_v62 }
 0x5e9   : > { %v4974_v44 = vpop.permute.xlu0 %4973  ;;  %v4978_v10 = vpop.permute.xlu1 %4977 }
 0x5ea   : > { %v5003_v33 = vsub.f32 %v7949_v30, %v4974_v44  ;;  %v5005_v29 = vsub.f32 %v7953_v34, %v4978_v10  ;;  %v5016_v34 = vsel %vm3874_vm2, %v4956_v40, %v5004_v56  ;;  %v1289_v56 = vrot.slane %v1264_v7, 1 }
 0x5eb   : > { %v1267_v44 = vmul.f32 %v1251_v63, %v7829_v35  ;;  %v1126_v10 = vadd.f32 %v7889_v41, %v1024_v0  ;;  %v1012_v40 = vstv %s7793_s25  ;;  %s8206_s25 = spop %6625 }
 0x5ec   : > { %v5015_v22 = vsel %vm3874_vm2, %v4955_v43, %v5003_v33  ;;  %v5017_v31 = vsel %vm3874_vm2, %v4957_v17, %v5005_v29  ;;  %v1127_v43 = vadd.f32 %v7891_v47, %v1025_v51  ;;  %v1254_v17 = vstv %s6622_s23 }
 0x5ed   : > { %6562 = vmatprep.mubr.msk.f32.mxu1 %vm5033_vm7, %v5015_v22  ;;  %v4934_v19 = vpop.permute.xlu0 %4933  ;;  %6569 = vmatprep.mubr.msk.f32.mxu0 %vm5033_vm7, %v5017_v31  ;;  %v4982_v30 = vpop.permute.xlu1 %4981  ;;  %v1026_v29 = vmul.f32 %v1008_v46, %v7826_v55  ;;  %v1292_v22 = vrot.slane %v1266_v59, 1  ;;  %v1257_v31 = vstv %s8157_s24  ;;  %v1293_v41 = vrot.slane %v1267_v44, 1 }
 0x5ee   : > { %v4959_v32 = vadd.f32 %v4934_v19, %v7959_v6  ;;  %v5007_v52 = vsub.f32 %v7959_v6, %v4982_v30  ;;  %6563 = vmatmul.mubr.msk.f32.vlgmr.msra.gmra.mxu1 %vm5033_vm7, %v5016_v34  ;;  %6570 = vmatmul.mubr.msk.f32.vlgmr.msra.gmra.mxu0 %vm5033_vm7, %v5018_v53  ;;  %v1268_v47 = vmul.f32 %v1254_v17, %v7838_v23 }
 0x5ef   : > { %6573 = vmatpush3.msra.mxu1 %v5032_v15  ;;  %v1269_v34 = vmul.f32 %v1254_v17, %v7841_v26  ;;  %v1291_v53 = vsel %vm911_vm4, %v1289_v56, %v1290_v1  ;;  %v1028_v7 = vmul.f32 %v1012_v40, %v7838_v23  ;;  %v1029_v0 = vmul.f32 %v1012_v40, %v7841_v26 }
 0x5f0   : > { %v5019_v57 = vsel %vm3874_vm2, %v4959_v32, %v5007_v52  ;;  %6574 = vmatprep.subr.mxu1 %v5031_v50  ;;  %v1270_v46 = vmul.f32 %v1257_v31, %v7850_v58  ;;  %v1295_v51 = vrot.slane %v1268_v47, 1  ;;  %v1294_v3 = vsel %vm911_vm4, %v1292_v22, %v1293_v41 }
 0x5f1   : > { %v4936_v48 = vpop.permute.xlu0 %4935  ;;  %6576 = vmatprep.mubr.msk.f32.mxu1 %vm5033_vm7, %v5019_v57  ;;  %v4984_v6 = vpop.permute.xlu1 %4983  ;;  %6575 = vmatpush3.msra.mxu1 %v5031_v50  ;;  %v1128_v50 = vadd.f32 %v7893_v9, %v1026_v29  ;;  %v1296_v59 = vrot.slane %v1269_v34, 1  ;;  %v1271_v9 = vmul.f32 %v1257_v31, %v7853_v5  ;;  %v1031_v17 = vmul.f32 %v1016_v45, %v7853_v5 }
 0x5f2   : > { %v4960_v27 = vadd.f32 %v7955_v54, %v4936_v48  ;;  %v5008_v15 = vsub.f32 %v7955_v54, %v4984_v6  ;;  %v1298_v40 = vrot.slane %v1270_v46, 1 }
 0x5f3   : > { %v1299_v62 = vrot.slane %v1271_v9, 1 }
 0x5f4   : > { %v5020_v33 = vsel %vm3874_vm2, %v4960_v27, %v5008_v15  ;;  %v1130_v27 = vadd.f32 %v7897_v38, %v1028_v7  ;;  %v1131_v15 = vadd.f32 %v7899_v42, %v1029_v0  ;;  %v1133_v42 = vadd.f32 %v7903_v2, %v1031_v17 }
 0x5f5   : > { %v1195_v54 = vpop.permute.xlu0 %1194  ;;  %6577 = vmatmul.mubr.msk.f32.vlgmr.msra.gmra.mxu1 %vm5033_vm7, %v5020_v33  ;;  %v1197_v8 = vpop.permute.xlu1 %1196  ;;  %v1300_v47 = vsel %vm911_vm4, %v1298_v40, %v1299_v62 }
 0x5f6   : > { %v1228_v19 = vadd.f32 %v1195_v54, %v1126_v10  ;;  %v1229_v30 = vadd.f32 %v1197_v8, %v1127_v43  ;;  %v1030_v43 = vmul.f32 %v1016_v45, %v7850_v58  ;;  %v1297_v54 = vsel %vm911_vm4, %v1295_v51, %v1296_v59 }
 0x5f8   : > { %v8172_v32 = vadd.f32 %v1290_v1, %v1229_v30  ;;  %v8174_v52 = vadd.f32 %v1291_v53, %v1228_v19  ;;  %v1132_v38 = vadd.f32 %v7901_v28, %v1030_v43 }
 0x5f9   : > { %v1199_v63 = vpop.permute.xlu0 %1198  ;;  %v1201_v57 = vpop.permute.xlu1 %1200 }
 0x5fa   : > { %v1230_v48 = vadd.f32 %v1199_v63, %v1128_v50  ;;  %v1231_v6 = vadd.f32 %v1201_v57, %v1129_v21 }
 0x5fc   : > { %v8184_v56 = vadd.f32 %v1293_v41, %v1231_v6  ;;  %v8186_v1 = vadd.f32 %v1294_v3, %v1230_v48 }
 0x5fd   : > { %v1203_v44 = vpop.permute.xlu0 %1202  ;;  %v1205_v10 = vpop.permute.xlu1 %1204 }
 0x5fe   : > { %v1232_v33 = vadd.f32 %v1203_v44, %v1130_v27  ;;  %v1233_v29 = vadd.f32 %v1205_v10, %v1131_v15 }
 0x600   : > { %v8193_v8 = vadd.f32 %v1296_v59, %v1233_v29  ;;  %v8195_v22 = vadd.f32 %v1297_v54, %v1232_v33 }
 0x601   : > { %v1207_v31 = vpop.permute.xlu0 %1206  ;;  %v1209_v19 = vpop.permute.xlu1 %1208 }
 0x602   : > { %v1234_v30 = vadd.f32 %v1207_v31, %v1132_v38  ;;  %v1235_v41 = vadd.f32 %v1209_v19, %v1133_v42  ;;  %v6720_v19 = vld [vmem:[%s8739_s5 + $0xc] sm:$0x7] }
 0x604   : > { %v8198_v34 = vadd.f32 %v1299_v62, %v1235_v41  ;;  %v8200_v53 = vadd.f32 %v1300_v47, %v1234_v30  ;;  %v6721_v47 = vld [vmem:[%s8739_s5 + $0x14] sm:$0x7] }
 0x605   : > { %v8202_v50 = vpop.permute.xlu0 %1210  ;;  %v8204_v21 = vpop.permute.xlu1 %1212 }
 0x609   : > { %v1329_v28 = vpop.permute.xlu0 %1328  ;;  %v1331_v2 = vpop.permute.xlu1 %1330 }
 0x60a   : > { %6627 = vpush %v1329_v28  ;;  %v8265_v28 = vrot.slane %v6721_v47, 2 }
 0x60b   : > { %6629 = vpush %v1331_v2 }
 0x60d   : > { %v1333_v7 = vpop.permute.xlu0 %1332  ;;  %v1335_v45 = vpop.permute.xlu1 %1334 }
 0x60e   : > { %6631 = vpush %v1333_v7 }
 0x60f   : > { %6633 = vpush %v1335_v45 }
 0x611   : > { %v1337_v63 = vpop.permute.xlu0 %1336  ;;  %v1339_v57 = vpop.permute.xlu1 %1338 }
 0x612   : > { %6635 = vpush %v1337_v63 }
 0x613   : > { %6637 = vpush %v1339_v57 }
 0x615   : > { %v1449_v0 = vpop.permute.xlu1 %1448 }
 0x616   : > { %6639 = vpush %v1449_v0 }
 0x63b   : > { %s6628_s26 = spop %6627 }
 0x63c   : > { %v1341_v46 = vstv %s6628_s26  ;;  %s8208_s17 = spop %6629 }
 0x63d   : > { %v1358_v48 = vmul.f32 %v1341_v46, %v7802_v13  ;;  %v1359_v6 = vmul.f32 %v1341_v46, %v7805_v37  ;;  %v1344_v51 = vstv %s8208_s17 }
 0x63e   : > { %v1361_v3 = vmul.f32 %v1344_v51, %v7817_v49  ;;  %v1360_v7 = vmul.f32 %v1344_v51, %v7814_v36 }
 0x63f   : > { %v1382_v59 = vrot.slane %v1358_v48, 1  ;;  %v1383_v9 = vrot.slane %v1359_v6, 1  ;;  %s8214_s18 = spop %6631 }
 0x640   : > { %v1347_v27 = vstv %s8214_s18  ;;  %s8217_s30 = spop %6633  ;;  %v1386_v44 = vrot.slane %v1361_v3, 1  ;;  %v1385_v45 = vrot.slane %v1360_v7, 1 }
 0x641   : > { %1402 = vrot.lane.b32.xlu1 %v1383_v9, %s8819_s20  ;;  %v1384_v15 = vsel %vm911_vm4, %v1382_v59, %v1383_v9  ;;  %v1363_v10 = vmul.f32 %v1347_v27, %v7829_v35  ;;  %v1350_v43 = vstv %s8217_s30  ;;  %v1362_v63 = vmul.f32 %v1347_v27, %v7826_v55 }
 0x642   : > { %1400 = vrot.lane.b32.xlu0 %v1384_v15, %s8819_s20  ;;  %v1365_v33 = vmul.f32 %v1350_v43, %v7841_v26  ;;  %v1364_v0 = vmul.f32 %v1350_v43, %v7838_v23  ;;  %v1387_v46 = vsel %vm911_vm4, %v1385_v45, %v1386_v44  ;;  %v1020_v45 = vstv %s7799_s27 }
 0x643   : > { %s8224_s19 = spop %6635  ;;  %v1389_v17 = vrot.slane %v1363_v10, 1  ;;  %v1388_v57 = vrot.slane %v1362_v63, 1 }
 0x644   : > { %v1353_v29 = vstv %s8224_s19  ;;  %s8231_s1 = spop %6637  ;;  %v1392_v40 = vrot.slane %v1365_v33, 1  ;;  %v1391_v48 = vrot.slane %v1364_v0, 1  ;;  %v1453_v33 = vpop.permute.xlu1 %1452 }
 0x645   : > { %1406 = vrot.lane.b32.xlu1 %v1386_v44, %s8819_s20  ;;  %v1367_v62 = vmul.f32 %v1353_v29, %v7853_v5  ;;  %v1356_v54 = vstv %s8231_s1  ;;  %v1366_v6 = vmul.f32 %v1353_v29, %v7850_v58  ;;  %v1390_v51 = vsel %vm911_vm4, %v1388_v57, %v1389_v17 }
 0x646   : > { %1450 = vrot.lane.b32.xlu0 %v7913_v25, %s8818_s29  ;;  %v6719_v25 = vld [vmem:[%s8739_s5 + $0x4] sm:$0x7]  ;;  %v1368_v9 = vmul.f32 %v1356_v54, %v7864_v12  ;;  %v1393_v3 = vsel %vm911_vm4, %v1391_v48, %v1392_v40 }
 0x647   : > { %s8238_s0 = spop %6639  ;;  %v8246_v38 = vrot.slane %v6719_v25, 2  ;;  %v1395_v42 = vrot.slane %v1367_v62, 1  ;;  %v1394_v59 = vrot.slane %v1366_v6, 1 }
 0x648   : > { %v1461_v31 = vstv %s8238_s0  ;;  %v1397_v27 = vrot.slane %v1368_v9, 1  ;;  %v1457_v29 = vpop.permute.xlu1 %1456 }
 0x649   : > { %1410 = vrot.lane.b32.xlu1 %v1389_v17, %s8819_s20  ;;  %v1479_v41 = vmul.f32 %v1461_v31, %v7805_v37  ;;  %v1478_v15 = vmul.f32 %v1461_v31, %v7802_v13  ;;  %v1396_v44 = vsel %vm911_vm4, %v1394_v59, %v1395_v42 }
 0x64a   : > { %1454 = vrot.lane.b32.xlu0 %v7919_v20, %s8818_s29  ;;  %v1369_v20 = vmul.f32 %v1356_v54, %v7867_v11 }
 0x64b   : > { %v1503_v2 = vrot.slane %v1479_v41, 1  ;;  %v1502_v10 = vrot.slane %v1478_v15, 1 }
 0x64c   : > { %v1398_v30 = vrot.slane %v1369_v20, 1 }
 0x64d   : > { %1414 = vrot.lane.b32.xlu1 %v1392_v40, %s8819_s20  ;;  %v1504_v17 = vsel %vm911_vm4, %v1502_v10, %v1503_v2  ;;  %v1660_v40 = vpop.permute.xlu1 %1659 }
 0x64e   : > { %1458 = vrot.lane.b32.xlu0 %v7927_v61, %s8818_s29  ;;  %v8256_v61 = vrot.slane %v6720_v19, 2  ;;  %v1399_v43 = vsel %vm911_vm4, %v1397_v27, %v1398_v30 }
 0x651   : > { %1418 = vrot.lane.b32.xlu1 %v1395_v42, %s8819_s20  ;;  %v1664_v62 = vpop.permute.xlu1 %1663 }
 0x652   : > { %1661 = vrot.lane.b32.xlu0 %v8246_v38, %s8819_s20 }
 0x655   : > { %1422 = vrot.lane.b32.xlu1 %v1398_v30, %s8819_s20  ;;  %v1668_v54 = vpop.permute.xlu1 %1667 }
 0x656   : > { %1665 = vrot.lane.b32.xlu0 %v8256_v61, %s8819_s20 }
 0x659   : > { %1522 = vrot.lane.b32.xlu1 %v1503_v2, %s8818_s29  ;;  %v1780_v25 = vpop.permute.xlu1 %1779 }
 0x65a   : > { %1669 = vrot.lane.b32.xlu0 %v8265_v28, %s8819_s20 }
 0x65d   : > { %v1784_v42 = vpop.permute.xlu1 %1783 }
 0x65e   : > { %1781 = vrot.lane.b32.xlu0 %v8246_v38, %s8818_s29 }
 0x661   : > { %v1788_v20 = vpop.permute.xlu1 %1787 }
 0x662   : > { %1785 = vrot.lane.b32.xlu0 %v8256_v61, %s8818_s29 }
 0x666   : > { %1789 = vrot.lane.b32.xlu0 %v8265_v28, %s8818_s29 }
 0x66a   : > { %1404 = vrot.lane.b32.xlu0 %v1387_v46, %s8819_s20  ;;  %v1260_v46 = vstv %s8206_s25 }
 0x66b   : > { %v1272_v10 = vmul.f32 %v1260_v46, %v7864_v12 }
 0x66e   : > { %1408 = vrot.lane.b32.xlu0 %v1390_v51, %s8819_s20 }
 0x672   : > { %1412 = vrot.lane.b32.xlu0 %v1393_v3, %s8819_s20 }
 0x676   : > { %1416 = vrot.lane.b32.xlu0 %v1396_v44, %s8819_s20 }
 0x67a   : > { %1420 = vrot.lane.b32.xlu0 %v1399_v43, %s8819_s20  ;;  %v1032_v43 = vmul.f32 %v1020_v45, %v7864_v12 }
 0x67e   : > { %1520 = vrot.lane.b32.xlu0 %v1504_v17, %s8818_s29 }
 0x6b3   : > { %v1403_v31 = vpop.permute.xlu1 %1402 }
 0x6b4   : > { %v8295_v19 = vadd.f32 %v1403_v31, %v8076_v14  ;;  %v1401_v30 = vpop.permute.xlu0 %1400  ;;  %v1033_v14 = vmul.f32 %v1020_v45, %v7867_v11 }
 0x6b5   : > { %v8298_v41 = vadd.f32 %v1401_v30, %v8078_v16 }
 0x6b6   : > { %v1135_v48 = vadd.f32 %v7907_v18, %v1033_v14 }
 0x6b7   : > { %v1407_v47 = vpop.permute.xlu1 %1406 }
 0x6b8   : > { %v8301_v2 = vadd.f32 %v1407_v47, %v8172_v32  ;;  %v1451_v7 = vpop.permute.xlu0 %1450  ;;  %v1273_v32 = vmul.f32 %v1260_v46, %v7867_v11  ;;  %v1237_v59 = vadd.f32 %v8204_v21, %v1135_v48 }
 0x6b9   : > { %6641 = vpush %v1451_v7 }
 0x6ba   : > { %6643 = vpush %v1453_v33  ;;  %v1302_v9 = vrot.slane %v1273_v32, 1  ;;  %v1134_v33 = vadd.f32 %v7905_v4, %v1032_v43 }
 0x6bb   : > { %v1411_v63 = vpop.permute.xlu1 %1410 }
 0x6bc   : > { %v8305_v57 = vadd.f32 %v1411_v63, %v8184_v56  ;;  %v1455_v0 = vpop.permute.xlu0 %1454 }
 0x6bd   : > { %6645 = vpush %v1455_v0 }
 0x6be   : > { %6647 = vpush %v1457_v29 }
 0x6bf   : > { %v1415_v16 = vpop.permute.xlu1 %1414 }
 0x6c0   : > { %v8312_v6 = vadd.f32 %v1415_v16, %v8193_v8  ;;  %v1459_v51 = vpop.permute.xlu0 %1458  ;;  %v1327_v8 = vadd.f32 %v1302_v9, %v1237_v59 }
 0x6c1   : > { %6649 = vpush %v1459_v51 }
 0x6c2   : > { %6651 = vpush %v8048_v39 }
 0x6c3   : > { %6653 = vpush %v8246_v38  ;;  %v1419_v56 = vpop.permute.xlu1 %1418 }
 0x6c4   : > { %6655 = vpush %v8053_v24  ;;  %v8319_v3 = vadd.f32 %v1419_v56, %v8198_v34  ;;  %v1662_v18 = vpop.permute.xlu0 %1661 }
 0x6c5   : > { %6657 = vpush %v8256_v61 }
 0x6c6   : > { %6659 = vpush %v8058_v60 }
 0x6c7   : > { %6661 = vpush %v8265_v28  ;;  %v1423_v21 = vpop.permute.xlu1 %1422 }
 0x6c8   : > { %6663 = vpush %v1660_v40  ;;  %v8324_v39 = vadd.f32 %v1423_v21, %v1327_v8  ;;  %v1666_v38 = vpop.permute.xlu0 %1665  ;;  %v1301_v40 = vrot.slane %v1272_v10, 1 }
 0x6c9   : > { %6665 = vpush %v1662_v18 }
 0x6ca   : > { %6667 = vpush %v1664_v62  ;;  %v1236_v62 = vadd.f32 %v8202_v50, %v1134_v33 }
 0x6cb   : > { %6669 = vpush %v1666_v38 }
 0x6cc   : > { %6671 = vpush %v1668_v54  ;;  %v1670_v24 = vpop.permute.xlu0 %1669 }
 0x6cd   : > { %6673 = vpush %v1670_v24 }
 0x6ce   : > { %6675 = vpush %v1780_v25 }
 0x6d0   : > { %v1782_v34 = vpop.permute.xlu0 %1781 }
 0x6d1   : > { %6677 = vpush %v1782_v34 }
 0x6d2   : > { %6679 = vpush %v1784_v42 }
 0x6d4   : > { %v1786_v61 = vpop.permute.xlu0 %1785 }
 0x6d5   : > { %6681 = vpush %v1786_v61 }
 0x6d6   : > { %6683 = vpush %v1788_v20 }
 0x6d8   : > { %v1790_v60 = vpop.permute.xlu0 %1789 }
 0x6d9   : > { %6685 = vpush %v1790_v60 }
 0x6dc   : > { %v1405_v28 = vpop.permute.xlu0 %1404 }
 0x6dd   : > { %v8327_v27 = vadd.f32 %v1405_v28, %v8174_v52 }
 0x6e0   : > { %v1409_v15 = vpop.permute.xlu0 %1408 }
 0x6e1   : > { %v8330_v44 = vadd.f32 %v1409_v15, %v8186_v1  ;;  %v1303_v1 = vsel %vm911_vm4, %v1301_v40, %v1302_v9 }
 0x6e2   : > { %v1326_v42 = vadd.f32 %v1303_v1, %v1236_v62 }
 0x6e4   : > { %v1413_v17 = vpop.permute.xlu0 %1412 }
 0x6e5   : > { %v8336_v29 = vadd.f32 %v1413_v17, %v8195_v22 }
 0x6e8   : > { %v1417_v54 = vpop.permute.xlu0 %1416 }
 0x6e9   : > { %v8340_v52 = vadd.f32 %v1417_v54, %v8200_v53 }
 0x6ea   : > { %s6642_s27 = spop %6641 }
 0x6eb   : > { %v1464_v25 = vstv %s6642_s27  ;;  %s6644_s25 = spop %6643 }
 0x6ec   : > { %v1480_v20 = vmul.f32 %v1464_v25, %v7814_v36  ;;  %v1481_v4 = vmul.f32 %v1464_v25, %v7817_v49  ;;  %v1467_v31 = vstv %s6644_s25  ;;  %v1421_v22 = vpop.permute.xlu0 %1420 }
 0x6ed   : > { %v1482_v30 = vmul.f32 %v1467_v31, %v7826_v55  ;;  %v1483_v50 = vmul.f32 %v1467_v31, %v7829_v35  ;;  %v8347_v47 = vadd.f32 %v1421_v22, %v1326_v42 }
 0x6ee   : > { %v1505_v53 = vrot.slane %v1480_v20, 1  ;;  %v1506_v7 = vrot.slane %v1481_v4, 1  ;;  %s6646_s30 = spop %6645 }
 0x6ef   : > { %v1508_v45 = vrot.slane %v1482_v30, 1  ;;  %v1509_v63 = vrot.slane %v1483_v50, 1  ;;  %v1470_v0 = vstv %s6646_s30  ;;  %s6648_s19 = spop %6647 }
 0x6f0   : > { %v1484_v46 = vmul.f32 %v1470_v0, %v7838_v23  ;;  %v1485_v14 = vmul.f32 %v1470_v0, %v7841_v26  ;;  %v1473_v16 = vstv %s6648_s19  ;;  %1526 = vrot.lane.b32.xlu1 %v1506_v7, %s8818_s29  ;;  %v1507_v48 = vsel %vm911_vm4, %v1505_v53, %v1506_v7 }
 0x6f1   : > { %1524 = vrot.lane.b32.xlu0 %v1507_v48, %s8818_s29  ;;  %v1486_v32 = vmul.f32 %v1473_v16, %v7850_v58  ;;  %v1487_v56 = vmul.f32 %v1473_v16, %v7853_v5  ;;  %v1510_v9 = vsel %vm911_vm4, %v1508_v45, %v1509_v63  ;;  %v1523_v45 = vpop.permute.xlu1 %1522 }
 0x6f2   : > { %s6650_s1 = spop %6649  ;;  %v1511_v51 = vrot.slane %v1484_v46, 1  ;;  %v1512_v59 = vrot.slane %v1485_v14, 1 }
 0x6f3   : > { %s8355_s0 = spop %6651  ;;  %v1476_v18 = vstv %s6650_s1  ;;  %v1514_v8 = vrot.slane %v1486_v32, 1  ;;  %v1515_v21 = vrot.slane %v1487_v56, 1  ;;  %v1557_v56 = vadd.f32 %v1523_v45, %v8295_v19 }
 0x6f4   : > { %s8358_s28 = spop %6653  ;;  %1530 = vrot.lane.b32.xlu1 %v1509_v63, %s8818_s29  ;;  %v1513_v38 = vsel %vm911_vm4, %v1511_v51, %v1512_v59  ;;  %v1489_v24 = vmul.f32 %v1476_v18, %v7867_v11  ;;  %v1488_v34 = vmul.f32 %v1476_v18, %v7864_v12  ;;  %v1575_v33 = vstv %s8355_s0  ;;  %v1521_v63 = vpop.permute.xlu0 %1520 }
 0x6f5   : > { %s8362_s23 = spop %6655  ;;  %1528 = vrot.lane.b32.xlu0 %v1510_v9, %s8818_s29  ;;  %v1516_v60 = vsel %vm911_vm4, %v1514_v8, %v1515_v21  ;;  %v1592_v20 = vmul.f32 %v1575_v33, %v7802_v13  ;;  %v1593_v4 = vmul.f32 %v1575_v33, %v7805_v37  ;;  %v1556_v9 = vadd.f32 %v1521_v63, %v8298_v41 }
 0x6f6   : > { %s8365_s24 = spop %6657  ;;  %v1518_v28 = vrot.slane %v1489_v24, 1  ;;  %v1517_v10 = vrot.slane %v1488_v34, 1 }
 0x6f7   : > { %s8367_s26 = spop %6659  ;;  %v1617_v0 = vrot.slane %v1592_v20, 2  ;;  %v1618_v48 = vrot.slane %v1593_v4, 2 }
 0x6f8   : > { %s8369_s17 = spop %6661  ;;  %1534 = vrot.lane.b32.xlu1 %v1512_v59, %s8818_s29  ;;  %v1519_v42 = vsel %vm911_vm4, %v1517_v10, %v1518_v28 }
 0x6f9   : > { %s6664_s18 = spop %6663  ;;  %1532 = vrot.lane.b32.xlu0 %v1513_v38, %s8818_s29 }
 0x6fa   : > { %v1672_v61 = vstv %s6664_s18  ;;  %s6666_s27 = spop %6665 }
 0x6fb   : > { %v1690_v15 = vmul.f32 %v1672_v61, %v7805_v37  ;;  %v1689_v43 = vmul.f32 %v1672_v61, %v7802_v13  ;;  %v1675_v17 = vstv %s6666_s27  ;;  %s6668_s25 = spop %6667  ;;  %v8405_v61 = vadd.f32 %v1618_v48, %v1557_v56 }
 0x6fc   : > { %1538 = vrot.lane.b32.xlu1 %v1515_v21, %s8818_s29  ;;  %v1692_v62 = vmul.f32 %v1675_v17, %v7817_v49  ;;  %v1691_v1 = vmul.f32 %v1675_v17, %v7814_v36  ;;  %v1678_v25 = vstv %s6668_s25  ;;  %s6670_s30 = spop %6669 }
 0x6fd   : > { %1536 = vrot.lane.b32.xlu0 %v1516_v60, %s8818_s29  ;;  %v1714_v40 = vrot.slane %v1690_v15, 2  ;;  %v1713_v54 = vrot.slane %v1689_v43, 2  ;;  %v1694_v22 = vmul.f32 %v1678_v25, %v7829_v35  ;;  %v1693_v50 = vmul.f32 %v1678_v25, %v7826_v55  ;;  %s6672_s19 = spop %6671 }
 0x6fe   : > { %v1717_v31 = vrot.slane %v1692_v62, 2  ;;  %v1716_v30 = vrot.slane %v1691_v1, 2  ;;  %v1681_v53 = vstv %s6670_s30  ;;  %v1684_v51 = vstv %s6672_s19  ;;  %s6674_s1 = spop %6673 }
 0x6ff   : > { %v1715_v7 = vsel %vm1616_vm0, %v1713_v54, %v1714_v40  ;;  %v1720_v46 = vrot.slane %v1694_v22, 2  ;;  %v1695_v14 = vmul.f32 %v1681_v53, %v7838_v23  ;;  %v1696_v16 = vmul.f32 %v1681_v53, %v7841_v26  ;;  %s6676_s0 = spop %6675 }
 0x700   : > { %1542 = vrot.lane.b32.xlu1 %v1518_v28, %s8818_s29  ;;  %v1719_v32 = vrot.slane %v1693_v50, 2  ;;  %v1718_v59 = vsel %vm1616_vm0, %v1716_v30, %v1717_v31  ;;  %v1698_v21 = vmul.f32 %v1684_v51, %v7853_v5  ;;  %v1687_v38 = vstv %s6674_s1 }
 0x701   : > { %1540 = vrot.lane.b32.xlu0 %v1519_v42, %s8818_s29  ;;  %v1722_v18 = vrot.slane %v1695_v14, 2  ;;  %v1723_v8 = vrot.slane %v1696_v16, 2  ;;  %v1697_v24 = vmul.f32 %v1684_v51, %v7850_v58  ;;  %v1619_v60 = vsel %vm1616_vm0, %v1617_v0, %v1618_v48 }
 0x702   : > { %v1721_v34 = vsel %vm1616_vm0, %v1719_v32, %v1720_v46  ;;  %v8410_v19 = vadd.f32 %v1619_v60, %v1556_v9  ;;  %v1726_v41 = vrot.slane %v1698_v21, 2  ;;  %v1700_v28 = vmul.f32 %v1687_v38, %v7867_v11  ;;  %s6678_s18 = spop %6677 }
 0x703   : > { %v1725_v15 = vrot.slane %v1697_v24, 2  ;;  %v1699_v10 = vmul.f32 %v1687_v38, %v7864_v12  ;;  %v1792_v43 = vstv %s6676_s0  ;;  %v1724_v17 = vsel %vm1616_vm0, %v1722_v18, %v1723_v8  ;;  %s6680_s27 = spop %6679 }
 0x704   : > { %1733 = vrot.lane.b32.xlu1 %v1714_v40, %s8819_s20  ;;  %v1729_v33 = vrot.slane %v1700_v28, 2  ;;  %v1810_v40 = vmul.f32 %v1792_v43, %v7805_v37  ;;  %v1809_v54 = vmul.f32 %v1792_v43, %v7802_v13  ;;  %v1795_v1 = vstv %s6678_s18  ;;  %v6155_v43 = vld [vmem:[%s8742_s8] ss:$0 sm:$0xff] }
 0x705   : > { %1731 = vrot.lane.b32.xlu0 %v1715_v7, %s8819_s20  ;;  %v1728_v62 = vrot.slane %v1699_v10, 2  ;;  %v1727_v25 = vsel %vm1616_vm0, %v1725_v15, %v1726_v41  ;;  %v1812_v20 = vmul.f32 %v1795_v1, %v7817_v49  ;;  %v1798_v22 = vstv %s6680_s27  ;;  %v6156_v15 = vld [vmem:[%s8742_s8 + $0x1] ss:$0 sm:$0xff] }
 0x706   : > { %v1834_v42 = vrot.slane %v1810_v40, 2  ;;  %v1833_v4 = vrot.slane %v1809_v54, 2  ;;  %s6682_s25 = spop %6681  ;;  %v1814_v30 = vmul.f32 %v1798_v22, %v7829_v35  ;;  %v1813_v53 = vmul.f32 %v1798_v22, %v7826_v55  ;;  %v6160_v40 = vld [vmem:[%s8744_s10 + $0x1] ss:$0 sm:$0xff]  ;;  %v6163_v54 = vld [vmem:[%s8742_s8 + $0x2] ss:$0 sm:$0xff] }
 0x707   : > { %v1730_v37 = vsel %vm1616_vm0, %v1728_v62, %v1729_v33  ;;  %v1837_v13 = vrot.slane %v1812_v20, 2  ;;  %v1801_v7 = vstv %s6682_s25  ;;  %s6684_s30 = spop %6683  ;;  %v6159_v62 = vld [vmem:[%s8744_s10] ss:$0 sm:$0xff]  ;;  %v6162_v20 = vld [vmem:[%s8745_s11 + $0x1] ss:$0 sm:$0xff] }
 0x708   : > { %1737 = vrot.lane.b32.xlu1 %v1717_v31, %s8819_s20  ;;  %v1811_v31 = vmul.f32 %v1795_v1, %v7814_v36  ;;  %v1835_v45 = vsel %vm1616_vm0, %v1833_v4, %v1834_v42  ;;  %v1840_v63 = vrot.slane %v1814_v30, 2  ;;  %v1816_v0 = vmul.f32 %v1801_v7, %v7841_v26  ;;  %v6161_v1 = vld [vmem:[%s8745_s11] ss:$0 sm:$0xff]  ;;  %v6168_v4 = vld [vmem:[%s8744_s10 + $0x3] ss:$0 sm:$0xff] }
 0x709   : > { %1735 = vrot.lane.b32.xlu0 %v1718_v59, %s8819_s20  ;;  %v1815_v14 = vmul.f32 %v1801_v7, %v7838_v23  ;;  %v1804_v16 = vstv %s6684_s30  ;;  %v6165_v22 = vld [vmem:[%s8743_s9 + $0x2] ss:$0 sm:$0xff]  ;;  %v6172_v30 = vld [vmem:[%s8742_s8 + $0x5] ss:$0 sm:$0xff] }
 0x70a   : > { %v1836_v50 = vrot.slane %v1811_v31, 2  ;;  %v1843_v32 = vrot.slane %v1816_v0, 2  ;;  %v1818_v51 = vmul.f32 %v1804_v16, %v7853_v5  ;;  %v1817_v56 = vmul.f32 %v1804_v16, %v7850_v58  ;;  %v6166_v31 = vld [vmem:[%s8743_s9 + $0x3] ss:$0 sm:$0xff]  ;;  %v6175_v7 = vld [vmem:[%s8744_s10 + $0x4] ss:$0 sm:$0xff] }
 0x70b   : > { %v1842_v59 = vrot.slane %v1815_v14, 2  ;;  %v6173_v14 = vld [vmem:[%s8743_s9 + $0x4] ss:$0 sm:$0xff]  ;;  %v6178_v16 = vld [vmem:[%s8745_s11 + $0x5] ss:$0 sm:$0xff] }
 0x70c   : > { %1741 = vrot.lane.b32.xlu1 %v1720_v46, %s8819_s20  ;;  %v1839_v46 = vrot.slane %v1813_v53, 2  ;;  %v1838_v48 = vsel %vm1616_vm0, %v1836_v50, %v1837_v13  ;;  %v1845_v38 = vrot.slane %v1817_v56, 2  ;;  %v6171_v50 = vld [vmem:[%s8742_s8 + $0x4] ss:$0 sm:$0xff]  ;;  %v6176_v53 = vld [vmem:[%s8744_s10 + $0x5] ss:$0 sm:$0xff] }
 0x70d   : > { %1739 = vrot.lane.b32.xlu0 %v1721_v34, %s8819_s20  ;;  %v1844_v34 = vsel %vm1616_vm0, %v1842_v59, %v1843_v32 }
 0x70e   : > { %v1841_v18 = vsel %vm1616_vm0, %v1839_v46, %v1840_v63 }
 0x710   : > { %1745 = vrot.lane.b32.xlu1 %v1723_v8, %s8819_s20  ;;  %v1846_v8 = vrot.slane %v1818_v51, 2 }
 0x711   : > { %1743 = vrot.lane.b32.xlu0 %v1724_v17, %s8819_s20  ;;  %v6158_v17 = vld [vmem:[%s8743_s9 + $0x1] ss:$0 sm:$0xff] }
 0x712   : > { %v1847_v28 = vsel %vm1616_vm0, %v1845_v38, %v1846_v8 }
 0x714   : > { %1749 = vrot.lane.b32.xlu1 %v1726_v41, %s8819_s20 }
 0x715   : > { %1747 = vrot.lane.b32.xlu0 %v1727_v25, %s8819_s20  ;;  %v6167_v25 = vld [vmem:[%s8744_s10 + $0x2] ss:$0 sm:$0xff] }
 0x718   : > { %1753 = vrot.lane.b32.xlu1 %v1729_v33, %s8819_s20  ;;  %v6157_v33 = vld [vmem:[%s8743_s9] ss:$0 sm:$0xff] }
 0x719   : > { %1751 = vrot.lane.b32.xlu0 %v1730_v37, %s8819_s20  ;;  %s6686_s20 = spop %6685  ;;  %v6170_v37 = vld [vmem:[%s8745_s11 + $0x3] ss:$0 sm:$0xff] }
 0x71a   : > { %v1807_v9 = vstv %s6686_s20 }
 0x71b   : > { %v1820_v21 = vmul.f32 %v1807_v9, %v7867_v11  ;;  %v1819_v24 = vmul.f32 %v1807_v9, %v7864_v12 }
 0x71c   : > { %1853 = vrot.lane.b32.xlu1 %v1834_v42, %s8818_s29  ;;  %v6164_v42 = vld [vmem:[%s8742_s8 + $0x3] ss:$0 sm:$0xff] }
 0x71d   : > { %1851 = vrot.lane.b32.xlu0 %v1835_v45, %s8818_s29  ;;  %v1849_v60 = vrot.slane %v1820_v21, 2  ;;  %v1848_v41 = vrot.slane %v1819_v24, 2  ;;  %v6174_v45 = vld [vmem:[%s8743_s9 + $0x5] ss:$0 sm:$0xff]  ;;  %v1587_v24 = vstv %s8367_s26 }
 0x71f   : > { %v1850_v10 = vsel %vm1616_vm0, %v1848_v41, %v1849_v60 }
 0x720   : > { %1857 = vrot.lane.b32.xlu1 %v1837_v13, %s8818_s29  ;;  %v6169_v13 = vld [vmem:[%s8745_s11 + $0x2] ss:$0 sm:$0xff] }
 0x721   : > { %1855 = vrot.lane.b32.xlu0 %v1838_v48, %s8818_s29  ;;  %v1581_v48 = vstv %s8362_s23  ;;  %s8820_s23 = sshll.u32 %s8822_s22, 6 }
 0x722   : > { %v1596_v56 = vmul.f32 %v1581_v48, %v7826_v55 }
 0x724   : > { %1861 = vrot.lane.b32.xlu1 %v1840_v63, %s8818_s29  ;;  %v1578_v63 = vstv %s8358_s28 }
 0x725   : > { %1859 = vrot.lane.b32.xlu0 %v1841_v18, %s8818_s29  ;;  %v1594_v0 = vmul.f32 %v1578_v63, %v7814_v36  ;;  %v1595_v46 = vmul.f32 %v1578_v63, %v7817_v49  ;;  %v1597_v36 = vmul.f32 %v1581_v48, %v7829_v35  ;;  %v6177_v49 = vld [vmem:[%s8745_s11 + $0x4] ss:$0 sm:$0xff] }
 0x727   : > { %v1620_v51 = vrot.slane %v1594_v0, 2  ;;  %v1621_v59 = vrot.slane %v1595_v46, 2  ;;  %v1624_v55 = vrot.slane %v1597_v36, 2 }
 0x728   : > { %1865 = vrot.lane.b32.xlu1 %v1843_v32, %s8818_s29  ;;  %v1584_v32 = vstv %s8365_s24 }
 0x729   : > { %1863 = vrot.lane.b32.xlu0 %v1844_v34, %s8818_s29  ;;  %v1598_v21 = vmul.f32 %v1584_v32, %v7838_v23  ;;  %v1599_v38 = vmul.f32 %v1584_v32, %v7841_v26  ;;  %v1622_v35 = vsel %vm1616_vm0, %v1620_v51, %v1621_v59  ;;  %v1600_v23 = vmul.f32 %v1587_v24, %v7850_v58 }
 0x72a   : > { %v1601_v26 = vmul.f32 %v1587_v24, %v7853_v5 }
 0x72c   : > { %1869 = vrot.lane.b32.xlu1 %v1846_v8, %s8818_s29  ;;  %v1630_v58 = vrot.slane %v1601_v26, 2 }
 0x72d   : > { %1867 = vrot.lane.b32.xlu0 %v1847_v28, %s8818_s29 }
 0x730   : > { %1873 = vrot.lane.b32.xlu1 %v1849_v60, %s8818_s29  ;;  %v1623_v60 = vrot.slane %v1596_v56, 2 }
 0x731   : > { %1871 = vrot.lane.b32.xlu0 %v1850_v10, %s8818_s29 }
 0x734   : > { %5599 = vperm.xlu1 %6702, %v6156_v15  }
 0x735   : > { %5595 = vperm.xlu0 %6701, %v6155_v43  }
 0x738   : > { %5621 = vperm.xlu1 %6702, %v6158_v17   ;;  %v1626_v17 = vrot.slane %v1598_v21, 2 }
 0x739   : > { %5617 = vperm.xlu0 %6701, %v6157_v33  }
 0x73c   : > { %5647 = vperm.xlu1 %6702, %v6160_v40   ;;  %v1625_v40 = vsel %vm1616_vm0, %v1623_v60, %v1624_v55 }
 0x73d   : > { %5643 = vperm.xlu0 %6701, %v6159_v62  }
 0x740   : > { %5727 = vperm.xlu1 %6702, %v6163_v54  }
 0x741   : > { %5665 = vperm.xlu0 %6701, %v6161_v1  }
 0x744   : > { %5775 = vperm.xlu1 %6702, %v6167_v25  }
 0x745   : > { %5731 = vperm.xlu0 %6701, %v6164_v42   ;;  %v1590_v42 = vstv %s8369_s17  ;;  %s521_s17 = scalar_lea.vmem %s8750_s16, %s8820_s23 }
 0x748   : > { %5669 = vperm.xlu1 %6702, %v6162_v20   ;;  %v1629_v20 = vrot.slane %v1600_v23, 2  ;;  %v6550_v23 = vpop.f32.mrf.mxu1 }
 0x749   : > { %5779 = vperm.xlu0 %6701, %v6168_v4  }
 0x74c   : > { %5753 = vperm.xlu1 %6702, %v6166_v31  }
 0x74d   : > { %5749 = vperm.xlu0 %6701, %v6165_v22   ;;  %v1603_v22 = vmul.f32 %v1590_v42, %v7867_v11 }
 0x750   : > { %5801 = vperm.xlu1 %6702, %v6170_v37  }
 0x751   : > { %5797 = vperm.xlu0 %6701, %v6169_v13  }
 0x754   : > { %5863 = vperm.xlu1 %6702, %v6172_v30   ;;  %v1602_v30 = vmul.f32 %v1590_v42, %v7864_v12 }
 0x755   : > { %5859 = vperm.xlu0 %6701, %v6171_v50  }
 0x756   : > { %v1632_v0 = vrot.slane %v1602_v30, 2 }
 0x758   : > { %5911 = vperm.xlu1 %6702, %v6176_v53  }
 0x759   : > { %5907 = vperm.xlu0 %6701, %v6175_v7  }
 0x75c   : > { %5885 = vperm.xlu1 %6702, %v6174_v45   ;;  %v1633_v45 = vrot.slane %v1603_v22, 2 }
 0x75d   : > { %5881 = vperm.xlu0 %6701, %v6173_v14  }
 0x75e   : > { %v1634_v12 = vsel %vm1616_vm0, %v1632_v0, %v1633_v45 }
 0x760   : > { %5933 = vperm.xlu1 %6702, %v6178_v16  }
 0x761   : > { %5929 = vperm.xlu0 %6701, %v6177_v49  }
 0x762   : > { %v1527_v9 = vpop.permute.xlu1 %1526 }
 0x763   : > { %v1559_v18 = vadd.f32 %v1527_v9, %v8301_v2  ;;  %v1525_v8 = vpop.permute.xlu0 %1524 }
 0x764   : > { %v1558_v34 = vadd.f32 %v1525_v8, %v8327_v27  ;;  %v1627_v27 = vrot.slane %v1599_v38, 2  ;;  %v6543_v38 = vpop.f32.mrf.mxu0 }
 0x765   : > { %v1650_v41 = vadd.f32 %v1621_v59, %v1559_v18 }
 0x766   : > { %v1531_v28 = vpop.permute.xlu1 %1530  ;;  %v8537_v15 = vadd.f32 %v1622_v35, %v1558_v34  ;;  %v1628_v5 = vsel %vm1616_vm0, %v1626_v17, %v1627_v27 }
 0x767   : > { %v1561_v2 = vadd.f32 %v1531_v28, %v8305_v57  ;;  %v1529_v10 = vpop.permute.xlu0 %1528 }
 0x768   : > { %v1560_v43 = vadd.f32 %v1529_v10, %v8330_v44  ;;  %v5106_v10 = vpop.f32.mrf.mxu0 }
 0x769   : > { %v1652_v33 = vadd.f32 %v1624_v55, %v1561_v2 }
 0x76a   : > { %v1535_v62 = vpop.permute.xlu1 %1534  ;;  %v8544_v54 = vadd.f32 %v1625_v40, %v1560_v43 }
 0x76b   : > { %v1563_v1 = vadd.f32 %v1535_v62, %v8312_v6  ;;  %v1533_v25 = vpop.permute.xlu0 %1532 }
 0x76c   : > { %v1562_v57 = vadd.f32 %v1533_v25, %v8336_v29  ;;  %v1631_v29 = vsel %vm1616_vm0, %v1629_v20, %v1630_v58 }
 0x76d   : > { %v1654_v4 = vadd.f32 %v1627_v27, %v1563_v1 }
 0x76e   : > { %v1539_v44 = vpop.permute.xlu1 %1538  ;;  %v8550_v31 = vadd.f32 %v1628_v5, %v1562_v57 }
 0x76f   : > { %v1565_v37 = vadd.f32 %v1539_v44, %v8319_v3  ;;  %v1537_v13 = vpop.permute.xlu0 %1536  ;;  %v5187_v44 = vpop.f32.mrf.mxu1 }
 0x770   : > { %v1564_v6 = vadd.f32 %v1537_v13, %v8340_v52 }
 0x771   : > { %v8556_v50 = vadd.f32 %v1630_v58, %v1565_v37 }
 0x772   : > { %v1543_v53 = vpop.permute.xlu1 %1542  ;;  %v8559_v7 = vadd.f32 %v1631_v29, %v1564_v6 }
 0x773   : > { %v1567_v63 = vadd.f32 %v1543_v53, %v8324_v39  ;;  %v1541_v11 = vpop.permute.xlu0 %1540  ;;  %v6564_v53 = vpop.f32.mrf.mxu1 }
 0x774   : > { %v1566_v14 = vadd.f32 %v1541_v11, %v8347_v47 }
 0x775   : > { %v8562_v46 = vadd.f32 %v1633_v45, %v1567_v63 }
 0x776   : > { %v1734_v3 = vpop.permute.xlu1 %1733  ;;  %v8566_v52 = vadd.f32 %v1634_v12, %v1566_v14 }
 0x777   : > { %v1732_v16 = vpop.permute.xlu0 %1731  ;;  %v1768_v18 = vadd.f32 %v1734_v3, %v8405_v61 }
 0x778   : > { %v1767_v24 = vadd.f32 %v1732_v16, %v8410_v19  ;;  %v8577_v19 = vpop.f32.mrf.mxu0 }
 0x77a   : > { %v1738_v48 = vpop.permute.xlu1 %1737  ;;  %v5268_v29 = vpop.f32.mrf.mxu0 }
 0x77b   : > { %v1736_v32 = vpop.permute.xlu0 %1735  ;;  %v1770_v34 = vadd.f32 %v1738_v48, %v1650_v41 }
 0x77c   : > { %v1769_v26 = vadd.f32 %v1736_v32, %v8537_v15 }
 0x77e   : > { %v1742_v51 = vpop.permute.xlu1 %1741 }
 0x77f   : > { %v1740_v59 = vpop.permute.xlu0 %1739  ;;  %v1772_v17 = vadd.f32 %v1742_v51, %v1652_v33 }
 0x780   : > { %v1771_v57 = vadd.f32 %v1740_v59, %v8544_v54 }
 0x782   : > { %v1746_v56 = vpop.permute.xlu1 %1745 }
 0x783   : > { %v1744_v36 = vpop.permute.xlu0 %1743  ;;  %v1774_v20 = vadd.f32 %v1746_v56, %v1654_v4 }
 0x784   : > { %v1773_v54 = vadd.f32 %v1744_v36, %v8550_v31 }
 0x786   : > { %v1750_v49 = vpop.permute.xlu1 %1749 }
 0x787   : > { %v1748_v39 = vpop.permute.xlu0 %1747  ;;  %v1776_v0 = vadd.f32 %v1750_v49, %v8556_v50  ;;  %v6571_v49 = vpop.f32.mrf.mxu0 }
 0x788   : > { %v1775_v11 = vadd.f32 %v1748_v39, %v8559_v7  ;;  %v5349_v7 = vpop.f32.mrf.mxu1 }
 0x78a   : > { %v8568_v9 = vpop.permute.xlu1 %1753 }
 0x78b   : > { %v8571_v8 = vpop.permute.xlu0 %1751 }
 0x78e   : > { %v1854_v47 = vpop.permute.xlu1 %1853 }
 0x78f   : > { %v1888_v21 = vadd.f32 %v1854_v47, %v1768_v18  ;;  %v1852_v60 = vpop.permute.xlu0 %1851 }
 0x790   : > { %v1887_v28 = vadd.f32 %v1852_v60, %v1767_v24 }
 0x791   : > { %v5545_v35 = vadd.f32 %v6543_v38, %v1888_v21 }
 0x792   : > { %v1858_v55 = vpop.permute.xlu1 %1857  ;;  %v5544_v40 = vadd.f32 %v5106_v10, %v1887_v28 }
 0x793   : > { %v1890_v2 = vadd.f32 %v1858_v55, %v1770_v34  ;;  %v1856_v61 = vpop.permute.xlu0 %1855 }
 0x794   : > { %v1889_v1 = vadd.f32 %v1856_v61, %v1769_v26  ;;  %v1777_v61 = vadd.f32 %v8571_v8, %v8566_v52 }
 0x795   : > { %v5547_v43 = vadd.f32 %v5545_v35, %v1890_v2 }
 0x796   : > { %v1862_v27 = vpop.permute.xlu1 %1861  ;;  %v5546_v42 = vadd.f32 %v5544_v40, %v1889_v1 }
 0x797   : > { %v5549_v62 = vadd.f32 %v6550_v23, %v5547_v43  ;;  %v8575_v25 = vadd.f32 %v1862_v27, %v1772_v17  ;;  %v1860_v58 = vpop.permute.xlu0 %1859 }
 0x798   : > { %v5548_v37 = vadd.f32 %v5546_v42, %v5187_v44  ;;  %v8588_v30 = vadd.f32 %v1860_v58, %v1771_v57 }
 0x799   : > { %v5551_v41 = vmul.f32 0.25, %v5549_v62  ;;  %v5677_v13 = vadd.f32 %v8577_v19, %v8575_v25  ;;  %v6578_v62 = vpop.f32.mrf.mxu1 }
 0x79a   : > { %v1866_v5 = vpop.permute.xlu1 %1865  ;;  %v5550_v3 = vmul.f32 0.25, %v5548_v37  ;;  %v5676_v32 = vadd.f32 %v5268_v29, %v8588_v30 }
 0x79b   : > { %v8580_v15 = vsub.f32 %v1888_v21, %v5551_v41  ;;  %v8582_v33 = vsub.f32 %v1890_v2, %v5551_v41  ;;  %v8584_v22 = vsub.f32 %v6543_v38, %v5551_v41  ;;  %v1894_v6 = vadd.f32 %v1866_v5, %v1774_v20  ;;  %v1864_v12 = vpop.permute.xlu0 %1863 }
 0x79c   : > { %v8591_v4 = vsub.f32 %v6550_v23, %v5551_v41  ;;  %v1893_v51 = vadd.f32 %v1864_v12, %v1773_v54  ;;  %v8602_v59 = vsub.f32 %v1887_v28, %v5550_v3  ;;  %v8604_v56 = vsub.f32 %v1889_v1, %v5550_v3 }
 0x79d   : > { %v5561_v45 = vmul.f32 %v8580_v15, %v8580_v15  ;;  %v5563_v63 = vmul.f32 %v8584_v22, %v8584_v22  ;;  %v5679_v14 = vadd.f32 %v5677_v13, %v1894_v6  ;;  %v5567_v31 = vmul.f32 %v8582_v33, %v8582_v33 }
 0x79e   : > { %v1870_v16 = vpop.permute.xlu1 %1869  ;;  %v8606_v36 = vsub.f32 %v5106_v10, %v5550_v3  ;;  %v5571_v18 = vmul.f32 %v8591_v4, %v8591_v4  ;;  %v5678_v21 = vadd.f32 %v5676_v32, %v1893_v51  ;;  %v1778_v38 = vadd.f32 %v8568_v9, %v8562_v46  ;;  %v5430_v9 = vpop.f32.mrf.mxu0 }
 0x79f   : > { %v5565_v48 = vadd.f32 %v5563_v63, %v5561_v45  ;;  %v1896_v50 = vadd.f32 %v1870_v16, %v1776_v0  ;;  %v5681_v47 = vadd.f32 %v6564_v53, %v5679_v14  ;;  %v8612_v24 = vsub.f32 %v5187_v44, %v5550_v3  ;;  %v1868_v55 = vpop.permute.xlu0 %1867  ;;  %v5511_v0 = vpop.f32.mrf.mxu1 }
 0x7a0   : > { %v5560_v34 = vmul.f32 %v8602_v59, %v8602_v59  ;;  %v5562_v60 = vmul.f32 %v8606_v36, %v8606_v36  ;;  %v5680_v10 = vadd.f32 %v5678_v21, %v5349_v7  ;;  %v1895_v23 = vadd.f32 %v1868_v55, %v1775_v11 }
 0x7a1   : > { %v5569_v39 = vadd.f32 %v5567_v31, %v5565_v48  ;;  %v5683_v2 = vmul.f32 0.25, %v5681_v47  ;;  %v5566_v43 = vmul.f32 %v8604_v56, %v8604_v56  ;;  %v5809_v17 = vadd.f32 %v6571_v49, %v1896_v50 }
 0x7a2   : > { %v1874_v35 = vpop.permute.xlu1 %1873  ;;  %v5564_v26 = vadd.f32 %v5562_v60, %v5560_v34  ;;  %v5570_v41 = vmul.f32 %v8612_v24, %v8612_v24  ;;  %v5682_v42 = vmul.f32 0.25, %v5680_v10  ;;  %v5808_v44 = vadd.f32 %v5430_v9, %v1895_v23 }
 0x7a3   : > { %v5573_v28 = vadd.f32 %v5571_v18, %v5569_v39  ;;  %v1898_v46 = vadd.f32 %v1874_v35, %v1778_v38  ;;  %v8622_v40 = vsub.f32 %v1894_v6, %v5683_v2  ;;  %v1872_v20 = vpop.permute.xlu0 %1871  ;;  %v8627_v5 = vsub.f32 %v8577_v19, %v5683_v2 }
 0x7a4   : > { %v5568_v1 = vadd.f32 %v5566_v43, %v5564_v26  ;;  %v1897_v37 = vadd.f32 %v1872_v20, %v1777_v61  ;;  %v8629_v54 = vsub.f32 %v6564_v53, %v5683_v2  ;;  %v8631_v52 = vsub.f32 %v1893_v51, %v5682_v42 }
 0x7a5   : > { %v5575_v27 = vmul.f32 0.25, %v5573_v28  ;;  %v5811_v57 = vadd.f32 %v5809_v17, %v1898_v46  ;;  %v8633_v8 = vsub.f32 %v5268_v29, %v5682_v42  ;;  %v8636_v63 = vsub.f32 %v8588_v30, %v5682_v42 }
 0x7a6   : > { %v5572_v13 = vadd.f32 %v5570_v41, %v5568_v1  ;;  %v5810_v45 = vadd.f32 %v5808_v44, %v1897_v37  ;;  %v5699_v19 = vmul.f32 %v8622_v40, %v8622_v40  ;;  %v8641_v3 = vsub.f32 %v8575_v25, %v5683_v2 }
 0x7a7   : > { %v5577_v58 = vadd.f32 1e-06, %v5575_v27  ;;  %v5813_v6 = vadd.f32 %v6578_v62, %v5811_v57  ;;  %v5692_v29 = vmul.f32 %v8636_v63, %v8636_v63  ;;  %v5694_v12 = vmul.f32 %v8633_v8, %v8633_v8 }
 0x7a8   : > { %v5574_v11 = vmul.f32 0.25, %v5572_v13  ;;  %v5812_v14 = vadd.f32 %v5810_v45, %v5511_v0  ;;  %v8647_v48 = vsub.f32 %v5349_v7, %v5682_v42  ;;  %v5693_v30 = vmul.f32 %v8641_v3, %v8641_v3 }
 0x7a9   : > { %6707 = vrsqrt.f32 %v5577_v58  ;;  %v5815_v53 = vmul.f32 0.25, %v5813_v6  ;;  %v5695_v31 = vmul.f32 %v8627_v5, %v8627_v5  ;;  %v5703_v25 = vmul.f32 %v8629_v54, %v8629_v54 }
 0x7aa   : > { %v5576_v16 = vadd.f32 1e-06, %v5574_v11  ;;  %v5814_v18 = vmul.f32 0.25, %v5812_v14  ;;  %v5696_v47 = vadd.f32 %v5694_v12, %v5692_v29  ;;  %v5698_v21 = vmul.f32 %v8631_v52, %v8631_v52 }
 0x7ab   : > { %v8655_v32 = vsub.f32 %v1896_v50, %v5815_v53  ;;  %v8657_v51 = vsub.f32 %v1898_v46, %v5815_v53  ;;  %v8659_v39 = vsub.f32 %v6571_v49, %v5815_v53  ;;  %v5697_v7 = vadd.f32 %v5695_v31, %v5693_v30 }
 0x7ac   : > { %6709 = vrsqrt.f32 %v5576_v16  ;;  %v8663_v38 = vsub.f32 %v6578_v62, %v5815_v53  ;;  %v5702_v49 = vmul.f32 %v8647_v48, %v8647_v48  ;;  %v8671_v55 = vsub.f32 %v1895_v23, %v5814_v18 }
 0x7ad   : > { %v5825_v34 = vmul.f32 %v8655_v32, %v8655_v32  ;;  %v5827_v50 = vmul.f32 %v8659_v39, %v8659_v39  ;;  %v8673_v35 = vsub.f32 %v1897_v37, %v5814_v18  ;;  %v8675_v28 = vsub.f32 %v5430_v9, %v5814_v18 }
 0x7ae   : > { %v5831_v10 = vmul.f32 %v8657_v51, %v8657_v51  ;;  %v5700_v26 = vadd.f32 %v5698_v21, %v5696_v47  ;;  %v5701_v43 = vadd.f32 %v5699_v19, %v5697_v7  ;;  %v8679_v17 = vsub.f32 %v5511_v0, %v5814_v18 }
 0x7af   : > { %v5600_v60 = vpop.permute.xlu1 %5599  ;;  %v5829_v2 = vadd.f32 %v5827_v50, %v5825_v34  ;;  %v5824_v46 = vmul.f32 %v8671_v55, %v8671_v55  ;;  %v5826_v61 = vmul.f32 %v8675_v28, %v8675_v28  ;;  %v5835_v27 = vmul.f32 %v8663_v38, %v8663_v38 }
 0x7b0   : > { %v5596_v9 = vpop.permute.xlu0 %5595  ;;  %v5704_v1 = vadd.f32 %v5702_v49, %v5700_v26  ;;  %v5705_v41 = vadd.f32 %v5703_v25, %v5701_v43  ;;  %v5830_v57 = vmul.f32 %v8673_v35, %v8673_v35  ;;  %v5834_v6 = vmul.f32 %v8679_v17, %v8679_v17 }
 0x7b1   : > { %v5833_v23 = vadd.f32 %v5831_v10, %v5829_v2  ;;  %v5828_v42 = vadd.f32 %v5826_v61, %v5824_v46 }
 0x7b2   : > { %v5706_v58 = vmul.f32 0.25, %v5704_v1  ;;  %v5707_v44 = vmul.f32 0.25, %v5705_v41 }
 0x7b3   : > { %v5622_v62 = vpop.permute.xlu1 %5621  ;;  %v5837_v20 = vadd.f32 %v5835_v27, %v5833_v23  ;;  %v5832_v13 = vadd.f32 %v5830_v57, %v5828_v42 }
 0x7b4   : > { %v5618_v19 = vpop.permute.xlu0 %5617  ;;  %v5708_v16 = vadd.f32 1e-06, %v5706_v58  ;;  %v5709_v31 = vadd.f32 1e-06, %v5707_v44 }
 0x7b5   : > { %v5839_v45 = vmul.f32 0.25, %v5837_v20  ;;  %v5836_v29 = vadd.f32 %v5834_v6, %v5832_v13 }
 0x7b6   : > { %v6708_v37 = vpop.eup %6707  ;;  %6711 = vrsqrt.f32 %v5708_v16 }
 0x7b7   : > { %v5583_v0 = vmul.f32 %v6708_v37, %v8582_v33  ;;  %v5581_v11 = vmul.f32 %v6708_v37, %v8580_v15  ;;  %v5631_v53 = vmul.f32 %v6708_v37, %v8591_v4  ;;  %v5648_v14 = vpop.permute.xlu1 %5647  ;;  %v5629_v12 = vmul.f32 %v6708_v37, %v8584_v22 }
 0x7b8   : > { %v5841_v30 = vadd.f32 1e-06, %v5839_v45  ;;  %v5838_v25 = vmul.f32 0.25, %v5836_v29  ;;  %v5644_v47 = vpop.permute.xlu0 %5643 }
 0x7b9   : > { %v6710_v18 = vpop.eup %6709  ;;  %v5605_v49 = vmul.f32 %v5600_v60, %v5583_v0  ;;  %v5603_v2 = vmul.f32 %v5596_v9, %v5581_v11  ;;  %v5653_v23 = vmul.f32 %v5648_v14, %v5631_v53 }
 0x7ba   : > { %6713 = vrsqrt.f32 %v5841_v30  ;;  %v5840_v21 = vadd.f32 1e-06, %v5838_v25  ;;  %v5582_v33 = vmul.f32 %v6710_v18, %v8604_v56  ;;  %v5580_v15 = vmul.f32 %v6710_v18, %v8602_v59 }
 0x7bb   : > { %v5728_v7 = vpop.permute.xlu1 %5727  ;;  %v5630_v4 = vmul.f32 %v6710_v18, %v8612_v24  ;;  %v5628_v34 = vmul.f32 %v6710_v18, %v8606_v36  ;;  %6715 = vrsqrt.f32 %v5709_v31  ;;  %v5627_v27 = vadd.f32 %v5622_v62, %v5605_v49 }
 0x7bc   : > { %6717 = vrsqrt.f32 %v5840_v21  ;;  %v5666_v22 = vpop.permute.xlu0 %5665  ;;  %v5604_v10 = vmul.f32 %v5600_v60, %v5582_v33  ;;  %v5602_v26 = vmul.f32 %v5596_v9, %v5580_v15  ;;  %v5625_v56 = vadd.f32 %v5618_v19, %v5603_v2 }
 0x7bd   : > { %v5652_v61 = vmul.f32 %v5648_v14, %v5630_v4  ;;  %v5650_v1 = vmul.f32 %v5644_v47, %v5628_v34  ;;  %v5651_v59 = vmul.f32 %v5644_v47, %v5629_v12 }
 0x7be   : > { %v5626_v24 = vadd.f32 %v5622_v62, %v5604_v10  ;;  %v5624_v42 = vadd.f32 %v5618_v19, %v5602_v26 }
 0x7bf   : > { %v5776_v50 = vpop.permute.xlu1 %5775  ;;  %v5672_v2 = vadd.f32 %v5666_v22, %v5650_v1  ;;  %v5673_v10 = vadd.f32 %v5666_v22, %v5651_v59 }
 0x7c0   : > { %v5732_v43 = vpop.permute.xlu0 %5731 }
 0x7c3   : > { %v5670_v46 = vpop.permute.xlu1 %5669  ;;  %v6712_v41 = vpop.eup %6711 }
 0x7c4   : > { %v5674_v36 = vadd.f32 %v5670_v46, %v5652_v61  ;;  %v5675_v57 = vadd.f32 %v5670_v46, %v5653_v23  ;;  %v5780_v20 = vpop.permute.xlu0 %5779  ;;  %v5712_v37 = vmul.f32 %v6712_v41, %v8636_v63  ;;  %v5760_v60 = vmul.f32 %v6712_v41, %v8633_v8 }
 0x7c5   : > { %v5714_v9 = vmul.f32 %v6712_v41, %v8631_v52  ;;  %v5762_v13 = vmul.f32 %v6712_v41, %v8647_v48 }
 0x7c6   : > { %v5734_v19 = vmul.f32 %v5728_v7, %v5712_v37  ;;  %v5782_v53 = vmul.f32 %v5776_v50, %v5760_v60 }
 0x7c7   : > { %v5754_v58 = vpop.permute.xlu1 %5753  ;;  %v6714_v44 = vpop.eup %6713  ;;  %v5736_v14 = vmul.f32 %v5732_v43, %v5714_v9  ;;  %v5784_v63 = vmul.f32 %v5780_v20, %v5762_v13 }
 0x7c8   : > { %v5847_v6 = vmul.f32 %v6714_v44, %v8657_v51  ;;  %v5845_v45 = vmul.f32 %v6714_v44, %v8655_v32  ;;  %v5895_v62 = vmul.f32 %v6714_v44, %v8663_v38  ;;  %v8707_v0 = vmul.f32 %v6714_v44, %v8659_v39  ;;  %v6716_v11 = vpop.eup %6715  ;;  %v5750_v32 = vpop.permute.xlu0 %5749 }
 0x7c9   : > { %v6718_v29 = vpop.eup %6717  ;;  %v5713_v8 = vmul.f32 %v6716_v11, %v8641_v3  ;;  %v5761_v52 = vmul.f32 %v6716_v11, %v8627_v5  ;;  %v5715_v48 = vmul.f32 %v6716_v11, %v8622_v40  ;;  %v5763_v51 = vmul.f32 %v6716_v11, %v8629_v54 }
 0x7ca   : > { %v5758_v38 = vadd.f32 %v5754_v58, %v5736_v14  ;;  %v5756_v16 = vadd.f32 %v5750_v32, %v5734_v19  ;;  %v5846_v30 = vmul.f32 %v6718_v29, %v8673_v35  ;;  %v5844_v5 = vmul.f32 %v6718_v29, %v8671_v55 }
 0x7cb   : > { %v5802_v12 = vpop.permute.xlu1 %5801  ;;  %v5735_v31 = vmul.f32 %v5728_v7, %v5713_v8  ;;  %v5783_v25 = vmul.f32 %v5776_v50, %v5761_v52  ;;  %v5737_v18 = vmul.f32 %v5732_v43, %v5715_v48  ;;  %v5785_v47 = vmul.f32 %v5780_v20, %v5763_v51 }
 0x7cc   : > { %v5806_v39 = vadd.f32 %v5802_v12, %v5784_v63  ;;  %v5942_v21 = vmul.f32 %v5758_v38, %v5626_v24  ;;  %v5940_v33 = vmul.f32 %v5756_v16, %v5624_v42  ;;  %v5798_v54 = vpop.permute.xlu0 %5797  ;;  %v5894_v49 = vmul.f32 %v6718_v29, %v8679_v17 }
 0x7cd   : > { %v5759_v15 = vadd.f32 %v5754_v58, %v5737_v18  ;;  %v5757_v40 = vadd.f32 %v5750_v32, %v5735_v31  ;;  %v5807_v4 = vadd.f32 %v5802_v12, %v5785_v47  ;;  %v5804_v26 = vadd.f32 %v5798_v54, %v5782_v53 }
 0x7ce   : > { %v5950_v3 = vmul.f32 %v5806_v39, %v5674_v36  ;;  %v5805_v35 = vadd.f32 %v5798_v54, %v5783_v25  ;;  %v5892_v46 = vmul.f32 %v6718_v29, %v8675_v28 }
 0x7cf   : > { %v5864_v34 = vpop.permute.xlu1 %5863  ;;  %v5943_v7 = vmul.f32 %v5759_v15, %v5627_v27  ;;  %v5941_v50 = vmul.f32 %v5757_v40, %v5625_v56  ;;  %v5951_v43 = vmul.f32 %v5807_v4, %v5675_v57  ;;  %v5948_v61 = vmul.f32 %v5804_v26, %v5672_v2 }
 0x7d0   : > { %v5949_v23 = vmul.f32 %v5805_v35, %v5673_v10  ;;  %v5860_v55 = vpop.permute.xlu0 %5859  ;;  %v5868_v24 = vmul.f32 %v5864_v34, %v5846_v30  ;;  %v5869_v42 = vmul.f32 %v5864_v34, %v5847_v6 }
 0x7d1   : > { %v5866_v1 = vmul.f32 %v5860_v55, %v5844_v5  ;;  %v5867_v22 = vmul.f32 %v5860_v55, %v5845_v45 }
 0x7d3   : > { %v5912_v41 = vpop.permute.xlu1 %5911 }
 0x7d4   : > { %v5908_v36 = vpop.permute.xlu0 %5907  ;;  %v5916_v27 = vmul.f32 %v5912_v41, %v5894_v49  ;;  %v5917_v28 = vmul.f32 %v5912_v41, %v5895_v62 }
 0x7d5   : > { %v5914_v6 = vmul.f32 %v5908_v36, %v5892_v46  ;;  %v5915_v45 = vmul.f32 %v5908_v36, %v8707_v0 }
 0x7d7   : > { %v5886_v20 = vpop.permute.xlu1 %5885 }
 0x7d8   : > { %v5890_v58 = vadd.f32 %v5886_v20, %v5868_v24  ;;  %v5891_v17 = vadd.f32 %v5886_v20, %v5869_v42  ;;  %v5882_v57 = vpop.permute.xlu0 %5881 }
 0x7d9   : > { %v5888_v37 = vadd.f32 %v5882_v57, %v5866_v1  ;;  %v5889_v60 = vadd.f32 %v5882_v57, %v5867_v22 }
 0x7da   : > { %v5946_v56 = vadd.f32 %v5942_v21, %v5890_v58  ;;  %v5947_v59 = vadd.f32 %v5943_v7, %v5891_v17 }
 0x7db   : > { %v5934_v44 = vpop.permute.xlu1 %5933  ;;  %v5944_v11 = vadd.f32 %v5940_v33, %v5888_v37  ;;  %v5945_v19 = vadd.f32 %v5941_v50, %v5889_v60 }
 0x7dc   : > { %5961 = vst.msk [vmem:[%s521_s17 + $0x20] sm:$0xff] %vm1911_vm1, %v5946_v56  ;;  %v5938_v9 = vadd.f32 %v5934_v44, %v5916_v27  ;;  %v5939_v13 = vadd.f32 %v5934_v44, %v5917_v28  ;;  %v5930_v62 = vpop.permute.xlu0 %5929 }
 0x7dd   : > { %5962 = vst.msk [vmem:[%s521_s17 + $0x28] sm:$0x3f] %vm5957_vm8, %v5947_v59  ;;  %5958 = vst.msk [vmem:[%s521_s17 + $0x8] sm:$0x3f] %vm5957_vm8, %v5945_v19  ;;  %v5936_v63 = vadd.f32 %v5930_v62, %v5914_v6  ;;  %v5937_v29 = vadd.f32 %v5930_v62, %v5915_v45 }
 0x7de   : > { %v5954_v53 = vadd.f32 %v5950_v3, %v5938_v9  ;;  %v5955_v14 = vadd.f32 %v5951_v43, %v5939_v13  ;;  %5956 = vst.msk [vmem:[%s521_s17] sm:$0xff] %vm1911_vm1, %v5944_v11 }
 0x7df   : > { %v5952_v8 = vadd.f32 %v5948_v61, %v5936_v63  ;;  %v5953_v52 = vadd.f32 %v5949_v23, %v5937_v29 }
 0x7e0   : > { %5963 = vst.msk [vmem:[%s521_s17 + $0x30] sm:$0xff] %vm1911_vm1, %v5954_v53 }
 0x7e1   : > { %5964 = vst.msk [vmem:[%s521_s17 + $0x38] sm:$0x3f] %vm5957_vm8, %v5955_v14  ;;  %5960 = vst.msk [vmem:[%s521_s17 + $0x18] sm:$0x3f] %vm5957_vm8, %v5953_v52 }
 0x7e2   : > { %5959 = vst.msk [vmem:[%s521_s17 + $0x10] sm:$0xff] %vm1911_vm1, %v5952_v8 }
 0x7e3 PF: > { %s26_s21 = sadd.s32 1, %s6728_s21  }
 0x7e4   : > { %p23_p4 = scmp.ge.s32.totalorder %s26_s21, 4  }
 0x7e6   :  { %25 = sbr.rel (!%p23_p4) target bundleno = 4 (0x4), region = 114 }

</bundles_post_ra>
